<compile_context>
chip_gen: v6e
topology: v6e:2x2x1
jax: 0.10.0
libtpu: 0.0.40
codegen_flags: <defaults>
</compile_context>

<pallas_src>
import functools

import jax
import jax.numpy as jnp
from jax.experimental import pallas as pl
from jax.experimental.pallas import tpu as pltpu

LANE = 128
SUBLANE = 8
_TIME_CHUNK = 32  # timesteps per hoisted-projection chunk


def _round_up(x, m):
    return ((x + m - 1) // m) * m


def _vmem_limit_bytes():
    # v5e/v6e physical VMEM = 128 MiB, v7x = 64 MiB; defaults (16/32 MiB) are
    # far too small for the weight-resident LSTM kernel at realistic sizes.
    try:
        cap = int(pltpu.get_tpu_info().vmem_capacity_bytes)
    except Exception:  # no device / older jax: assume the smallest (v7x) VMEM
        cap = 64 * 1024 * 1024
    return int(min(0.875 * cap, 100 * 1024 * 1024))


def _sb_spec(block_shape, index_map):
    """BlockSpec with single buffering (grid only varies the batch tile)."""
    try:
        return pl.BlockSpec(block_shape, index_map, pipeline_mode=pl.Buffered(1))
    except Exception:  # older jax without pipeline_mode support
        return pl.BlockSpec(block_shape, index_map)


# ---------------------------------------------------------------------------
# Fused multi-layer LSTM kernel. One grid step = one batch tile; the whole
# recurrence (all layers, all timesteps) runs inside the kernel.
# PyTorch gate order: i, f, g, o ; gates = x @ W_ih^T + h @ W_hh^T + (b_ih+b_hh)
# Weights are pre-transposed/padded (lane-aligned, per-gate zero padding).
# ---------------------------------------------------------------------------
def _lstm_stack_kernel(x_ref, wih0_ref, wihr_ref, whh_ref, b_ref, h0_ref, c0_ref,
                       hseq_ref, hn_ref, cn_ref,
                       xp_sc, act_sc):
    T, Bt, Ep = x_ref.shape
    num_layers, _, Hp = hn_ref.shape
    H4 = 4 * Hp
    n_slab = act_sc.shape[0]
    n_buf, TC = xp_sc.shape[0], xp_sc.shape[1]
    n_chunks = (T + TC - 1) // TC
    f32 = jnp.float32

    for layer in range(num_layers):
        bias = b_ref[layer]          # (1, 4Hp) f32
        w_hh = whh_ref[layer]        # (Hp, 4Hp) bf16, hoisted out of the loop

        def project(ci, slot, layer=layer, bias=bias):
            # Hoisted input projection for one time chunk: one (Tc*Bt, K)x(K, 4Hp)
            # bf16 MXU matmul with f32 accumulation; result stored bf16.
            t0 = ci * TC
            clen = min(TC, T - t0)
            if layer == 0:
                inp = x_ref[t0:t0 + clen].reshape(clen * Bt, Ep)
                w_in = wih0_ref[...]
            else:
                inp = act_sc[(layer - 1) % n_slab, t0:t0 + clen].reshape(clen * Bt, Hp)
                w_in = wihr_ref[layer - 1]
            xp = jnp.dot(inp, w_in, preferred_element_type=f32) + bias
            xp_sc[slot, 0:clen] = xp.reshape(clen, Bt, H4).astype(xp_sc.dtype)

        last = layer == num_layers - 1
        # last layer writes straight to the output; earlier layers to VMEM scratch
        dst = hseq_ref if last else act_sc.at[layer % n_slab]

        h = h0_ref[layer]            # (Bt, Hp) f32
        c = c0_ref[layer]            # (Bt, Hp) f32

        project(0, 0)
        for ci in range(n_chunks):
            slot = ci % n_buf
            if ci + 1 < n_chunks:
                # No data dependence on chunk ci's recurrence -> the scheduler can
                # overlap this MXU work with the EUP/VPU-bound recurrence below.
                project(ci + 1, (ci + 1) % n_buf)
            t0 = ci * TC
            clen = min(TC, T - t0)
            # TODO(synk): for very long T switch this static unroll to a
            # lax.fori_loop over chunks (pl.ds offsets) to bound compile time.
            for t in range(clen):
                # only the recurrent matmul remains on the serial dependency chain
                gates = xp_sc[slot, t].astype(f32) + jnp.dot(
                    h.astype(jnp.bfloat16), w_hh, preferred_element_type=f32)
                i_g = jax.nn.sigmoid(gates[:, 0 * Hp:1 * Hp])   # lane-aligned slices
                f_g = jax.nn.sigmoid(gates[:, 1 * Hp:2 * Hp])
                g_g = jnp.tanh(gates[:, 2 * Hp:3 * Hp])
                o_g = jax.nn.sigmoid(gates[:, 3 * Hp:4 * Hp])
                c = f_g * c + i_g * g_g                          # f32 cell state
                h = o_g * jnp.tanh(c)                            # f32 hidden
                dst[t0 + t] = h.astype(jnp.bfloat16)

        # final states written once per layer (not every timestep), in f32
        hn_ref[layer] = h
        cn_ref[layer] = c


def _lstm_stack(x, wih0, wihr, whh, b, h0, c0):
    """x: (T, Bp, Ep) bf16 time-major input -> (h_seq (T,Bp,Hp) bf16, h_n, c_n)."""
    T, Bp, Ep = x.shape
    num_layers, Hp, H4 = whh.shape

    # Batch tiling: 2 parallel tiles when possible (v7x megacore split by batch).
    n_btiles = 2 if (Bp % 16 == 0 and Bp >= 16) else 1
    Bt = Bp // n_btiles

    n_slab = min(max(num_layers - 1, 1), 2)
    act_t = T if num_layers > 1 else SUBLANE        # unused slab stays tiny for L==1
    tc = min(_TIME_CHUNK, T)
    n_chunks = -(-T // tc)
    n_xp = 1 if n_chunks == 1 else 2                # double-buffer only when needed

    flops = 0
    for layer in range(num_layers):
        k_in = Ep if layer == 0 else Hp
        flops += 2 * T * Bp * (k_in + Hp) * H4
    transcendentals = 5 * num_layers * T * Bp * Hp
    bytes_accessed = int(2 * (x.size + wih0.size + wihr.size + whh.size)
                         + 4 * (b.size + h0.size + c0.size)
                         + 2 * T * Bp * Hp + 8 * num_layers * Bp * Hp)

    in_specs = [
        _sb_spec((T, Bt, Ep), lambda i: (0, i, 0)),
        _sb_spec(wih0.shape, lambda i: (0, 0)),
        _sb_spec(wihr.shape, lambda i: (0, 0, 0)),
        _sb_spec(whh.shape, lambda i: (0, 0, 0)),
        _sb_spec(b.shape, lambda i: (0, 0, 0)),
        _sb_spec((num_layers, Bt, Hp), lambda i: (0, i, 0)),
        _sb_spec((num_layers, Bt, Hp), lambda i: (0, i, 0)),
    ]
    out_specs = [
        _sb_spec((T, Bt, Hp), lambda i: (0, i, 0)),
        _sb_spec((num_layers, Bt, Hp), lambda i: (0, i, 0)),
        _sb_spec((num_layers, Bt, Hp), lambda i: (0, i, 0)),
    ]
    return pl.pallas_call(
        _lstm_stack_kernel,
        out_shape=(
            jax.ShapeDtypeStruct((T, Bp, Hp), jnp.bfloat16),
            jax.ShapeDtypeStruct((num_layers, Bp, Hp), jnp.float32),
            jax.ShapeDtypeStruct((num_layers, Bp, Hp), jnp.float32),
        ),
        grid=(n_btiles,),
        in_specs=in_specs,
        out_specs=out_specs,
        scratch_shapes=[
            pltpu.VMEM((n_xp, tc, Bt, H4), jnp.bfloat16),     # chunked input projection
            pltpu.VMEM((n_slab, act_t, Bt, Hp), jnp.bfloat16),  # inter-layer activation
        ],
        compiler_params=pltpu.CompilerParams(
            dimension_semantics=("parallel",),               # batch tiles independent
            vmem_limit_bytes=_vmem_limit_bytes()),
        cost_estimate=pl.CostEstimate(
            flops=int(flops), transcendentals=int(transcendentals),
            bytes_accessed=bytes_accessed),
    )(x, wih0, wihr, whh, b, h0, c0)


# ---------------------------------------------------------------------------
# FC head: logits = h @ W_fc^T + b_fc. Vocab is the OUTER grid axis so each
# (Hp, tv) W_fc tile is streamed from HBM exactly once and reused over all row
# tiles (and v7x splits the vocab across its two TensorCores).
# ---------------------------------------------------------------------------
def _fc_kernel(h_ref, w_ref, b_ref, o_ref):
    o_ref[...] = (jnp.dot(h_ref[...], w_ref[...],
                          preferred_element_type=jnp.float32)
                  + b_ref[...]).astype(o_ref.dtype)


def _fc_head(h_rows, w_fc_t, b_fc, *, row_tile=256, col_tile=512):
    """h_rows: (N, Hp) bf16 rows, w_fc_t: (Hp, Vp) bf16, b_fc: (1, Vp) f32."""
    N, Hp = h_rows.shape
    Vp = w_fc_t.shape[-1]
    tn = N if N <= row_tile else row_tile
    tv = Vp if Vp <= col_tile else col_tile
    grid = (pl.cdiv(Vp, tv), pl.cdiv(N, tn))      # vocab outer, rows inner (fastest)
    return pl.pallas_call(
        _fc_kernel,
        out_shape=jax.ShapeDtypeStruct((N, Vp), jnp.float32),
        grid=grid,
        in_specs=[
            pl.BlockSpec((tn, Hp), lambda v, r: (r, 0)),
            pl.BlockSpec((Hp, tv), lambda v, r: (0, v)),
            pl.BlockSpec((1, tv), lambda v, r: (0, v)),
        ],
        out_specs=pl.BlockSpec((tn, tv), lambda v, r: (r, v)),
        compiler_params=pltpu.CompilerParams(
            dimension_semantics=("parallel", "arbitrary"),
            vmem_limit_bytes=_vmem_limit_bytes()),
        cost_estimate=pl.CostEstimate(
            flops=2 * N * Hp * Vp, transcendentals=0,
            bytes_accessed=int(2 * N * Hp + 2 * Hp * Vp + 4 * N * Vp + 4 * Vp)),
    )(h_rows, w_fc_t, b_fc)


# ---------------------------------------------------------------------------
# Parameters: raw (PyTorch-like layout, f32) + packed (padded/transposed, bf16
# matmul operands with f32 biases) for the kernels.
# ---------------------------------------------------------------------------
def init_params(key, vocab_size, embed_dim, hidden_dim, num_layers, pad_idx=0):
    keys = jax.random.split(key, 1 + 4 * num_layers + 2)
    k = iter(keys)
    scale = 1.0 / jnp.sqrt(hidden_dim)

    emb = jax.random.uniform(next(k), (vocab_size, embed_dim),
                             jnp.float32, -0.1, 0.1)
    emb = emb.at[pad_idx].set(0.0)  # padding_idx row is zero

    layers = []
    for layer in range(num_layers):
        in_dim = embed_dim if layer == 0 else hidden_dim
        layers.append(dict(
            w_ih=jax.random.uniform(next(k), (4 * hidden_dim, in_dim),
                                    jnp.float32, -scale, scale),
            w_hh=jax.random.uniform(next(k), (4 * hidden_dim, hidden_dim),
                                    jnp.float32, -scale, scale),
            b_ih=jax.random.uniform(next(k), (4 * hidden_dim,),
                                    jnp.float32, -scale, scale),
            b_hh=jax.random.uniform(next(k), (4 * hidden_dim,),
                                    jnp.float32, -scale, scale),
        ))
    w_fc = jax.random.uniform(next(k), (vocab_size, hidden_dim),
                              jnp.float32, -scale, scale)
    b_fc = jax.random.uniform(next(k), (vocab_size,),
                              jnp.float32, -scale, scale)
    return dict(emb=emb, layers=layers, w_fc=w_fc, b_fc=b_fc)


def pack_params(raw, vocab_size, embed_dim, hidden_dim, num_layers):
    """Pad to lane/sublane-aligned shapes, pre-transpose and cast for the kernels."""
    E, H, V = embed_dim, hidden_dim, vocab_size
    Ep, Hp, Vp = _round_up(E, LANE), _round_up(H, LANE), _round_up(V, LANE)

    emb_p = (jnp.zeros((V, Ep), jnp.float32).at[:, :E]
             .set(raw["emb"]).astype(jnp.bfloat16))

    def pad_gate_mat(w, in_dim, in_pad):
        # w: (4H, in_dim), rows ordered [i|f|g|o]  ->  (in_pad, 4*Hp) bf16 with each
        # gate block individually padded to Hp lanes (padding stays exactly zero).
        w4 = w.reshape(4, H, in_dim)
        wp = jnp.zeros((4, Hp, in_pad), jnp.float32).at[:, :H, :in_dim].set(w4)
        return wp.reshape(4 * Hp, in_pad).T.astype(jnp.bfloat16)

    def pad_gate_bias(bvec):
        b4 = bvec.reshape(4, H)
        bp = jnp.zeros((4, Hp), jnp.float32).at[:, :H].set(b4)
        return bp.reshape(4 * Hp)

    wih0 = pad_gate_mat(raw["layers"][0]["w_ih"], E, Ep)                  # (Ep, 4Hp)
    whh = jnp.stack([pad_gate_mat(p["w_hh"], H, Hp)
                     for p in raw["layers"]], axis=0)                     # (L, Hp, 4Hp)
    if num_layers > 1:
        wihr = jnp.stack([pad_gate_mat(raw["layers"][l]["w_ih"], H, Hp)
                          for l in range(1, num_layers)], axis=0)         # (L-1, Hp, 4Hp)
    else:
        wihr = jnp.zeros((1, SUBLANE, LANE), jnp.bfloat16)                # tiny unused dummy
    b = jnp.stack([pad_gate_bias(p["b_ih"] + p["b_hh"])
                   for p in raw["layers"]], axis=0)[:, None, :]           # (L, 1, 4Hp) f32

    w_fc = (jnp.zeros((Hp, Vp), jnp.float32).at[:H, :V]
            .set(raw["w_fc"].T).astype(jnp.bfloat16))                     # (Hp, Vp)
    b_fc = jnp.zeros((1, Vp), jnp.float32).at[0, :V].set(raw["b_fc"])     # (1, Vp)
    return dict(emb=emb_p, wih0=wih0, wihr=wihr, whh=whh, b=b,
                w_fc=w_fc, b_fc=b_fc)


# ---------------------------------------------------------------------------
# Full model forward (embedding lookup + layout padding is glue; the LSTM stack
# and FC head run in Pallas).
# ---------------------------------------------------------------------------
@functools.partial(jax.jit,
                   static_argnames=("num_layers", "hidden_dim", "vocab_size"))
def lstm_text_model_forward(params, x_ids, hidden=None, *,
                            num_layers, hidden_dim, vocab_size):
    """x_ids: (B, T) int32 token ids -> (logits (B,T,V), (h_n, c_n))."""
    B, T = x_ids.shape
    H, V = hidden_dim, vocab_size
    Hp = params["whh"].shape[1]
    Vp = params["w_fc"].shape[1]
    Bp = _round_up(B, SUBLANE)

    # Embedding lookup directly in time-major order (folds the transpose into the
    # gather); table is bf16 so the gather moves half the bytes.
    # TODO(synk): fuse the gather into the kernel via scalar-prefetched token ids.
    emb_t = jnp.take(params["emb"], x_ids.T, axis=0)          # (T, B, Ep) bf16
    x_tbe = jnp.pad(emb_t, ((0, 0), (0, Bp - B), (0, 0)))     # (T, Bp, Ep)

    if hidden is None:
        h0 = jnp.zeros((num_layers, Bp, Hp), jnp.float32)
        c0 = jnp.zeros((num_layers, Bp, Hp), jnp.float32)
    else:
        h0_u, c0_u = hidden                                   # (L, B, H) each
        h0 = jnp.zeros((num_layers, Bp, Hp), jnp.float32).at[:, :B, :H].set(
            h0_u.astype(jnp.float32))
        c0 = jnp.zeros((num_layers, Bp, Hp), jnp.float32).at[:, :B, :H].set(
            c0_u.astype(jnp.float32))

    hseq, hn, cn = _lstm_stack(x_tbe, params["wih0"], params["wihr"],
                               params["whh"], params["b"], h0, c0)

    # FC head sees only the REAL batch rows (padded batch rows never reach it);
    # rows are batch-major so logits come out directly in (B, T, V) order.
    h_rows = jnp.transpose(hseq, (1, 0, 2))[:B].reshape(B * T, Hp)   # bf16
    n_rows = B * T
    n_rows_p = _round_up(n_rows, SUBLANE)
    h_rows = jnp.pad(h_rows, ((0, n_rows_p - n_rows), (0, 0)))
    logits_p = _fc_head(h_rows, params["w_fc"], params["b_fc"])      # (Np, Vp) f32
    logits = logits_p[:n_rows, :V].reshape(B, T, V)

    return logits, (hn[:, :B, :H], cn[:, :B, :H])


# ---------------------------------------------------------------------------
# Pure-JAX f32 reference (uses the raw, unpadded PyTorch-layout parameters).
# ---------------------------------------------------------------------------
def reference_forward(raw, x_ids, num_layers, hidden_dim):
    B, T = x_ids.shape
    H = hidden_dim
    cur = jnp.take(raw["emb"], x_ids, axis=0)                  # (B, T, E)
    h_fin, c_fin = [], []
    for layer in range(num_layers):
        p = raw["layers"][layer]
        w_ih_t, w_hh_t = p["w_ih"].T, p["w_hh"].T
        b = (p["b_ih"] + p["b_hh"])[None, :]
        h = jnp.zeros((B, H), jnp.float32)
        c = jnp.zeros((B, H), jnp.float32)
        outs = []
        for t in range(T):
            gates = cur[:, t, :] @ w_ih_t + h @ w_hh_t + b
            i_g = jax.nn.sigmoid(gates[:, 0 * H:1 * H])
            f_g = jax.nn.sigmoid(gates[:, 1 * H:2 * H])
            g_g = jnp.tanh(gates[:, 2 * H:3 * H])
            o_g = jax.nn.sigmoid(gates[:, 3 * H:4 * H])
            c = f_g * c + i_g * g_g
            h = o_g * jnp.tanh(c)
            outs.append(h)
        cur = jnp.stack(outs, axis=1)
        h_fin.append(h)
        c_fin.append(c)
    logits = cur @ raw["w_fc"].T + raw["b_fc"][None, None, :]
    return logits, (jnp.stack(h_fin, 0), jnp.stack(c_fin, 0))


if __name__ == "__main__":
    VOCAB, EMBED, HIDDEN, LAYERS, PAD = 64, 32, 32, 2, 0
    BATCH, SEQ = 2, 8

    key = jax.random.PRNGKey(0)
    kp, kx = jax.random.split(key)
    raw_params = init_params(kp, VOCAB, EMBED, HIDDEN, LAYERS, PAD)
    packed = pack_params(raw_params, VOCAB, EMBED, HIDDEN, LAYERS)
    x_ids = jax.random.randint(kx, (BATCH, SEQ), 0, VOCAB, dtype=jnp.int32)

    logits, (h_n, c_n) = lstm_text_model_forward(
        packed, x_ids, num_layers=LAYERS, hidden_dim=HIDDEN, vocab_size=VOCAB)
    jax.block_until_ready((logits, h_n, c_n))

    ref_logits, (ref_h, ref_c) = reference_forward(raw_params, x_ids, LAYERS, HIDDEN)
    assert logits.shape == (BATCH, SEQ, VOCAB)
    assert h_n.shape == (LAYERS, BATCH, HIDDEN)
    assert c_n.shape == (LAYERS, BATCH, HIDDEN)
    # bf16 MXU operands (f32 accumulation / gate math) -> loosened tolerance
    # against the pure-f32 reference.
    assert jnp.allclose(logits, ref_logits, atol=2e-2, rtol=2e-2)
    assert jnp.allclose(h_n, ref_h, atol=2e-2, rtol=2e-2)
    assert jnp.allclose(c_n, ref_c, atol=2e-2, rtol=2e-2)

    print("KERNEL_OK")
</pallas_src>

<mosaic_0001>
module attributes {stable_mosaic.version = 11 : i64} {
  func.func @_fc_kernel(%arg0: i32, %arg1: i32, %arg2: memref<16x128xbf16, #tpu.memory_space<vmem>>, %arg3: memref<128x128xbf16, #tpu.memory_space<vmem>>, %arg4: memref<1x128xf32, #tpu.memory_space<vmem>>, %arg5: memref<16x128xf32, #tpu.memory_space<vmem>>) attributes {dimension_semantics = [#tpu.dimension_semantics<parallel>, #tpu.dimension_semantics<arbitrary>], iteration_bounds = array<i64: 1, 1>, scalar_prefetch = 0 : i64, scratch_operands = 0 : i64, tpu.core_type = #tpu.core_type<tc>, window_params = [{transform_indices = @transform_0, window_bounds = array<i64: 16, 128>}, {transform_indices = @transform_1, window_bounds = array<i64: 128, 128>}, {transform_indices = @transform_2, window_bounds = array<i64: 1, 128>}, {transform_indices = @transform_3, window_bounds = array<i64: 16, 128>}]} {
    %c0 = arith.constant 0 : index
    %c0_0 = arith.constant 0 : index
    %0 = vector.load %arg2[%c0, %c0_0] : memref<16x128xbf16, #tpu.memory_space<vmem>>, vector<16x128xbf16>
    %c0_1 = arith.constant 0 : index
    %c0_2 = arith.constant 0 : index
    %1 = vector.load %arg3[%c0_1, %c0_2] : memref<128x128xbf16, #tpu.memory_space<vmem>>, vector<128x128xbf16>
    %cst = arith.constant dense<0.000000e+00> : vector<16x128xf32>
    %2 = tpu.matmul %0, %1, %cst {dimension_numbers = #tpu.dot_dimension_numbers<[1], [0], [0], [1], [0, 0, 1, 1], [], []>} : vector<16x128xbf16>, vector<128x128xbf16>, vector<16x128xf32> -> vector<16x128xf32>
    %c0_3 = arith.constant 0 : index
    %c0_4 = arith.constant 0 : index
    %3 = vector.load %arg4[%c0_3, %c0_4] : memref<1x128xf32, #tpu.memory_space<vmem>>, vector<1x128xf32>
    %4 = vector.broadcast %3 : vector<1x128xf32> to vector<16x128xf32>
    %5 = arith.addf %2, %4 : vector<16x128xf32>
    %c0_5 = arith.constant 0 : index
    %c0_6 = arith.constant 0 : index
    %6 = vector.load %arg5[%c0_5, %c0_6] : memref<16x128xf32, #tpu.memory_space<vmem>>, vector<16x128xf32>
    tpu.vector_store %arg5[%c0_5, %c0_6], %5 {strides = array<i32>} : memref<16x128xf32, #tpu.memory_space<vmem>>, vector<16x128xf32>,
    return
  }
  func.func @transform_0(%arg0: i32, %arg1: i32) -> (i32, i32) {
    %c0_i32 = arith.constant 0 : i32
    %c0_i32_0 = arith.constant 0 : i32
    return %arg1, %c0_i32 : i32, i32
  }
  func.func @transform_1(%arg0: i32, %arg1: i32) -> (i32, i32) {
    %c0_i32 = arith.constant 0 : i32
    %c0_i32_0 = arith.constant 0 : i32
    return %c0_i32, %arg0 : i32, i32
  }
  func.func @transform_2(%arg0: i32, %arg1: i32) -> (i32, i32) {
    %c0_i32 = arith.constant 0 : i32
    %c0_i32_0 = arith.constant 0 : i32
    return %c0_i32, %arg0 : i32, i32
  }
  func.func @transform_3(%arg0: i32, %arg1: i32) -> (i32, i32) {
    %c0_i32 = arith.constant 0 : i32
    return %arg1, %arg0 : i32, i32
  }
}

module attributes {stable_mosaic.version = 11 : i64} {
  func.func @_lstm_stack_kernel(%arg0: i32, %arg1: memref<8x8x128xbf16, #tpu.memory_space<vmem>>, %arg2: memref<128x512xbf16, #tpu.memory_space<vmem>>, %arg3: memref<1x128x512xbf16, #tpu.memory_space<vmem>>, %arg4: memref<2x128x512xbf16, #tpu.memory_space<vmem>>, %arg5: memref<2x1x512xf32, #tpu.memory_space<vmem>>, %arg6: memref<2x8x128xf32, #tpu.memory_space<vmem>>, %arg7: memref<2x8x128xf32, #tpu.memory_space<vmem>>, %arg8: memref<8x8x128xbf16, #tpu.memory_space<vmem>>, %arg9: memref<2x8x128xf32, #tpu.memory_space<vmem>>, %arg10: memref<2x8x128xf32, #tpu.memory_space<vmem>>, %arg11: memref<1x8x8x512xbf16, #tpu.memory_space<vmem>>, %arg12: memref<1x8x8x128xbf16, #tpu.memory_space<vmem>>) attributes {dimension_semantics = [#tpu.dimension_semantics<parallel>], iteration_bounds = array<i64: 1>, scalar_prefetch = 0 : i64, scratch_operands = 2 : i64, tpu.core_type = #tpu.core_type<tc>, window_params = [{pipeline_mode = #tpu.pipeline_mode<synchronous>, transform_indices = @transform_0, window_bounds = array<i64: 8, 8, 128>}, {pipeline_mode = #tpu.pipeline_mode<synchronous>, transform_indices = @transform_1, window_bounds = array<i64: 128, 512>}, {pipeline_mode = #tpu.pipeline_mode<synchronous>, transform_indices = @transform_2, window_bounds = array<i64: 1, 128, 512>}, {pipeline_mode = #tpu.pipeline_mode<synchronous>, transform_indices = @transform_3, window_bounds = array<i64: 2, 128, 512>}, {pipeline_mode = #tpu.pipeline_mode<synchronous>, transform_indices = @transform_4, window_bounds = array<i64: 2, 1, 512>}, {pipeline_mode = #tpu.pipeline_mode<synchronous>, transform_indices = @transform_5, window_bounds = array<i64: 2, 8, 128>}, {pipeline_mode = #tpu.pipeline_mode<synchronous>, transform_indices = @transform_6, window_bounds = array<i64: 2, 8, 128>}, {pipeline_mode = #tpu.pipeline_mode<synchronous>, transform_indices = @transform_7, window_bounds = array<i64: 8, 8, 128>}, {pipeline_mode = #tpu.pipeline_mode<synchronous>, transform_indices = @transform_8, window_bounds = array<i64: 2, 8, 128>}, {pipeline_mode = #tpu.pipeline_mode<synchronous>, transform_indices = @transform_9, window_bounds = array<i64: 2, 8, 128>}]} {
    %c0 = arith.constant 0 : index
    %c0_0 = arith.constant 0 : index
    %c0_1 = arith.constant 0 : index
    %0 = vector.load %arg5[%c0, %c0_0, %c0_1] : memref<2x1x512xf32, #tpu.memory_space<vmem>>, vector<1x1x512xf32>
    %1 = vector.shape_cast %0 : vector<1x1x512xf32> to vector<1x512xf32>
    %c0_2 = arith.constant 0 : index
    %c0_3 = arith.constant 0 : index
    %c0_4 = arith.constant 0 : index
    %2 = vector.load %arg4[%c0_2, %c0_3, %c0_4] : memref<2x128x512xbf16, #tpu.memory_space<vmem>>, vector<1x128x512xbf16>
    %3 = vector.shape_cast %2 : vector<1x128x512xbf16> to vector<128x512xbf16>
    %c0_5 = arith.constant 0 : index
    %c0_6 = arith.constant 0 : index
    %c0_7 = arith.constant 0 : index
    %4 = vector.load %arg6[%c0_5, %c0_6, %c0_7] : memref<2x8x128xf32, #tpu.memory_space<vmem>>, vector<1x8x128xf32>
    %5 = vector.shape_cast %4 : vector<1x8x128xf32> to vector<8x128xf32>
    %c0_8 = arith.constant 0 : index
    %c0_9 = arith.constant 0 : index
    %c0_10 = arith.constant 0 : index
    %6 = vector.load %arg7[%c0_8, %c0_9, %c0_10] : memref<2x8x128xf32, #tpu.memory_space<vmem>>, vector<1x8x128xf32>
    %7 = vector.shape_cast %6 : vector<1x8x128xf32> to vector<8x128xf32>
    %c0_11 = arith.constant 0 : index
    %c0_12 = arith.constant 0 : index
    %c0_13 = arith.constant 0 : index
    %8 = vector.load %arg1[%c0_11, %c0_12, %c0_13] : memref<8x8x128xbf16, #tpu.memory_space<vmem>>, vector<8x8x128xbf16>
    %9 = vector.shape_cast %8 : vector<8x8x128xbf16> to vector<64x128xbf16>
    %c0_14 = arith.constant 0 : index
    %c0_15 = arith.constant 0 : index
    %10 = vector.load %arg2[%c0_14, %c0_15] : memref<128x512xbf16, #tpu.memory_space<vmem>>, vector<128x512xbf16>
    %cst = arith.constant dense<0.000000e+00> : vector<64x512xf32>
    %11 = tpu.matmul %9, %10, %cst {dimension_numbers = #tpu.dot_dimension_numbers<[1], [0], [0], [1], [0, 0, 1, 1], [], []>} : vector<64x128xbf16>, vector<128x512xbf16>, vector<64x512xf32> -> vector<64x512xf32>
    %12 = vector.broadcast %1 : vector<1x512xf32> to vector<64x512xf32>
    %13 = arith.addf %11, %12 : vector<64x512xf32>
    %14 = vector.shape_cast %13 : vector<64x512xf32> to vector<8x8x512xf32>
    %15 = arith.truncf %14 : vector<8x8x512xf32> to vector<8x8x512xbf16>
    %c0_16 = arith.constant 0 : index
    %c0_17 = arith.constant 0 : index
    %c0_18 = arith.constant 0 : index
    %c0_19 = arith.constant 0 : index
    %16 = vector.load %arg11[%c0_16, %c0_17, %c0_18, %c0_19] : memref<1x8x8x512xbf16, #tpu.memory_space<vmem>>, vector<1x8x8x512xbf16>
    %17 = vector.shape_cast %16 : vector<1x8x8x512xbf16> to vector<8x8x512xbf16>
    %18 = vector.shape_cast %15 : vector<8x8x512xbf16> to vector<1x8x8x512xbf16>
    tpu.vector_store %arg11[%c0_16, %c0_17, %c0_18, %c0_19], %18 {strides = array<i32>} : memref<1x8x8x512xbf16, #tpu.memory_space<vmem>>, vector<1x8x8x512xbf16>,
    %c0_20 = arith.constant 0 : index
    %c0_21 = arith.constant 0 : index
    %c0_22 = arith.constant 0 : index
    %c0_23 = arith.constant 0 : index
    %19 = vector.load %arg11[%c0_20, %c0_21, %c0_22, %c0_23] : memref<1x8x8x512xbf16, #tpu.memory_space<vmem>>, vector<1x1x8x512xbf16>
    %20 = vector.shape_cast %19 : vector<1x1x8x512xbf16> to vector<8x512xbf16>
    %21 = arith.extf %20 : vector<8x512xbf16> to vector<8x512xf32>
    %22 = arith.truncf %5 : vector<8x128xf32> to vector<8x128xbf16>
    %cst_24 = arith.constant dense<0.000000e+00> : vector<8x512xf32>
    %23 = tpu.matmul %22, %3, %cst_24 {dimension_numbers = #tpu.dot_dimension_numbers<[1], [0], [0], [1], [0, 0, 1, 1], [], []>} : vector<8x128xbf16>, vector<128x512xbf16>, vector<8x512xf32> -> vector<8x512xf32>
    %24 = arith.addf %21, %23 : vector<8x512xf32>
    %25 = vector.extract_strided_slice %24 {offsets = [0, 0], sizes = [8, 128], strides = [1, 1]} : vector<8x512xf32> to vector<8x128xf32>
    %26 = arith.negf %25 : vector<8x128xf32>
    %27 = math.exp %26 : vector<8x128xf32>
    %cst_25 = arith.constant 1.000000e+00 : f32
    %28 = vector.broadcast %cst_25 : f32 to vector<8x128xf32>
    %29 = arith.addf %28, %27 : vector<8x128xf32>
    %30 = arith.divf %28, %29 : vector<8x128xf32>
    %31 = vector.extract_strided_slice %24 {offsets = [0, 128], sizes = [8, 128], strides = [1, 1]} : vector<8x512xf32> to vector<8x128xf32>
    %32 = arith.negf %31 : vector<8x128xf32>
    %33 = math.exp %32 : vector<8x128xf32>
    %cst_26 = arith.constant 1.000000e+00 : f32
    %34 = vector.broadcast %cst_26 : f32 to vector<8x128xf32>
    %35 = arith.addf %34, %33 : vector<8x128xf32>
    %36 = arith.divf %34, %35 : vector<8x128xf32>
    %37 = vector.extract_strided_slice %24 {offsets = [0, 256], sizes = [8, 128], strides = [1, 1]} : vector<8x512xf32> to vector<8x128xf32>
    %38 = math.tanh %37 : vector<8x128xf32>
    %39 = vector.extract_strided_slice %24 {offsets = [0, 384], sizes = [8, 128], strides = [1, 1]} : vector<8x512xf32> to vector<8x128xf32>
    %40 = arith.negf %39 : vector<8x128xf32>
    %41 = math.exp %40 : vector<8x128xf32>
    %cst_27 = arith.constant 1.000000e+00 : f32
    %42 = vector.broadcast %cst_27 : f32 to vector<8x128xf32>
    %43 = arith.addf %42, %41 : vector<8x128xf32>
    %44 = arith.divf %42, %43 : vector<8x128xf32>
    %45 = arith.mulf %36, %7 : vector<8x128xf32>
    %46 = arith.mulf %30, %38 : vector<8x128xf32>
    %47 = arith.addf %45, %46 : vector<8x128xf32>
    %48 = math.tanh %47 : vector<8x128xf32>
    %49 = arith.mulf %44, %48 : vector<8x128xf32>
    %50 = arith.truncf %49 : vector<8x128xf32> to vector<8x128xbf16>
    %c0_i32 = arith.constant 0 : i32
    %c0_i32_28 = arith.constant 0 : i32
    %c0_i32_29 = arith.constant 0 : i32
    %c0_i32_30 = arith.constant 0 : i32
    %51 = tpu.memref_slice %arg12[%c0_i32, %c0_i32_28, %c0_i32_29, %c0_i32_30] : memref<1x8x8x128xbf16, #tpu.memory_space<vmem>> -> memref<1x8x8x128xbf16, #tpu.memory_space<vmem>>
    %52 = tpu.memref_squeeze %51 : memref<1x8x8x128xbf16, #tpu.memory_space<vmem>> -> memref<8x8x128xbf16, #tpu.memory_space<vmem>>
    %c0_31 = arith.constant 0 : index
    %c0_32 = arith.constant 0 : index
    %c0_33 = arith.constant 0 : index
    %53 = vector.load %52[%c0_31, %c0_32, %c0_33] : memref<8x8x128xbf16, #tpu.memory_space<vmem>>, vector<1x8x128xbf16>
    %54 = vector.shape_cast %53 : vector<1x8x128xbf16> to vector<8x128xbf16>
    %55 = vector.shape_cast %50 : vector<8x128xbf16> to vector<1x8x128xbf16>
    tpu.vector_store %52[%c0_31, %c0_32, %c0_33], %55 {strides = array<i32>} : memref<8x8x128xbf16, #tpu.memory_space<vmem>>, vector<1x8x128xbf16>,
    %c0_34 = arith.constant 0 : index
    %c1 = arith.constant 1 : index
    %c0_35 = arith.constant 0 : index
    %c0_36 = arith.constant 0 : index
    %56 = vector.load %arg11[%c0_34, %c1, %c0_35, %c0_36] : memref<1x8x8x512xbf16, #tpu.memory_space<vmem>>, vector<1x1x8x512xbf16>
    %57 = vector.shape_cast %56 : vector<1x1x8x512xbf16> to vector<8x512xbf16>
    %58 = arith.extf %57 : vector<8x512xbf16> to vector<8x512xf32>
    %59 = arith.truncf %49 : vector<8x128xf32> to vector<8x128xbf16>
    %cst_37 = arith.constant dense<0.000000e+00> : vector<8x512xf32>
    %60 = tpu.matmul %59, %3, %cst_37 {dimension_numbers = #tpu.dot_dimension_numbers<[1], [0], [0], [1], [0, 0, 1, 1], [], []>} : vector<8x128xbf16>, vector<128x512xbf16>, vector<8x512xf32> -> vector<8x512xf32>
    %61 = arith.addf %58, %60 : vector<8x512xf32>
    %62 = vector.extract_strided_slice %61 {offsets = [0, 0], sizes = [8, 128], strides = [1, 1]} : vector<8x512xf32> to vector<8x128xf32>
    %63 = arith.negf %62 : vector<8x128xf32>
    %64 = math.exp %63 : vector<8x128xf32>
    %cst_38 = arith.constant 1.000000e+00 : f32
    %65 = vector.broadcast %cst_38 : f32 to vector<8x128xf32>
    %66 = arith.addf %65, %64 : vector<8x128xf32>
    %67 = arith.divf %65, %66 : vector<8x128xf32>
    %68 = vector.extract_strided_slice %61 {offsets = [0, 128], sizes = [8, 128], strides = [1, 1]} : vector<8x512xf32> to vector<8x128xf32>
    %69 = arith.negf %68 : vector<8x128xf32>
    %70 = math.exp %69 : vector<8x128xf32>
    %cst_39 = arith.constant 1.000000e+00 : f32
    %71 = vector.broadcast %cst_39 : f32 to vector<8x128xf32>
    %72 = arith.addf %71, %70 : vector<8x128xf32>
    %73 = arith.divf %71, %72 : vector<8x128xf32>
    %74 = vector.extract_strided_slice %61 {offsets = [0, 256], sizes = [8, 128], strides = [1, 1]} : vector<8x512xf32> to vector<8x128xf32>
    %75 = math.tanh %74 : vector<8x128xf32>
    %76 = vector.extract_strided_slice %61 {offsets = [0, 384], sizes = [8, 128], strides = [1, 1]} : vector<8x512xf32> to vector<8x128xf32>
    %77 = arith.negf %76 : vector<8x128xf32>
    %78 = math.exp %77 : vector<8x128xf32>
    %cst_40 = arith.constant 1.000000e+00 : f32
    %79 = vector.broadcast %cst_40 : f32 to vector<8x128xf32>
    %80 = arith.addf %79, %78 : vector<8x128xf32>
    %81 = arith.divf %79, %80 : vector<8x128xf32>
    %82 = arith.mulf %73, %47 : vector<8x128xf32>
    %83 = arith.mulf %67, %75 : vector<8x128xf32>
    %84 = arith.addf %82, %83 : vector<8x128xf32>
    %85 = math.tanh %84 : vector<8x128xf32>
    %86 = arith.mulf %81, %85 : vector<8x128xf32>
    %87 = arith.truncf %86 : vector<8x128xf32> to vector<8x128xbf16>
    %c0_i32_41 = arith.constant 0 : i32
    %c0_i32_42 = arith.constant 0 : i32
    %c0_i32_43 = arith.constant 0 : i32
    %c0_i32_44 = arith.constant 0 : i32
    %88 = tpu.memref_slice %arg12[%c0_i32_41, %c0_i32_42, %c0_i32_43, %c0_i32_44] : memref<1x8x8x128xbf16, #tpu.memory_space<vmem>> -> memref<1x8x8x128xbf16, #tpu.memory_space<vmem>>
    %89 = tpu.memref_squeeze %88 : memref<1x8x8x128xbf16, #tpu.memory_space<vmem>> -> memref<8x8x128xbf16, #tpu.memory_space<vmem>>
    %c1_45 = arith.constant 1 : index
    %c0_46 = arith.constant 0 : index
    %c0_47 = arith.constant 0 : index
    %90 = vector.load %89[%c1_45, %c0_46, %c0_47] : memref<8x8x128xbf16, #tpu.memory_space<vmem>>, vector<1x8x128xbf16>
    %91 = vector.shape_cast %90 : vector<1x8x128xbf16> to vector<8x128xbf16>
    %92 = vector.shape_cast %87 : vector<8x128xbf16> to vector<1x8x128xbf16>
    tpu.vector_store %89[%c1_45, %c0_46, %c0_47], %92 {strides = array<i32>} : memref<8x8x128xbf16, #tpu.memory_space<vmem>>, vector<1x8x128xbf16>,
    %c0_48 = arith.constant 0 : index
    %c2 = arith.constant 2 : index
    %c0_49 = arith.constant 0 : index
    %c0_50 = arith.constant 0 : index
    %93 = vector.load %arg11[%c0_48, %c2, %c0_49, %c0_50] : memref<1x8x8x512xbf16, #tpu.memory_space<vmem>>, vector<1x1x8x512xbf16>
    %94 = vector.shape_cast %93 : vector<1x1x8x512xbf16> to vector<8x512xbf16>
    %95 = arith.extf %94 : vector<8x512xbf16> to vector<8x512xf32>
    %96 = arith.truncf %86 : vector<8x128xf32> to vector<8x128xbf16>
    %cst_51 = arith.constant dense<0.000000e+00> : vector<8x512xf32>
    %97 = tpu.matmul %96, %3, %cst_51 {dimension_numbers = #tpu.dot_dimension_numbers<[1], [0], [0], [1], [0, 0, 1, 1], [], []>} : vector<8x128xbf16>, vector<128x512xbf16>, vector<8x512xf32> -> vector<8x512xf32>
    %98 = arith.addf %95, %97 : vector<8x512xf32>
    %99 = vector.extract_strided_slice %98 {offsets = [0, 0], sizes = [8, 128], strides = [1, 1]} : vector<8x512xf32> to vector<8x128xf32>
    %100 = arith.negf %99 : vector<8x128xf32>
    %101 = math.exp %100 : vector<8x128xf32>
    %cst_52 = arith.constant 1.000000e+00 : f32
    %102 = vector.broadcast %cst_52 : f32 to vector<8x128xf32>
    %103 = arith.addf %102, %101 : vector<8x128xf32>
    %104 = arith.divf %102, %103 : vector<8x128xf32>
    %105 = vector.extract_strided_slice %98 {offsets = [0, 128], sizes = [8, 128], strides = [1, 1]} : vector<8x512xf32> to vector<8x128xf32>
    %106 = arith.negf %105 : vector<8x128xf32>
    %107 = math.exp %106 : vector<8x128xf32>
    %cst_53 = arith.constant 1.000000e+00 : f32
    %108 = vector.broadcast %cst_53 : f32 to vector<8x128xf32>
    %109 = arith.addf %108, %107 : vector<8x128xf32>
    %110 = arith.divf %108, %109 : vector<8x128xf32>
    %111 = vector.extract_strided_slice %98 {offsets = [0, 256], sizes = [8, 128], strides = [1, 1]} : vector<8x512xf32> to vector<8x128xf32>
    %112 = math.tanh %111 : vector<8x128xf32>
    %113 = vector.extract_strided_slice %98 {offsets = [0, 384], sizes = [8, 128], strides = [1, 1]} : vector<8x512xf32> to vector<8x128xf32>
    %114 = arith.negf %113 : vector<8x128xf32>
    %115 = math.exp %114 : vector<8x128xf32>
    %cst_54 = arith.constant 1.000000e+00 : f32
    %116 = vector.broadcast %cst_54 : f32 to vector<8x128xf32>
    %117 = arith.addf %116, %115 : vector<8x128xf32>
    %118 = arith.divf %116, %117 : vector<8x128xf32>
    %119 = arith.mulf %110, %84 : vector<8x128xf32>
    %120 = arith.mulf %104, %112 : vector<8x128xf32>
    %121 = arith.addf %119, %120 : vector<8x128xf32>
    %122 = math.tanh %121 : vector<8x128xf32>
    %123 = arith.mulf %118, %122 : vector<8x128xf32>
    %124 = arith.truncf %123 : vector<8x128xf32> to vector<8x128xbf16>
    %c0_i32_55 = arith.constant 0 : i32
    %c0_i32_56 = arith.constant 0 : i32
    %c0_i32_57 = arith.constant 0 : i32
    %c0_i32_58 = arith.constant 0 : i32
    %125 = tpu.memref_slice %arg12[%c0_i32_55, %c0_i32_56, %c0_i32_57, %c0_i32_58] : memref<1x8x8x128xbf16, #tpu.memory_space<vmem>> -> memref<1x8x8x128xbf16, #tpu.memory_space<vmem>>
    %126 = tpu.memref_squeeze %125 : memref<1x8x8x128xbf16, #tpu.memory_space<vmem>> -> memref<8x8x128xbf16, #tpu.memory_space<vmem>>
    %c2_59 = arith.constant 2 : index
    %c0_60 = arith.constant 0 : index
    %c0_61 = arith.constant 0 : index
    %127 = vector.load %126[%c2_59, %c0_60, %c0_61] : memref<8x8x128xbf16, #tpu.memory_space<vmem>>, vector<1x8x128xbf16>
    %128 = vector.shape_cast %127 : vector<1x8x128xbf16> to vector<8x128xbf16>
    %129 = vector.shape_cast %124 : vector<8x128xbf16> to vector<1x8x128xbf16>
    tpu.vector_store %126[%c2_59, %c0_60, %c0_61], %129 {strides = array<i32>} : memref<8x8x128xbf16, #tpu.memory_space<vmem>>, vector<1x8x128xbf16>,
    %c0_62 = arith.constant 0 : index
    %c3 = arith.constant 3 : index
    %c0_63 = arith.constant 0 : index
    %c0_64 = arith.constant 0 : index
    %130 = vector.load %arg11[%c0_62, %c3, %c0_63, %c0_64] : memref<1x8x8x512xbf16, #tpu.memory_space<vmem>>, vector<1x1x8x512xbf16>
    %131 = vector.shape_cast %130 : vector<1x1x8x512xbf16> to vector<8x512xbf16>
    %132 = arith.extf %131 : vector<8x512xbf16> to vector<8x512xf32>
    %133 = arith.truncf %123 : vector<8x128xf32> to vector<8x128xbf16>
    %cst_65 = arith.constant dense<0.000000e+00> : vector<8x512xf32>
    %134 = tpu.matmul %133, %3, %cst_65 {dimension_numbers = #tpu.dot_dimension_numbers<[1], [0], [0], [1], [0, 0, 1, 1], [], []>} : vector<8x128xbf16>, vector<128x512xbf16>, vector<8x512xf32> -> vector<8x512xf32>
    %135 = arith.addf %132, %134 : vector<8x512xf32>
    %136 = vector.extract_strided_slice %135 {offsets = [0, 0], sizes = [8, 128], strides = [1, 1]} : vector<8x512xf32> to vector<8x128xf32>
    %137 = arith.negf %136 : vector<8x128xf32>
    %138 = math.exp %137 : vector<8x128xf32>
    %cst_66 = arith.constant 1.000000e+00 : f32
    %139 = vector.broadcast %cst_66 : f32 to vector<8x128xf32>
    %140 = arith.addf %139, %138 : vector<8x128xf32>
    %141 = arith.divf %139, %140 : vector<8x128xf32>
    %142 = vector.extract_strided_slice %135 {offsets = [0, 128], sizes = [8, 128], strides = [1, 1]} : vector<8x512xf32> to vector<8x128xf32>
    %143 = arith.negf %142 : vector<8x128xf32>
    %144 = math.exp %143 : vector<8x128xf32>
    %cst_67 = arith.constant 1.000000e+00 : f32
    %145 = vector.broadcast %cst_67 : f32 to vector<8x128xf32>
    %146 = arith.addf %145, %144 : vector<8x128xf32>
    %147 = arith.divf %145, %146 : vector<8x128xf32>
    %148 = vector.extract_strided_slice %135 {offsets = [0, 256], sizes = [8, 128], strides = [1, 1]} : vector<8x512xf32> to vector<8x128xf32>
    %149 = math.tanh %148 : vector<8x128xf32>
    %150 = vector.extract_strided_slice %135 {offsets = [0, 384], sizes = [8, 128], strides = [1, 1]} : vector<8x512xf32> to vector<8x128xf32>
    %151 = arith.negf %150 : vector<8x128xf32>
    %152 = math.exp %151 : vector<8x128xf32>
    %cst_68 = arith.constant 1.000000e+00 : f32
    %153 = vector.broadcast %cst_68 : f32 to vector<8x128xf32>
    %154 = arith.addf %153, %152 : vector<8x128xf32>
    %155 = arith.divf %153, %154 : vector<8x128xf32>
    %156 = arith.mulf %147, %121 : vector<8x128xf32>
    %157 = arith.mulf %141, %149 : vector<8x128xf32>
    %158 = arith.addf %156, %157 : vector<8x128xf32>
    %159 = math.tanh %158 : vector<8x128xf32>
    %160 = arith.mulf %155, %159 : vector<8x128xf32>
    %161 = arith.truncf %160 : vector<8x128xf32> to vector<8x128xbf16>
    %c0_i32_69 = arith.constant 0 : i32
    %c0_i32_70 = arith.constant 0 : i32
    %c0_i32_71 = arith.constant 0 : i32
    %c0_i32_72 = arith.constant 0 : i32
    %162 = tpu.memref_slice %arg12[%c0_i32_69, %c0_i32_70, %c0_i32_71, %c0_i32_72] : memref<1x8x8x128xbf16, #tpu.memory_space<vmem>> -> memref<1x8x8x128xbf16, #tpu.memory_space<vmem>>
    %163 = tpu.memref_squeeze %162 : memref<1x8x8x128xbf16, #tpu.memory_space<vmem>> -> memref<8x8x128xbf16, #tpu.memory_space<vmem>>
    %c3_73 = arith.constant 3 : index
    %c0_74 = arith.constant 0 : index
    %c0_75 = arith.constant 0 : index
    %164 = vector.load %163[%c3_73, %c0_74, %c0_75] : memref<8x8x128xbf16, #tpu.memory_space<vmem>>, vector<1x8x128xbf16>
    %165 = vector.shape_cast %164 : vector<1x8x128xbf16> to vector<8x128xbf16>
    %166 = vector.shape_cast %161 : vector<8x128xbf16> to vector<1x8x128xbf16>
    tpu.vector_store %163[%c3_73, %c0_74, %c0_75], %166 {strides = array<i32>} : memref<8x8x128xbf16, #tpu.memory_space<vmem>>, vector<1x8x128xbf16>,
    %c0_76 = arith.constant 0 : index
    %c4 = arith.constant 4 : index
    %c0_77 = arith.constant 0 : index
    %c0_78 = arith.constant 0 : index
    %167 = vector.load %arg11[%c0_76, %c4, %c0_77, %c0_78] : memref<1x8x8x512xbf16, #tpu.memory_space<vmem>>, vector<1x1x8x512xbf16>
    %168 = vector.shape_cast %167 : vector<1x1x8x512xbf16> to vector<8x512xbf16>
    %169 = arith.extf %168 : vector<8x512xbf16> to vector<8x512xf32>
    %170 = arith.truncf %160 : vector<8x128xf32> to vector<8x128xbf16>
    %cst_79 = arith.constant dense<0.000000e+00> : vector<8x512xf32>
    %171 = tpu.matmul %170, %3, %cst_79 {dimension_numbers = #tpu.dot_dimension_numbers<[1], [0], [0], [1], [0, 0, 1, 1], [], []>} : vector<8x128xbf16>, vector<128x512xbf16>, vector<8x512xf32> -> vector<8x512xf32>
    %172 = arith.addf %169, %171 : vector<8x512xf32>
    %173 = vector.extract_strided_slice %172 {offsets = [0, 0], sizes = [8, 128], strides = [1, 1]} : vector<8x512xf32> to vector<8x128xf32>
    %174 = arith.negf %173 : vector<8x128xf32>
    %175 = math.exp %174 : vector<8x128xf32>
    %cst_80 = arith.constant 1.000000e+00 : f32
    %176 = vector.broadcast %cst_80 : f32 to vector<8x128xf32>
    %177 = arith.addf %176, %175 : vector<8x128xf32>
    %178 = arith.divf %176, %177 : vector<8x128xf32>
    %179 = vector.extract_strided_slice %172 {offsets = [0, 128], sizes = [8, 128], strides = [1, 1]} : vector<8x512xf32> to vector<8x128xf32>
    %180 = arith.negf %179 : vector<8x128xf32>
    %181 = math.exp %180 : vector<8x128xf32>
    %cst_81 = arith.constant 1.000000e+00 : f32
    %182 = vector.broadcast %cst_81 : f32 to vector<8x128xf32>
    %183 = arith.addf %182, %181 : vector<8x128xf32>
    %184 = arith.divf %182, %183 : vector<8x128xf32>
    %185 = vector.extract_strided_slice %172 {offsets = [0, 256], sizes = [8, 128], strides = [1, 1]} : vector<8x512xf32> to vector<8x128xf32>
    %186 = math.tanh %185 : vector<8x128xf32>
    %187 = vector.extract_strided_slice %172 {offsets = [0, 384], sizes = [8, 128], strides = [1, 1]} : vector<8x512xf32> to vector<8x128xf32>
    %188 = arith.negf %187 : vector<8x128xf32>
    %189 = math.exp %188 : vector<8x128xf32>
    %cst_82 = arith.constant 1.000000e+00 : f32
    %190 = vector.broadcast %cst_82 : f32 to vector<8x128xf32>
    %191 = arith.addf %190, %189 : vector<8x128xf32>
    %192 = arith.divf %190, %191 : vector<8x128xf32>
    %193 = arith.mulf %184, %158 : vector<8x128xf32>
    %194 = arith.mulf %178, %186 : vector<8x128xf32>
    %195 = arith.addf %193, %194 : vector<8x128xf32>
    %196 = math.tanh %195 : vector<8x128xf32>
    %197 = arith.mulf %192, %196 : vector<8x128xf32>
    %198 = arith.truncf %197 : vector<8x128xf32> to vector<8x128xbf16>
    %c0_i32_83 = arith.constant 0 : i32
    %c0_i32_84 = arith.constant 0 : i32
    %c0_i32_85 = arith.constant 0 : i32
    %c0_i32_86 = arith.constant 0 : i32
    %199 = tpu.memref_slice %arg12[%c0_i32_83, %c0_i32_84, %c0_i32_85, %c0_i32_86] : memref<1x8x8x128xbf16, #tpu.memory_space<vmem>> -> memref<1x8x8x128xbf16, #tpu.memory_space<vmem>>
    %200 = tpu.memref_squeeze %199 : memref<1x8x8x128xbf16, #tpu.memory_space<vmem>> -> memref<8x8x128xbf16, #tpu.memory_space<vmem>>
    %c4_87 = arith.constant 4 : index
    %c0_88 = arith.constant 0 : index
    %c0_89 = arith.constant 0 : index
    %201 = vector.load %200[%c4_87, %c0_88, %c0_89] : memref<8x8x128xbf16, #tpu.memory_space<vmem>>, vector<1x8x128xbf16>
    %202 = vector.shape_cast %201 : vector<1x8x128xbf16> to vector<8x128xbf16>
    %203 = vector.shape_cast %198 : vector<8x128xbf16> to vector<1x8x128xbf16>
    tpu.vector_store %200[%c4_87, %c0_88, %c0_89], %203 {strides = array<i32>} : memref<8x8x128xbf16, #tpu.memory_space<vmem>>, vector<1x8x128xbf16>,
    %c0_90 = arith.constant 0 : index
    %c5 = arith.constant 5 : index
    %c0_91 = arith.constant 0 : index
    %c0_92 = arith.constant 0 : index
    %204 = vector.load %arg11[%c0_90, %c5, %c0_91, %c0_92] : memref<1x8x8x512xbf16, #tpu.memory_space<vmem>>, vector<1x1x8x512xbf16>
    %205 = vector.shape_cast %204 : vector<1x1x8x512xbf16> to vector<8x512xbf16>
    %206 = arith.extf %205 : vector<8x512xbf16> to vector<8x512xf32>
    %207 = arith.truncf %197 : vector<8x128xf32> to vector<8x128xbf16>
    %cst_93 = arith.constant dense<0.000000e+00> : vector<8x512xf32>
    %208 = tpu.matmul %207, %3, %cst_93 {dimension_numbers = #tpu.dot_dimension_numbers<[1], [0], [0], [1], [0, 0, 1, 1], [], []>} : vector<8x128xbf16>, vector<128x512xbf16>, vector<8x512xf32> -> vector<8x512xf32>
    %209 = arith.addf %206, %208 : vector<8x512xf32>
    %210 = vector.extract_strided_slice %209 {offsets = [0, 0], sizes = [8, 128], strides = [1, 1]} : vector<8x512xf32> to vector<8x128xf32>
    %211 = arith.negf %210 : vector<8x128xf32>
    %212 = math.exp %211 : vector<8x128xf32>
    %cst_94 = arith.constant 1.000000e+00 : f32
    %213 = vector.broadcast %cst_94 : f32 to vector<8x128xf32>
    %214 = arith.addf %213, %212 : vector<8x128xf32>
    %215 = arith.divf %213, %214 : vector<8x128xf32>
    %216 = vector.extract_strided_slice %209 {offsets = [0, 128], sizes = [8, 128], strides = [1, 1]} : vector<8x512xf32> to vector<8x128xf32>
    %217 = arith.negf %216 : vector<8x128xf32>
    %218 = math.exp %217 : vector<8x128xf32>
    %cst_95 = arith.constant 1.000000e+00 : f32
    %219 = vector.broadcast %cst_95 : f32 to vector<8x128xf32>
    %220 = arith.addf %219, %218 : vector<8x128xf32>
    %221 = arith.divf %219, %220 : vector<8x128xf32>
    %222 = vector.extract_strided_slice %209 {offsets = [0, 256], sizes = [8, 128], strides = [1, 1]} : vector<8x512xf32> to vector<8x128xf32>
    %223 = math.tanh %222 : vector<8x128xf32>
    %224 = vector.extract_strided_slice %209 {offsets = [0, 384], sizes = [8, 128], strides = [1, 1]} : vector<8x512xf32> to vector<8x128xf32>
    %225 = arith.negf %224 : vector<8x128xf32>
    %226 = math.exp %225 : vector<8x128xf32>
    %cst_96 = arith.constant 1.000000e+00 : f32
    %227 = vector.broadcast %cst_96 : f32 to vector<8x128xf32>
    %228 = arith.addf %227, %226 : vector<8x128xf32>
    %229 = arith.divf %227, %228 : vector<8x128xf32>
    %230 = arith.mulf %221, %195 : vector<8x128xf32>
    %231 = arith.mulf %215, %223 : vector<8x128xf32>
    %232 = arith.addf %230, %231 : vector<8x128xf32>
    %233 = math.tanh %232 : vector<8x128xf32>
    %234 = arith.mulf %229, %233 : vector<8x128xf32>
    %235 = arith.truncf %234 : vector<8x128xf32> to vector<8x128xbf16>
    %c0_i32_97 = arith.constant 0 : i32
    %c0_i32_98 = arith.constant 0 : i32
    %c0_i32_99 = arith.constant 0 : i32
    %c0_i32_100 = arith.constant 0 : i32
    %236 = tpu.memref_slice %arg12[%c0_i32_97, %c0_i32_98, %c0_i32_99, %c0_i32_100] : memref<1x8x8x128xbf16, #tpu.memory_space<vmem>> -> memref<1x8x8x128xbf16, #tpu.memory_space<vmem>>
    %237 = tpu.memref_squeeze %236 : memref<1x8x8x128xbf16, #tpu.memory_space<vmem>> -> memref<8x8x128xbf16, #tpu.memory_space<vmem>>
    %c5_101 = arith.constant 5 : index
    %c0_102 = arith.constant 0 : index
    %c0_103 = arith.constant 0 : index
    %238 = vector.load %237[%c5_101, %c0_102, %c0_103] : memref<8x8x128xbf16, #tpu.memory_space<vmem>>, vector<1x8x128xbf16>
    %239 = vector.shape_cast %238 : vector<1x8x128xbf16> to vector<8x128xbf16>
    %240 = vector.shape_cast %235 : vector<8x128xbf16> to vector<1x8x128xbf16>
    tpu.vector_store %237[%c5_101, %c0_102, %c0_103], %240 {strides = array<i32>} : memref<8x8x128xbf16, #tpu.memory_space<vmem>>, vector<1x8x128xbf16>,
    %c0_104 = arith.constant 0 : index
    %c6 = arith.constant 6 : index
    %c0_105 = arith.constant 0 : index
    %c0_106 = arith.constant 0 : index
    %241 = vector.load %arg11[%c0_104, %c6, %c0_105, %c0_106] : memref<1x8x8x512xbf16, #tpu.memory_space<vmem>>, vector<1x1x8x512xbf16>
    %242 = vector.shape_cast %241 : vector<1x1x8x512xbf16> to vector<8x512xbf16>
    %243 = arith.extf %242 : vector<8x512xbf16> to vector<8x512xf32>
    %244 = arith.truncf %234 : vector<8x128xf32> to vector<8x128xbf16>
    %cst_107 = arith.constant dense<0.000000e+00> : vector<8x512xf32>
    %245 = tpu.matmul %244, %3, %cst_107 {dimension_numbers = #tpu.dot_dimension_numbers<[1], [0], [0], [1], [0, 0, 1, 1], [], []>} : vector<8x128xbf16>, vector<128x512xbf16>, vector<8x512xf32> -> vector<8x512xf32>
    %246 = arith.addf %243, %245 : vector<8x512xf32>
    %247 = vector.extract_strided_slice %246 {offsets = [0, 0], sizes = [8, 128], strides = [1, 1]} : vector<8x512xf32> to vector<8x128xf32>
    %248 = arith.negf %247 : vector<8x128xf32>
    %249 = math.exp %248 : vector<8x128xf32>
    %cst_108 = arith.constant 1.000000e+00 : f32
    %250 = vector.broadcast %cst_108 : f32 to vector<8x128xf32>
    %251 = arith.addf %250, %249 : vector<8x128xf32>
    %252 = arith.divf %250, %251 : vector<8x128xf32>
    %253 = vector.extract_strided_slice %246 {offsets = [0, 128], sizes = [8, 128], strides = [1, 1]} : vector<8x512xf32> to vector<8x128xf32>
    %254 = arith.negf %253 : vector<8x128xf32>
    %255 = math.exp %254 : vector<8x128xf32>
    %cst_109 = arith.constant 1.000000e+00 : f32
    %256 = vector.broadcast %cst_109 : f32 to vector<8x128xf32>
    %257 = arith.addf %256, %255 : vector<8x128xf32>
    %258 = arith.divf %256, %257 : vector<8x128xf32>
    %259 = vector.extract_strided_slice %246 {offsets = [0, 256], sizes = [8, 128], strides = [1, 1]} : vector<8x512xf32> to vector<8x128xf32>
    %260 = math.tanh %259 : vector<8x128xf32>
    %261 = vector.extract_strided_slice %246 {offsets = [0, 384], sizes = [8, 128], strides = [1, 1]} : vector<8x512xf32> to vector<8x128xf32>
    %262 = arith.negf %261 : vector<8x128xf32>
    %263 = math.exp %262 : vector<8x128xf32>
    %cst_110 = arith.constant 1.000000e+00 : f32
    %264 = vector.broadcast %cst_110 : f32 to vector<8x128xf32>
    %265 = arith.addf %264, %263 : vector<8x128xf32>
    %266 = arith.divf %264, %265 : vector<8x128xf32>
    %267 = arith.mulf %258, %232 : vector<8x128xf32>
    %268 = arith.mulf %252, %260 : vector<8x128xf32>
    %269 = arith.addf %267, %268 : vector<8x128xf32>
    %270 = math.tanh %269 : vector<8x128xf32>
    %271 = arith.mulf %266, %270 : vector<8x128xf32>
    %272 = arith.truncf %271 : vector<8x128xf32> to vector<8x128xbf16>
    %c0_i32_111 = arith.constant 0 : i32
    %c0_i32_112 = arith.constant 0 : i32
    %c0_i32_113 = arith.constant 0 : i32
    %c0_i32_114 = arith.constant 0 : i32
    %273 = tpu.memref_slice %arg12[%c0_i32_111, %c0_i32_112, %c0_i32_113, %c0_i32_114] : memref<1x8x8x128xbf16, #tpu.memory_space<vmem>> -> memref<1x8x8x128xbf16, #tpu.memory_space<vmem>>
    %274 = tpu.memref_squeeze %273 : memref<1x8x8x128xbf16, #tpu.memory_space<vmem>> -> memref<8x8x128xbf16, #tpu.memory_space<vmem>>
    %c6_115 = arith.constant 6 : index
    %c0_116 = arith.constant 0 : index
    %c0_117 = arith.constant 0 : index
    %275 = vector.load %274[%c6_115, %c0_116, %c0_117] : memref<8x8x128xbf16, #tpu.memory_space<vmem>>, vector<1x8x128xbf16>
    %276 = vector.shape_cast %275 : vector<1x8x128xbf16> to vector<8x128xbf16>
    %277 = vector.shape_cast %272 : vector<8x128xbf16> to vector<1x8x128xbf16>
    tpu.vector_store %274[%c6_115, %c0_116, %c0_117], %277 {strides = array<i32>} : memref<8x8x128xbf16, #tpu.memory_space<vmem>>, vector<1x8x128xbf16>,
    %c0_118 = arith.constant 0 : index
    %c7 = arith.constant 7 : index
    %c0_119 = arith.constant 0 : index
    %c0_120 = arith.constant 0 : index
    %278 = vector.load %arg11[%c0_118, %c7, %c0_119, %c0_120] : memref<1x8x8x512xbf16, #tpu.memory_space<vmem>>, vector<1x1x8x512xbf16>
    %279 = vector.shape_cast %278 : vector<1x1x8x512xbf16> to vector<8x512xbf16>
    %280 = arith.extf %279 : vector<8x512xbf16> to vector<8x512xf32>
    %281 = arith.truncf %271 : vector<8x128xf32> to vector<8x128xbf16>
    %cst_121 = arith.constant dense<0.000000e+00> : vector<8x512xf32>
    %282 = tpu.matmul %281, %3, %cst_121 {dimension_numbers = #tpu.dot_dimension_numbers<[1], [0], [0], [1], [0, 0, 1, 1], [], []>} : vector<8x128xbf16>, vector<128x512xbf16>, vector<8x512xf32> -> vector<8x512xf32>
    %283 = arith.addf %280, %282 : vector<8x512xf32>
    %284 = vector.extract_strided_slice %283 {offsets = [0, 0], sizes = [8, 128], strides = [1, 1]} : vector<8x512xf32> to vector<8x128xf32>
    %285 = arith.negf %284 : vector<8x128xf32>
    %286 = math.exp %285 : vector<8x128xf32>
    %cst_122 = arith.constant 1.000000e+00 : f32
    %287 = vector.broadcast %cst_122 : f32 to vector<8x128xf32>
    %288 = arith.addf %287, %286 : vector<8x128xf32>
    %289 = arith.divf %287, %288 : vector<8x128xf32>
    %290 = vector.extract_strided_slice %283 {offsets = [0, 128], sizes = [8, 128], strides = [1, 1]} : vector<8x512xf32> to vector<8x128xf32>
    %291 = arith.negf %290 : vector<8x128xf32>
    %292 = math.exp %291 : vector<8x128xf32>
    %cst_123 = arith.constant 1.000000e+00 : f32
    %293 = vector.broadcast %cst_123 : f32 to vector<8x128xf32>
    %294 = arith.addf %293, %292 : vector<8x128xf32>
    %295 = arith.divf %293, %294 : vector<8x128xf32>
    %296 = vector.extract_strided_slice %283 {offsets = [0, 256], sizes = [8, 128], strides = [1, 1]} : vector<8x512xf32> to vector<8x128xf32>
    %297 = math.tanh %296 : vector<8x128xf32>
    %298 = vector.extract_strided_slice %283 {offsets = [0, 384], sizes = [8, 128], strides = [1, 1]} : vector<8x512xf32> to vector<8x128xf32>
    %299 = arith.negf %298 : vector<8x128xf32>
    %300 = math.exp %299 : vector<8x128xf32>
    %cst_124 = arith.constant 1.000000e+00 : f32
    %301 = vector.broadcast %cst_124 : f32 to vector<8x128xf32>
    %302 = arith.addf %301, %300 : vector<8x128xf32>
    %303 = arith.divf %301, %302 : vector<8x128xf32>
    %304 = arith.mulf %295, %269 : vector<8x128xf32>
    %305 = arith.mulf %289, %297 : vector<8x128xf32>
    %306 = arith.addf %304, %305 : vector<8x128xf32>
    %307 = math.tanh %306 : vector<8x128xf32>
    %308 = arith.mulf %303, %307 : vector<8x128xf32>
    %309 = arith.truncf %308 : vector<8x128xf32> to vector<8x128xbf16>
    %c0_i32_125 = arith.constant 0 : i32
    %c0_i32_126 = arith.constant 0 : i32
    %c0_i32_127 = arith.constant 0 : i32
    %c0_i32_128 = arith.constant 0 : i32
    %310 = tpu.memref_slice %arg12[%c0_i32_125, %c0_i32_126, %c0_i32_127, %c0_i32_128] : memref<1x8x8x128xbf16, #tpu.memory_space<vmem>> -> memref<1x8x8x128xbf16, #tpu.memory_space<vmem>>
    %311 = tpu.memref_squeeze %310 : memref<1x8x8x128xbf16, #tpu.memory_space<vmem>> -> memref<8x8x128xbf16, #tpu.memory_space<vmem>>
    %c7_129 = arith.constant 7 : index
    %c0_130 = arith.constant 0 : index
    %c0_131 = arith.constant 0 : index
    %312 = vector.load %311[%c7_129, %c0_130, %c0_131] : memref<8x8x128xbf16, #tpu.memory_space<vmem>>, vector<1x8x128xbf16>
    %313 = vector.shape_cast %312 : vector<1x8x128xbf16> to vector<8x128xbf16>
    %314 = vector.shape_cast %309 : vector<8x128xbf16> to vector<1x8x128xbf16>
    tpu.vector_store %311[%c7_129, %c0_130, %c0_131], %314 {strides = array<i32>} : memref<8x8x128xbf16, #tpu.memory_space<vmem>>, vector<1x8x128xbf16>,
    %c0_132 = arith.constant 0 : index
    %c0_133 = arith.constant 0 : index
    %c0_134 = arith.constant 0 : index
    %315 = vector.load %arg9[%c0_132, %c0_133, %c0_134] : memref<2x8x128xf32, #tpu.memory_space<vmem>>, vector<1x8x128xf32>
    %316 = vector.shape_cast %315 : vector<1x8x128xf32> to vector<8x128xf32>
    %317 = vector.shape_cast %308 : vector<8x128xf32> to vector<1x8x128xf32>
    tpu.vector_store %arg9[%c0_132, %c0_133, %c0_134], %317 {strides = array<i32>} : memref<2x8x128xf32, #tpu.memory_space<vmem>>, vector<1x8x128xf32>,
    %c0_135 = arith.constant 0 : index
    %c0_136 = arith.constant 0 : index
    %c0_137 = arith.constant 0 : index
    %318 = vector.load %arg10[%c0_135, %c0_136, %c0_137] : memref<2x8x128xf32, #tpu.memory_space<vmem>>, vector<1x8x128xf32>
    %319 = vector.shape_cast %318 : vector<1x8x128xf32> to vector<8x128xf32>
    %320 = vector.shape_cast %306 : vector<8x128xf32> to vector<1x8x128xf32>
    tpu.vector_store %arg10[%c0_135, %c0_136, %c0_137], %320 {strides = array<i32>} : memref<2x8x128xf32, #tpu.memory_space<vmem>>, vector<1x8x128xf32>,
    %c1_138 = arith.constant 1 : index
    %c0_139 = arith.constant 0 : index
    %c0_140 = arith.constant 0 : index
    %321 = vector.load %arg5[%c1_138, %c0_139, %c0_140] : memref<2x1x512xf32, #tpu.memory_space<vmem>>, vector<1x1x512xf32>
    %322 = vector.shape_cast %321 : vector<1x1x512xf32> to vector<1x512xf32>
    %c1_141 = arith.constant 1 : index
    %c0_142 = arith.constant 0 : index
    %c0_143 = arith.constant 0 : index
    %323 = vector.load %arg4[%c1_141, %c0_142, %c0_143] : memref<2x128x512xbf16, #tpu.memory_space<vmem>>, vector<1x128x512xbf16>
    %324 = vector.shape_cast %323 : vector<1x128x512xbf16> to vector<128x512xbf16>
    %c1_144 = arith.constant 1 : index
    %c0_145 = arith.constant 0 : index
    %c0_146 = arith.constant 0 : index
    %325 = vector.load %arg6[%c1_144, %c0_145, %c0_146] : memref<2x8x128xf32, #tpu.memory_space<vmem>>, vector<1x8x128xf32>
    %326 = vector.shape_cast %325 : vector<1x8x128xf32> to vector<8x128xf32>
    %c1_147 = arith.constant 1 : index
    %c0_148 = arith.constant 0 : index
    %c0_149 = arith.constant 0 : index
    %327 = vector.load %arg7[%c1_147, %c0_148, %c0_149] : memref<2x8x128xf32, #tpu.memory_space<vmem>>, vector<1x8x128xf32>
    %328 = vector.shape_cast %327 : vector<1x8x128xf32> to vector<8x128xf32>
    %c0_150 = arith.constant 0 : index
    %c0_151 = arith.constant 0 : index
    %c0_152 = arith.constant 0 : index
    %c0_153 = arith.constant 0 : index
    %329 = vector.load %arg12[%c0_150, %c0_151, %c0_152, %c0_153] : memref<1x8x8x128xbf16, #tpu.memory_space<vmem>>, vector<1x8x8x128xbf16>
    %330 = vector.shape_cast %329 : vector<1x8x8x128xbf16> to vector<8x8x128xbf16>
    %331 = vector.shape_cast %330 : vector<8x8x128xbf16> to vector<64x128xbf16>
    %c0_154 = arith.constant 0 : index
    %c0_155 = arith.constant 0 : index
    %c0_156 = arith.constant 0 : index
    %332 = vector.load %arg3[%c0_154, %c0_155, %c0_156] : memref<1x128x512xbf16, #tpu.memory_space<vmem>>, vector<1x128x512xbf16>
    %333 = vector.shape_cast %332 : vector<1x128x512xbf16> to vector<128x512xbf16>
    %cst_157 = arith.constant dense<0.000000e+00> : vector<64x512xf32>
    %334 = tpu.matmul %331, %333, %cst_157 {dimension_numbers = #tpu.dot_dimension_numbers<[1], [0], [0], [1], [0, 0, 1, 1], [], []>} : vector<64x128xbf16>, vector<128x512xbf16>, vector<64x512xf32> -> vector<64x512xf32>
    %335 = vector.broadcast %322 : vector<1x512xf32> to vector<64x512xf32>
    %336 = arith.addf %334, %335 : vector<64x512xf32>
    %337 = vector.shape_cast %336 : vector<64x512xf32> to vector<8x8x512xf32>
    %338 = arith.truncf %337 : vector<8x8x512xf32> to vector<8x8x512xbf16>
    %c0_158 = arith.constant 0 : index
    %c0_159 = arith.constant 0 : index
    %c0_160 = arith.constant 0 : index
    %c0_161 = arith.constant 0 : index
    %339 = vector.load %arg11[%c0_158, %c0_159, %c0_160, %c0_161] : memref<1x8x8x512xbf16, #tpu.memory_space<vmem>>, vector<1x8x8x512xbf16>
    %340 = vector.shape_cast %339 : vector<1x8x8x512xbf16> to vector<8x8x512xbf16>
    %341 = vector.shape_cast %338 : vector<8x8x512xbf16> to vector<1x8x8x512xbf16>
    tpu.vector_store %arg11[%c0_158, %c0_159, %c0_160, %c0_161], %341 {strides = array<i32>} : memref<1x8x8x512xbf16, #tpu.memory_space<vmem>>, vector<1x8x8x512xbf16>,
    %c0_162 = arith.constant 0 : index
    %c0_163 = arith.constant 0 : index
    %c0_164 = arith.constant 0 : index
    %c0_165 = arith.constant 0 : index
    %342 = vector.load %arg11[%c0_162, %c0_163, %c0_164, %c0_165] : memref<1x8x8x512xbf16, #tpu.memory_space<vmem>>, vector<1x1x8x512xbf16>
    %343 = vector.shape_cast %342 : vector<1x1x8x512xbf16> to vector<8x512xbf16>
    %344 = arith.extf %343 : vector<8x512xbf16> to vector<8x512xf32>
    %345 = arith.truncf %326 : vector<8x128xf32> to vector<8x128xbf16>
    %cst_166 = arith.constant dense<0.000000e+00> : vector<8x512xf32>
    %346 = tpu.matmul %345, %324, %cst_166 {dimension_numbers = #tpu.dot_dimension_numbers<[1], [0], [0], [1], [0, 0, 1, 1], [], []>} : vector<8x128xbf16>, vector<128x512xbf16>, vector<8x512xf32> -> vector<8x512xf32>
    %347 = arith.addf %344, %346 : vector<8x512xf32>
    %348 = vector.extract_strided_slice %347 {offsets = [0, 0], sizes = [8, 128], strides = [1, 1]} : vector<8x512xf32> to vector<8x128xf32>
    %349 = arith.negf %348 : vector<8x128xf32>
    %350 = math.exp %349 : vector<8x128xf32>
    %cst_167 = arith.constant 1.000000e+00 : f32
    %351 = vector.broadcast %cst_167 : f32 to vector<8x128xf32>
    %352 = arith.addf %351, %350 : vector<8x128xf32>
    %353 = arith.divf %351, %352 : vector<8x128xf32>
    %354 = vector.extract_strided_slice %347 {offsets = [0, 128], sizes = [8, 128], strides = [1, 1]} : vector<8x512xf32> to vector<8x128xf32>
    %355 = arith.negf %354 : vector<8x128xf32>
    %356 = math.exp %355 : vector<8x128xf32>
    %cst_168 = arith.constant 1.000000e+00 : f32
    %357 = vector.broadcast %cst_168 : f32 to vector<8x128xf32>
    %358 = arith.addf %357, %356 : vector<8x128xf32>
    %359 = arith.divf %357, %358 : vector<8x128xf32>
    %360 = vector.extract_strided_slice %347 {offsets = [0, 256], sizes = [8, 128], strides = [1, 1]} : vector<8x512xf32> to vector<8x128xf32>
    %361 = math.tanh %360 : vector<8x128xf32>
    %362 = vector.extract_strided_slice %347 {offsets = [0, 384], sizes = [8, 128], strides = [1, 1]} : vector<8x512xf32> to vector<8x128xf32>
    %363 = arith.negf %362 : vector<8x128xf32>
    %364 = math.exp %363 : vector<8x128xf32>
    %cst_169 = arith.constant 1.000000e+00 : f32
    %365 = vector.broadcast %cst_169 : f32 to vector<8x128xf32>
    %366 = arith.addf %365, %364 : vector<8x128xf32>
    %367 = arith.divf %365, %366 : vector<8x128xf32>
    %368 = arith.mulf %359, %328 : vector<8x128xf32>
    %369 = arith.mulf %353, %361 : vector<8x128xf32>
    %370 = arith.addf %368, %369 : vector<8x128xf32>
    %371 = math.tanh %370 : vector<8x128xf32>
    %372 = arith.mulf %367, %371 : vector<8x128xf32>
    %373 = arith.truncf %372 : vector<8x128xf32> to vector<8x128xbf16>
    %c0_170 = arith.constant 0 : index
    %c0_171 = arith.constant 0 : index
    %c0_172 = arith.constant 0 : index
    %374 = vector.load %arg8[%c0_170, %c0_171, %c0_172] : memref<8x8x128xbf16, #tpu.memory_space<vmem>>, vector<1x8x128xbf16>
    %375 = vector.shape_cast %374 : vector<1x8x128xbf16> to vector<8x128xbf16>
    %376 = vector.shape_cast %373 : vector<8x128xbf16> to vector<1x8x128xbf16>
    tpu.vector_store %arg8[%c0_170, %c0_171, %c0_172], %376 {strides = array<i32>} : memref<8x8x128xbf16, #tpu.memory_space<vmem>>, vector<1x8x128xbf16>,
    %c0_173 = arith.constant 0 : index
    %c1_174 = arith.constant 1 : index
    %c0_175 = arith.constant 0 : index
    %c0_176 = arith.constant 0 : index
    %377 = vector.load %arg11[%c0_173, %c1_174, %c0_175, %c0_176] : memref<1x8x8x512xbf16, #tpu.memory_space<vmem>>, vector<1x1x8x512xbf16>
    %378 = vector.shape_cast %377 : vector<1x1x8x512xbf16> to vector<8x512xbf16>
    %379 = arith.extf %378 : vector<8x512xbf16> to vector<8x512xf32>
    %380 = arith.truncf %372 : vector<8x128xf32> to vector<8x128xbf16>
    %cst_177 = arith.constant dense<0.000000e+00> : vector<8x512xf32>
    %381 = tpu.matmul %380, %324, %cst_177 {dimension_numbers = #tpu.dot_dimension_numbers<[1], [0], [0], [1], [0, 0, 1, 1], [], []>} : vector<8x128xbf16>, vector<128x512xbf16>, vector<8x512xf32> -> vector<8x512xf32>
    %382 = arith.addf %379, %381 : vector<8x512xf32>
    %383 = vector.extract_strided_slice %382 {offsets = [0, 0], sizes = [8, 128], strides = [1, 1]} : vector<8x512xf32> to vector<8x128xf32>
    %384 = arith.negf %383 : vector<8x128xf32>
    %385 = math.exp %384 : vector<8x128xf32>
    %cst_178 = arith.constant 1.000000e+00 : f32
    %386 = vector.broadcast %cst_178 : f32 to vector<8x128xf32>
    %387 = arith.addf %386, %385 : vector<8x128xf32>
    %388 = arith.divf %386, %387 : vector<8x128xf32>
    %389 = vector.extract_strided_slice %382 {offsets = [0, 128], sizes = [8, 128], strides = [1, 1]} : vector<8x512xf32> to vector<8x128xf32>
    %390 = arith.negf %389 : vector<8x128xf32>
    %391 = math.exp %390 : vector<8x128xf32>
    %cst_179 = arith.constant 1.000000e+00 : f32
    %392 = vector.broadcast %cst_179 : f32 to vector<8x128xf32>
    %393 = arith.addf %392, %391 : vector<8x128xf32>
    %394 = arith.divf %392, %393 : vector<8x128xf32>
    %395 = vector.extract_strided_slice %382 {offsets = [0, 256], sizes = [8, 128], strides = [1, 1]} : vector<8x512xf32> to vector<8x128xf32>
    %396 = math.tanh %395 : vector<8x128xf32>
    %397 = vector.extract_strided_slice %382 {offsets = [0, 384], sizes = [8, 128], strides = [1, 1]} : vector<8x512xf32> to vector<8x128xf32>
    %398 = arith.negf %397 : vector<8x128xf32>
    %399 = math.exp %398 : vector<8x128xf32>
    %cst_180 = arith.constant 1.000000e+00 : f32
    %400 = vector.broadcast %cst_180 : f32 to vector<8x128xf32>
    %401 = arith.addf %400, %399 : vector<8x128xf32>
    %402 = arith.divf %400, %401 : vector<8x128xf32>
    %403 = arith.mulf %394, %370 : vector<8x128xf32>
    %404 = arith.mulf %388, %396 : vector<8x128xf32>
    %405 = arith.addf %403, %404 : vector<8x128xf32>
    %406 = math.tanh %405 : vector<8x128xf32>
    %407 = arith.mulf %402, %406 : vector<8x128xf32>
    %408 = arith.truncf %407 : vector<8x128xf32> to vector<8x128xbf16>
    %c1_181 = arith.constant 1 : index
    %c0_182 = arith.constant 0 : index
    %c0_183 = arith.constant 0 : index
    %409 = vector.load %arg8[%c1_181, %c0_182, %c0_183] : memref<8x8x128xbf16, #tpu.memory_space<vmem>>, vector<1x8x128xbf16>
    %410 = vector.shape_cast %409 : vector<1x8x128xbf16> to vector<8x128xbf16>
    %411 = vector.shape_cast %408 : vector<8x128xbf16> to vector<1x8x128xbf16>
    tpu.vector_store %arg8[%c1_181, %c0_182, %c0_183], %411 {strides = array<i32>} : memref<8x8x128xbf16, #tpu.memory_space<vmem>>, vector<1x8x128xbf16>,
    %c0_184 = arith.constant 0 : index
    %c2_185 = arith.constant 2 : index
    %c0_186 = arith.constant 0 : index
    %c0_187 = arith.constant 0 : index
    %412 = vector.load %arg11[%c0_184, %c2_185, %c0_186, %c0_187] : memref<1x8x8x512xbf16, #tpu.memory_space<vmem>>, vector<1x1x8x512xbf16>
    %413 = vector.shape_cast %412 : vector<1x1x8x512xbf16> to vector<8x512xbf16>
    %414 = arith.extf %413 : vector<8x512xbf16> to vector<8x512xf32>
    %415 = arith.truncf %407 : vector<8x128xf32> to vector<8x128xbf16>
    %cst_188 = arith.constant dense<0.000000e+00> : vector<8x512xf32>
    %416 = tpu.matmul %415, %324, %cst_188 {dimension_numbers = #tpu.dot_dimension_numbers<[1], [0], [0], [1], [0, 0, 1, 1], [], []>} : vector<8x128xbf16>, vector<128x512xbf16>, vector<8x512xf32> -> vector<8x512xf32>
    %417 = arith.addf %414, %416 : vector<8x512xf32>
    %418 = vector.extract_strided_slice %417 {offsets = [0, 0], sizes = [8, 128], strides = [1, 1]} : vector<8x512xf32> to vector<8x128xf32>
    %419 = arith.negf %418 : vector<8x128xf32>
    %420 = math.exp %419 : vector<8x128xf32>
    %cst_189 = arith.constant 1.000000e+00 : f32
    %421 = vector.broadcast %cst_189 : f32 to vector<8x128xf32>
    %422 = arith.addf %421, %420 : vector<8x128xf32>
    %423 = arith.divf %421, %422 : vector<8x128xf32>
    %424 = vector.extract_strided_slice %417 {offsets = [0, 128], sizes = [8, 128], strides = [1, 1]} : vector<8x512xf32> to vector<8x128xf32>
    %425 = arith.negf %424 : vector<8x128xf32>
    %426 = math.exp %425 : vector<8x128xf32>
    %cst_190 = arith.constant 1.000000e+00 : f32
    %427 = vector.broadcast %cst_190 : f32 to vector<8x128xf32>
    %428 = arith.addf %427, %426 : vector<8x128xf32>
    %429 = arith.divf %427, %428 : vector<8x128xf32>
    %430 = vector.extract_strided_slice %417 {offsets = [0, 256], sizes = [8, 128], strides = [1, 1]} : vector<8x512xf32> to vector<8x128xf32>
    %431 = math.tanh %430 : vector<8x128xf32>
    %432 = vector.extract_strided_slice %417 {offsets = [0, 384], sizes = [8, 128], strides = [1, 1]} : vector<8x512xf32> to vector<8x128xf32>
    %433 = arith.negf %432 : vector<8x128xf32>
    %434 = math.exp %433 : vector<8x128xf32>
    %cst_191 = arith.constant 1.000000e+00 : f32
    %435 = vector.broadcast %cst_191 : f32 to vector<8x128xf32>
    %436 = arith.addf %435, %434 : vector<8x128xf32>
    %437 = arith.divf %435, %436 : vector<8x128xf32>
    %438 = arith.mulf %429, %405 : vector<8x128xf32>
    %439 = arith.mulf %423, %431 : vector<8x128xf32>
    %440 = arith.addf %438, %439 : vector<8x128xf32>
    %441 = math.tanh %440 : vector<8x128xf32>
    %442 = arith.mulf %437, %441 : vector<8x128xf32>
    %443 = arith.truncf %442 : vector<8x128xf32> to vector<8x128xbf16>
    %c2_192 = arith.constant 2 : index
    %c0_193 = arith.constant 0 : index
    %c0_194 = arith.constant 0 : index
    %444 = vector.load %arg8[%c2_192, %c0_193, %c0_194] : memref<8x8x128xbf16, #tpu.memory_space<vmem>>, vector<1x8x128xbf16>
    %445 = vector.shape_cast %444 : vector<1x8x128xbf16> to vector<8x128xbf16>
    %446 = vector.shape_cast %443 : vector<8x128xbf16> to vector<1x8x128xbf16>
    tpu.vector_store %arg8[%c2_192, %c0_193, %c0_194], %446 {strides = array<i32>} : memref<8x8x128xbf16, #tpu.memory_space<vmem>>, vector<1x8x128xbf16>,
    %c0_195 = arith.constant 0 : index
    %c3_196 = arith.constant 3 : index
    %c0_197 = arith.constant 0 : index
    %c0_198 = arith.constant 0 : index
    %447 = vector.load %arg11[%c0_195, %c3_196, %c0_197, %c0_198] : memref<1x8x8x512xbf16, #tpu.memory_space<vmem>>, vector<1x1x8x512xbf16>
    %448 = vector.shape_cast %447 : vector<1x1x8x512xbf16> to vector<8x512xbf16>
    %449 = arith.extf %448 : vector<8x512xbf16> to vector<8x512xf32>
    %450 = arith.truncf %442 : vector<8x128xf32> to vector<8x128xbf16>
    %cst_199 = arith.constant dense<0.000000e+00> : vector<8x512xf32>
    %451 = tpu.matmul %450, %324, %cst_199 {dimension_numbers = #tpu.dot_dimension_numbers<[1], [0], [0], [1], [0, 0, 1, 1], [], []>} : vector<8x128xbf16>, vector<128x512xbf16>, vector<8x512xf32> -> vector<8x512xf32>
    %452 = arith.addf %449, %451 : vector<8x512xf32>
    %453 = vector.extract_strided_slice %452 {offsets = [0, 0], sizes = [8, 128], strides = [1, 1]} : vector<8x512xf32> to vector<8x128xf32>
    %454 = arith.negf %453 : vector<8x128xf32>
    %455 = math.exp %454 : vector<8x128xf32>
    %cst_200 = arith.constant 1.000000e+00 : f32
    %456 = vector.broadcast %cst_200 : f32 to vector<8x128xf32>
    %457 = arith.addf %456, %455 : vector<8x128xf32>
    %458 = arith.divf %456, %457 : vector<8x128xf32>
    %459 = vector.extract_strided_slice %452 {offsets = [0, 128], sizes = [8, 128], strides = [1, 1]} : vector<8x512xf32> to vector<8x128xf32>
    %460 = arith.negf %459 : vector<8x128xf32>
    %461 = math.exp %460 : vector<8x128xf32>
    %cst_201 = arith.constant 1.000000e+00 : f32
    %462 = vector.broadcast %cst_201 : f32 to vector<8x128xf32>
    %463 = arith.addf %462, %461 : vector<8x128xf32>
    %464 = arith.divf %462, %463 : vector<8x128xf32>
    %465 = vector.extract_strided_slice %452 {offsets = [0, 256], sizes = [8, 128], strides = [1, 1]} : vector<8x512xf32> to vector<8x128xf32>
    %466 = math.tanh %465 : vector<8x128xf32>
    %467 = vector.extract_strided_slice %452 {offsets = [0, 384], sizes = [8, 128], strides = [1, 1]} : vector<8x512xf32> to vector<8x128xf32>
    %468 = arith.negf %467 : vector<8x128xf32>
    %469 = math.exp %468 : vector<8x128xf32>
    %cst_202 = arith.constant 1.000000e+00 : f32
    %470 = vector.broadcast %cst_202 : f32 to vector<8x128xf32>
    %471 = arith.addf %470, %469 : vector<8x128xf32>
    %472 = arith.divf %470, %471 : vector<8x128xf32>
    %473 = arith.mulf %464, %440 : vector<8x128xf32>
    %474 = arith.mulf %458, %466 : vector<8x128xf32>
    %475 = arith.addf %473, %474 : vector<8x128xf32>
    %476 = math.tanh %475 : vector<8x128xf32>
    %477 = arith.mulf %472, %476 : vector<8x128xf32>
    %478 = arith.truncf %477 : vector<8x128xf32> to vector<8x128xbf16>
    %c3_203 = arith.constant 3 : index
    %c0_204 = arith.constant 0 : index
    %c0_205 = arith.constant 0 : index
    %479 = vector.load %arg8[%c3_203, %c0_204, %c0_205] : memref<8x8x128xbf16, #tpu.memory_space<vmem>>, vector<1x8x128xbf16>
    %480 = vector.shape_cast %479 : vector<1x8x128xbf16> to vector<8x128xbf16>
    %481 = vector.shape_cast %478 : vector<8x128xbf16> to vector<1x8x128xbf16>
    tpu.vector_store %arg8[%c3_203, %c0_204, %c0_205], %481 {strides = array<i32>} : memref<8x8x128xbf16, #tpu.memory_space<vmem>>, vector<1x8x128xbf16>,
    %c0_206 = arith.constant 0 : index
    %c4_207 = arith.constant 4 : index
    %c0_208 = arith.constant 0 : index
    %c0_209 = arith.constant 0 : index
    %482 = vector.load %arg11[%c0_206, %c4_207, %c0_208, %c0_209] : memref<1x8x8x512xbf16, #tpu.memory_space<vmem>>, vector<1x1x8x512xbf16>
    %483 = vector.shape_cast %482 : vector<1x1x8x512xbf16> to vector<8x512xbf16>
    %484 = arith.extf %483 : vector<8x512xbf16> to vector<8x512xf32>
    %485 = arith.truncf %477 : vector<8x128xf32> to vector<8x128xbf16>
    %cst_210 = arith.constant dense<0.000000e+00> : vector<8x512xf32>
    %486 = tpu.matmul %485, %324, %cst_210 {dimension_numbers = #tpu.dot_dimension_numbers<[1], [0], [0], [1], [0, 0, 1, 1], [], []>} : vector<8x128xbf16>, vector<128x512xbf16>, vector<8x512xf32> -> vector<8x512xf32>
    %487 = arith.addf %484, %486 : vector<8x512xf32>
    %488 = vector.extract_strided_slice %487 {offsets = [0, 0], sizes = [8, 128], strides = [1, 1]} : vector<8x512xf32> to vector<8x128xf32>
    %489 = arith.negf %488 : vector<8x128xf32>
    %490 = math.exp %489 : vector<8x128xf32>
    %cst_211 = arith.constant 1.000000e+00 : f32
    %491 = vector.broadcast %cst_211 : f32 to vector<8x128xf32>
    %492 = arith.addf %491, %490 : vector<8x128xf32>
    %493 = arith.divf %491, %492 : vector<8x128xf32>
    %494 = vector.extract_strided_slice %487 {offsets = [0, 128], sizes = [8, 128], strides = [1, 1]} : vector<8x512xf32> to vector<8x128xf32>
    %495 = arith.negf %494 : vector<8x128xf32>
    %496 = math.exp %495 : vector<8x128xf32>
    %cst_212 = arith.constant 1.000000e+00 : f32
    %497 = vector.broadcast %cst_212 : f32 to vector<8x128xf32>
    %498 = arith.addf %497, %496 : vector<8x128xf32>
    %499 = arith.divf %497, %498 : vector<8x128xf32>
    %500 = vector.extract_strided_slice %487 {offsets = [0, 256], sizes = [8, 128], strides = [1, 1]} : vector<8x512xf32> to vector<8x128xf32>
    %501 = math.tanh %500 : vector<8x128xf32>
    %502 = vector.extract_strided_slice %487 {offsets = [0, 384], sizes = [8, 128], strides = [1, 1]} : vector<8x512xf32> to vector<8x128xf32>
    %503 = arith.negf %502 : vector<8x128xf32>
    %504 = math.exp %503 : vector<8x128xf32>
    %cst_213 = arith.constant 1.000000e+00 : f32
    %505 = vector.broadcast %cst_213 : f32 to vector<8x128xf32>
    %506 = arith.addf %505, %504 : vector<8x128xf32>
    %507 = arith.divf %505, %506 : vector<8x128xf32>
    %508 = arith.mulf %499, %475 : vector<8x128xf32>
    %509 = arith.mulf %493, %501 : vector<8x128xf32>
    %510 = arith.addf %508, %509 : vector<8x128xf32>
    %511 = math.tanh %510 : vector<8x128xf32>
    %512 = arith.mulf %507, %511 : vector<8x128xf32>
    %513 = arith.truncf %512 : vector<8x128xf32> to vector<8x128xbf16>
    %c4_214 = arith.constant 4 : index
    %c0_215 = arith.constant 0 : index
    %c0_216 = arith.constant 0 : index
    %514 = vector.load %arg8[%c4_214, %c0_215, %c0_216] : memref<8x8x128xbf16, #tpu.memory_space<vmem>>, vector<1x8x128xbf16>
    %515 = vector.shape_cast %514 : vector<1x8x128xbf16> to vector<8x128xbf16>
    %516 = vector.shape_cast %513 : vector<8x128xbf16> to vector<1x8x128xbf16>
    tpu.vector_store %arg8[%c4_214, %c0_215, %c0_216], %516 {strides = array<i32>} : memref<8x8x128xbf16, #tpu.memory_space<vmem>>, vector<1x8x128xbf16>,
    %c0_217 = arith.constant 0 : index
    %c5_218 = arith.constant 5 : index
    %c0_219 = arith.constant 0 : index
    %c0_220 = arith.constant 0 : index
    %517 = vector.load %arg11[%c0_217, %c5_218, %c0_219, %c0_220] : memref<1x8x8x512xbf16, #tpu.memory_space<vmem>>, vector<1x1x8x512xbf16>
    %518 = vector.shape_cast %517 : vector<1x1x8x512xbf16> to vector<8x512xbf16>
    %519 = arith.extf %518 : vector<8x512xbf16> to vector<8x512xf32>
    %520 = arith.truncf %512 : vector<8x128xf32> to vector<8x128xbf16>
    %cst_221 = arith.constant dense<0.000000e+00> : vector<8x512xf32>
    %521 = tpu.matmul %520, %324, %cst_221 {dimension_numbers = #tpu.dot_dimension_numbers<[1], [0], [0], [1], [0, 0, 1, 1], [], []>} : vector<8x128xbf16>, vector<128x512xbf16>, vector<8x512xf32> -> vector<8x512xf32>
    %522 = arith.addf %519, %521 : vector<8x512xf32>
    %523 = vector.extract_strided_slice %522 {offsets = [0, 0], sizes = [8, 128], strides = [1, 1]} : vector<8x512xf32> to vector<8x128xf32>
    %524 = arith.negf %523 : vector<8x128xf32>
    %525 = math.exp %524 : vector<8x128xf32>
    %cst_222 = arith.constant 1.000000e+00 : f32
    %526 = vector.broadcast %cst_222 : f32 to vector<8x128xf32>
    %527 = arith.addf %526, %525 : vector<8x128xf32>
    %528 = arith.divf %526, %527 : vector<8x128xf32>
    %529 = vector.extract_strided_slice %522 {offsets = [0, 128], sizes = [8, 128], strides = [1, 1]} : vector<8x512xf32> to vector<8x128xf32>
    %530 = arith.negf %529 : vector<8x128xf32>
    %531 = math.exp %530 : vector<8x128xf32>
    %cst_223 = arith.constant 1.000000e+00 : f32
    %532 = vector.broadcast %cst_223 : f32 to vector<8x128xf32>
    %533 = arith.addf %532, %531 : vector<8x128xf32>
    %534 = arith.divf %532, %533 : vector<8x128xf32>
    %535 = vector.extract_strided_slice %522 {offsets = [0, 256], sizes = [8, 128], strides = [1, 1]} : vector<8x512xf32> to vector<8x128xf32>
    %536 = math.tanh %535 : vector<8x128xf32>
    %537 = vector.extract_strided_slice %522 {offsets = [0, 384], sizes = [8, 128], strides = [1, 1]} : vector<8x512xf32> to vector<8x128xf32>
    %538 = arith.negf %537 : vector<8x128xf32>
    %539 = math.exp %538 : vector<8x128xf32>
    %cst_224 = arith.constant 1.000000e+00 : f32
    %540 = vector.broadcast %cst_224 : f32 to vector<8x128xf32>
    %541 = arith.addf %540, %539 : vector<8x128xf32>
    %542 = arith.divf %540, %541 : vector<8x128xf32>
    %543 = arith.mulf %534, %510 : vector<8x128xf32>
    %544 = arith.mulf %528, %536 : vector<8x128xf32>
    %545 = arith.addf %543, %544 : vector<8x128xf32>
    %546 = math.tanh %545 : vector<8x128xf32>
    %547 = arith.mulf %542, %546 : vector<8x128xf32>
    %548 = arith.truncf %547 : vector<8x128xf32> to vector<8x128xbf16>
    %c5_225 = arith.constant 5 : index
    %c0_226 = arith.constant 0 : index
    %c0_227 = arith.constant 0 : index
    %549 = vector.load %arg8[%c5_225, %c0_226, %c0_227] : memref<8x8x128xbf16, #tpu.memory_space<vmem>>, vector<1x8x128xbf16>
    %550 = vector.shape_cast %549 : vector<1x8x128xbf16> to vector<8x128xbf16>
    %551 = vector.shape_cast %548 : vector<8x128xbf16> to vector<1x8x128xbf16>
    tpu.vector_store %arg8[%c5_225, %c0_226, %c0_227], %551 {strides = array<i32>} : memref<8x8x128xbf16, #tpu.memory_space<vmem>>, vector<1x8x128xbf16>,
    %c0_228 = arith.constant 0 : index
    %c6_229 = arith.constant 6 : index
    %c0_230 = arith.constant 0 : index
    %c0_231 = arith.constant 0 : index
    %552 = vector.load %arg11[%c0_228, %c6_229, %c0_230, %c0_231] : memref<1x8x8x512xbf16, #tpu.memory_space<vmem>>, vector<1x1x8x512xbf16>
    %553 = vector.shape_cast %552 : vector<1x1x8x512xbf16> to vector<8x512xbf16>
    %554 = arith.extf %553 : vector<8x512xbf16> to vector<8x512xf32>
    %555 = arith.truncf %547 : vector<8x128xf32> to vector<8x128xbf16>
    %cst_232 = arith.constant dense<0.000000e+00> : vector<8x512xf32>
    %556 = tpu.matmul %555, %324, %cst_232 {dimension_numbers = #tpu.dot_dimension_numbers<[1], [0], [0], [1], [0, 0, 1, 1], [], []>} : vector<8x128xbf16>, vector<128x512xbf16>, vector<8x512xf32> -> vector<8x512xf32>
    %557 = arith.addf %554, %556 : vector<8x512xf32>
    %558 = vector.extract_strided_slice %557 {offsets = [0, 0], sizes = [8, 128], strides = [1, 1]} : vector<8x512xf32> to vector<8x128xf32>
    %559 = arith.negf %558 : vector<8x128xf32>
    %560 = math.exp %559 : vector<8x128xf32>
    %cst_233 = arith.constant 1.000000e+00 : f32
    %561 = vector.broadcast %cst_233 : f32 to vector<8x128xf32>
    %562 = arith.addf %561, %560 : vector<8x128xf32>
    %563 = arith.divf %561, %562 : vector<8x128xf32>
    %564 = vector.extract_strided_slice %557 {offsets = [0, 128], sizes = [8, 128], strides = [1, 1]} : vector<8x512xf32> to vector<8x128xf32>
    %565 = arith.negf %564 : vector<8x128xf32>
    %566 = math.exp %565 : vector<8x128xf32>
    %cst_234 = arith.constant 1.000000e+00 : f32
    %567 = vector.broadcast %cst_234 : f32 to vector<8x128xf32>
    %568 = arith.addf %567, %566 : vector<8x128xf32>
    %569 = arith.divf %567, %568 : vector<8x128xf32>
    %570 = vector.extract_strided_slice %557 {offsets = [0, 256], sizes = [8, 128], strides = [1, 1]} : vector<8x512xf32> to vector<8x128xf32>
    %571 = math.tanh %570 : vector<8x128xf32>
    %572 = vector.extract_strided_slice %557 {offsets = [0, 384], sizes = [8, 128], strides = [1, 1]} : vector<8x512xf32> to vector<8x128xf32>
    %573 = arith.negf %572 : vector<8x128xf32>
    %574 = math.exp %573 : vector<8x128xf32>
    %cst_235 = arith.constant 1.000000e+00 : f32
    %575 = vector.broadcast %cst_235 : f32 to vector<8x128xf32>
    %576 = arith.addf %575, %574 : vector<8x128xf32>
    %577 = arith.divf %575, %576 : vector<8x128xf32>
    %578 = arith.mulf %569, %545 : vector<8x128xf32>
    %579 = arith.mulf %563, %571 : vector<8x128xf32>
    %580 = arith.addf %578, %579 : vector<8x128xf32>
    %581 = math.tanh %580 : vector<8x128xf32>
    %582 = arith.mulf %577, %581 : vector<8x128xf32>
    %583 = arith.truncf %582 : vector<8x128xf32> to vector<8x128xbf16>
    %c6_236 = arith.constant 6 : index
    %c0_237 = arith.constant 0 : index
    %c0_238 = arith.constant 0 : index
    %584 = vector.load %arg8[%c6_236, %c0_237, %c0_238] : memref<8x8x128xbf16, #tpu.memory_space<vmem>>, vector<1x8x128xbf16>
    %585 = vector.shape_cast %584 : vector<1x8x128xbf16> to vector<8x128xbf16>
    %586 = vector.shape_cast %583 : vector<8x128xbf16> to vector<1x8x128xbf16>
    tpu.vector_store %arg8[%c6_236, %c0_237, %c0_238], %586 {strides = array<i32>} : memref<8x8x128xbf16, #tpu.memory_space<vmem>>, vector<1x8x128xbf16>,
    %c0_239 = arith.constant 0 : index
    %c7_240 = arith.constant 7 : index
    %c0_241 = arith.constant 0 : index
    %c0_242 = arith.constant 0 : index
    %587 = vector.load %arg11[%c0_239, %c7_240, %c0_241, %c0_242] : memref<1x8x8x512xbf16, #tpu.memory_space<vmem>>, vector<1x1x8x512xbf16>
    %588 = vector.shape_cast %587 : vector<1x1x8x512xbf16> to vector<8x512xbf16>
    %589 = arith.extf %588 : vector<8x512xbf16> to vector<8x512xf32>
    %590 = arith.truncf %582 : vector<8x128xf32> to vector<8x128xbf16>
    %cst_243 = arith.constant dense<0.000000e+00> : vector<8x512xf32>
    %591 = tpu.matmul %590, %324, %cst_243 {dimension_numbers = #tpu.dot_dimension_numbers<[1], [0], [0], [1], [0, 0, 1, 1], [], []>} : vector<8x128xbf16>, vector<128x512xbf16>, vector<8x512xf32> -> vector<8x512xf32>
    %592 = arith.addf %589, %591 : vector<8x512xf32>
    %593 = vector.extract_strided_slice %592 {offsets = [0, 0], sizes = [8, 128], strides = [1, 1]} : vector<8x512xf32> to vector<8x128xf32>
    %594 = arith.negf %593 : vector<8x128xf32>
    %595 = math.exp %594 : vector<8x128xf32>
    %cst_244 = arith.constant 1.000000e+00 : f32
    %596 = vector.broadcast %cst_244 : f32 to vector<8x128xf32>
    %597 = arith.addf %596, %595 : vector<8x128xf32>
    %598 = arith.divf %596, %597 : vector<8x128xf32>
    %599 = vector.extract_strided_slice %592 {offsets = [0, 128], sizes = [8, 128], strides = [1, 1]} : vector<8x512xf32> to vector<8x128xf32>
    %600 = arith.negf %599 : vector<8x128xf32>
    %601 = math.exp %600 : vector<8x128xf32>
    %cst_245 = arith.constant 1.000000e+00 : f32
    %602 = vector.broadcast %cst_245 : f32 to vector<8x128xf32>
    %603 = arith.addf %602, %601 : vector<8x128xf32>
    %604 = arith.divf %602, %603 : vector<8x128xf32>
    %605 = vector.extract_strided_slice %592 {offsets = [0, 256], sizes = [8, 128], strides = [1, 1]} : vector<8x512xf32> to vector<8x128xf32>
    %606 = math.tanh %605 : vector<8x128xf32>
    %607 = vector.extract_strided_slice %592 {offsets = [0, 384], sizes = [8, 128], strides = [1, 1]} : vector<8x512xf32> to vector<8x128xf32>
    %608 = arith.negf %607 : vector<8x128xf32>
    %609 = math.exp %608 : vector<8x128xf32>
    %cst_246 = arith.constant 1.000000e+00 : f32
    %610 = vector.broadcast %cst_246 : f32 to vector<8x128xf32>
    %611 = arith.addf %610, %609 : vector<8x128xf32>
    %612 = arith.divf %610, %611 : vector<8x128xf32>
    %613 = arith.mulf %604, %580 : vector<8x128xf32>
    %614 = arith.mulf %598, %606 : vector<8x128xf32>
    %615 = arith.addf %613, %614 : vector<8x128xf32>
    %616 = math.tanh %615 : vector<8x128xf32>
    %617 = arith.mulf %612, %616 : vector<8x128xf32>
    %618 = arith.truncf %617 : vector<8x128xf32> to vector<8x128xbf16>
    %c7_247 = arith.constant 7 : index
    %c0_248 = arith.constant 0 : index
    %c0_249 = arith.constant 0 : index
    %619 = vector.load %arg8[%c7_247, %c0_248, %c0_249] : memref<8x8x128xbf16, #tpu.memory_space<vmem>>, vector<1x8x128xbf16>
    %620 = vector.shape_cast %619 : vector<1x8x128xbf16> to vector<8x128xbf16>
    %621 = vector.shape_cast %618 : vector<8x128xbf16> to vector<1x8x128xbf16>
    tpu.vector_store %arg8[%c7_247, %c0_248, %c0_249], %621 {strides = array<i32>} : memref<8x8x128xbf16, #tpu.memory_space<vmem>>, vector<1x8x128xbf16>,
    %c1_250 = arith.constant 1 : index
    %c0_251 = arith.constant 0 : index
    %c0_252 = arith.constant 0 : index
    %622 = vector.load %arg9[%c1_250, %c0_251, %c0_252] : memref<2x8x128xf32, #tpu.memory_space<vmem>>, vector<1x8x128xf32>
    %623 = vector.shape_cast %622 : vector<1x8x128xf32> to vector<8x128xf32>
    %624 = vector.shape_cast %617 : vector<8x128xf32> to vector<1x8x128xf32>
    tpu.vector_store %arg9[%c1_250, %c0_251, %c0_252], %624 {strides = array<i32>} : memref<2x8x128xf32, #tpu.memory_space<vmem>>, vector<1x8x128xf32>,
    %c1_253 = arith.constant 1 : index
    %c0_254 = arith.constant 0 : index
    %c0_255 = arith.constant 0 : index
    %625 = vector.load %arg10[%c1_253, %c0_254, %c0_255] : memref<2x8x128xf32, #tpu.memory_space<vmem>>, vector<1x8x128xf32>
    %626 = vector.shape_cast %625 : vector<1x8x128xf32> to vector<8x128xf32>
    %627 = vector.shape_cast %615 : vector<8x128xf32> to vector<1x8x128xf32>
    tpu.vector_store %arg10[%c1_253, %c0_254, %c0_255], %627 {strides = array<i32>} : memref<2x8x128xf32, #tpu.memory_space<vmem>>, vector<1x8x128xf32>,
    return
  }
  func.func @transform_0(%arg0: i32) -> (i32, i32, i32) {
    %c0_i32 = arith.constant 0 : i32
    %c0_i32_0 = arith.constant 0 : i32
    %c0_i32_1 = arith.constant 0 : i32
    return %c0_i32, %arg0, %c0_i32_0 : i32, i32, i32
  }
  func.func @transform_1(%arg0: i32) -> (i32, i32) {
    %c0_i32 = arith.constant 0 : i32
    %c0_i32_0 = arith.constant 0 : i32
    %c0_i32_1 = arith.constant 0 : i32
    return %c0_i32, %c0_i32_0 : i32, i32
  }
  func.func @transform_2(%arg0: i32) -> (i32, i32, i32) {
    %c0_i32 = arith.constant 0 : i32
    %c0_i32_0 = arith.constant 0 : i32
    %c0_i32_1 = arith.constant 0 : i32
    %c0_i32_2 = arith.constant 0 : i32
    return %c0_i32, %c0_i32_0, %c0_i32_1 : i32, i32, i32
  }
  func.func @transform_3(%arg0: i32) -> (i32, i32, i32) {
    %c0_i32 = arith.constant 0 : i32
    %c0_i32_0 = arith.constant 0 : i32
    %c0_i32_1 = arith.constant 0 : i32
    %c0_i32_2 = arith.constant 0 : i32
    return %c0_i32, %c0_i32_0, %c0_i32_1 : i32, i32, i32
  }
  func.func @transform_4(%arg0: i32) -> (i32, i32, i32) {
    %c0_i32 = arith.constant 0 : i32
    %c0_i32_0 = arith.constant 0 : i32
    %c0_i32_1 = arith.constant 0 : i32
    %c0_i32_2 = arith.constant 0 : i32
    return %c0_i32, %c0_i32_0, %c0_i32_1 : i32, i32, i32
  }
  func.func @transform_5(%arg0: i32) -> (i32, i32, i32) {
    %c0_i32 = arith.constant 0 : i32
    %c0_i32_0 = arith.constant 0 : i32
    %c0_i32_1 = arith.constant 0 : i32
    return %c0_i32, %arg0, %c0_i32_0 : i32, i32, i32
  }
  func.func @transform_6(%arg0: i32) -> (i32, i32, i32) {
    %c0_i32 = arith.constant 0 : i32
    %c0_i32_0 = arith.constant 0 : i32
    %c0_i32_1 = arith.constant 0 : i32
    return %c0_i32, %arg0, %c0_i32_0 : i32, i32, i32
  }
  func.func @transform_7(%arg0: i32) -> (i32, i32, i32) {
    %c0_i32 = arith.constant 0 : i32
    %c0_i32_0 = arith.constant 0 : i32
    %c0_i32_1 = arith.constant 0 : i32
    return %c0_i32, %arg0, %c0_i32_0 : i32, i32, i32
  }
  func.func @transform_8(%arg0: i32) -> (i32, i32, i32) {
    %c0_i32 = arith.constant 0 : i32
    %c0_i32_0 = arith.constant 0 : i32
    %c0_i32_1 = arith.constant 0 : i32
    return %c0_i32, %arg0, %c0_i32_0 : i32, i32, i32
  }
  func.func @transform_9(%arg0: i32) -> (i32, i32, i32) {
    %c0_i32 = arith.constant 0 : i32
    %c0_i32_0 = arith.constant 0 : i32
    %c0_i32_1 = arith.constant 0 : i32
    return %c0_i32, %arg0, %c0_i32_0 : i32, i32, i32
  }
}

</mosaic_0001>

<bundles_post_ra>
// kernel: lstm_text_model_forward.3
= control target key start
LH: loop header
LB: loop body
LE: loop exit
PB: predicated region body
PF: predicated region fallthrough
CT: control target
= control target key end

     0   :  { %v191_v0 = vmov 0.0   ;;  %vm192_vm0 = vmmov 0   ;;  %s249_s1 = inlined_call_operand.vmem [shape: bf16[128,128], index: 1, kind: input, shape index: {}]   ;;  %s250_s0 = inlined_call_operand.vmem [shape: bf16[16,128], index: 0, kind: input, shape index: {}]   ;;  %s251_s2 = inlined_call_operand.vmem [shape: f32[1,128], index: 2, kind: input, shape index: {}]   ;;  %s252_s3 = inlined_call_operand.vmem [shape: f32[16,128], index: 3, kind: output, shape index: {}]  }
   0x1   :  { %160 = vmatprep.subr.bf16.mxu0 %v191_v0  ;;  %v182_v1 = vld [vmem:[%s249_s1 + $0x38] sm:$0xff]   ;;  %176 = vmatprep.mubr.msk.bf16.mxu0 %vm192_vm0, %v191_v0  ;;  %v183_v2 = vld [vmem:[%s249_s1 + $0x30] sm:$0xff]   ;;  %v184_v3 = vld [vmem:[%s249_s1 + $0x28] sm:$0xff]  }
   0x2   :  { %161 = vmatpush3.bf16.msra.mxu0 %v182_v1  ;;  %v185_v4 = vld [vmem:[%s249_s1 + $0x20] sm:$0xff]   ;;  %v186_v5 = vld [vmem:[%s249_s1 + $0x18] sm:$0xff]   ;;  %v187_v6 = vld [vmem:[%s249_s1 + $0x10] sm:$0xff]  }
   0x3   :  { %162 = vmatprep.subr.bf16.mxu0 %v191_v0  ;;  %v188_v7 = vld [vmem:[%s249_s1 + $0x8] sm:$0xff]   ;;  %v189_v8 = vld [vmem:[%s249_s1] sm:$0xff]  }
   0x4   :  { %v190_v9 = vld [vmem:[%s250_s0] sm:$0xff]  }
   0x5   :  { %v141_v10 = vld [vmem:[%s251_s2] ss:$0 sm:$0xff] }
   0x6   :  { %163 = vmatpush3.bf16.msra.mxu0 %v183_v2 }
   0x7   :  { %164 = vmatprep.subr.bf16.mxu0 %v191_v0 }
   0xa   :  { %165 = vmatpush3.bf16.msra.mxu0 %v184_v3 }
   0xb   :  { %166 = vmatprep.subr.bf16.mxu0 %v191_v0 }
   0xe   :  { %167 = vmatpush3.bf16.msra.mxu0 %v185_v4 }
   0xf   :  { %168 = vmatprep.subr.bf16.mxu0 %v191_v0 }
  0x12   :  { %169 = vmatpush3.bf16.msra.mxu0 %v186_v5 }
  0x13   :  { %170 = vmatprep.subr.bf16.mxu0 %v191_v0 }
  0x16   :  { %171 = vmatpush3.bf16.msra.mxu0 %v187_v6 }
  0x17   :  { %172 = vmatprep.subr.bf16.mxu0 %v191_v0 }
  0x1a   :  { %173 = vmatpush3.bf16.msra.mxu0 %v188_v7 }
  0x1b   :  { %174 = vmatprep.subr.bf16.mxu0 %v191_v0 }
  0x1e   :  { %175 = vmatpush3.bf16.msra.mxu0 %v189_v8 }
  0x21   :  { %177 = vmatmul.mubr.bf16.vlgmr.msra.gmra.mxu0 %v190_v9 }
  0xe1   :  { %v128_v11 = vpop.f32.mrf.mxu0 }
  0xe2   :  { %v129_v12 = vadd.f32 %v141_v10, %v128_v11 }
  0xe3   :  { %v178_v13 = vpop.f32.mrf.mxu0 }
  0xe4   :  { %135 = vst [vmem:[%s252_s3] sm:$0xff] %v129_v12 }
  0xe5   :  { %v131_v14 = vpop.f32.mrf.mxu0 }
  0xe6   :  { %v132_v15 = vadd.f32 %v141_v10, %v131_v14 }
  0xe7   :  { %v179_v16 = vpop.f32.mrf.mxu0 }
  0xe8   :  { %136 = vst [vmem:[%s252_s3 + $0x8] sm:$0xff] %v132_v15 }

// kernel: lstm_text_model_forward.2
= control target key start
LH: loop header
LB: loop body
LE: loop exit
PB: predicated region body
PF: predicated region fallthrough
CT: control target
= control target key end

     0   :  { %15 = vsyncpa [#allocation5], 0  ;;  %s5551_s0 = inlined_call_operand.vmem [shape: bf16[8,8,128], index: 0, kind: input, shape index: {}]   ;;  %s5552_s1 = inlined_call_operand.hbm [shape: bf16[128,512], index: 1, kind: input, shape index: {}]   ;;  %s5553_s2 = inlined_call_operand.hbm [shape: bf16[1,128,512], index: 2, kind: input, shape index: {}]   ;;  %s5554_s3 = inlined_call_operand.hbm [shape: bf16[2,128,512], index: 3, kind: input, shape index: {}]   ;;  %s5555_s4 = inlined_call_operand.vmem [shape: f32[2,1,512], index: 4, kind: input, shape index: {}]   ;;  %s5556_s5 = inlined_call_operand.vmem [shape: f32[2,8,128], index: 5, kind: input, shape index: {}, may-alias: {5,6}]   ;;  %s5557_s6 = inlined_call_operand.vmem [shape: f32[2,8,128], index: 6, kind: input, shape index: {}, may-alias: {5,6}]   ;;  %s5558_s7 = inlined_call_operand.vmem [shape: bf16[8,8,128], index: 7, kind: output, shape index: {0}]   ;;  %s5559_s8 = inlined_call_operand.vmem [shape: f32[2,8,128], index: 8, kind: output, shape index: {1}]   ;;  %s5560_s9 = inlined_call_operand.vmem [shape: f32[2,8,128], index: 9, kind: output, shape index: {2}]  }
   0x1   :  { %16 = vsyncpa [#allocation7], 0  ;;  %s4316_s30 = smov [#allocation6]   ;;  %s4317_s11 = smov [#allocation4]  }
   0x2   :  { %s36_s10 = sshll.u32 %s4316_s30, 4  ;;  %s24_s12 = sshll.u32 %s4317_s11, 4  ;;  %s37_s10 = int_to_ptr.vmem [resolvable:$true] %s36_s10  ;;  %s25_s12 = int_to_ptr.vmem [resolvable:$true] %s24_s12 }
   0x3   :  { %s4260_s13 = scalar_lea.vmem %s37_s10, 4096  ;;  %p4265_p1 = scmp.lt.s32.totalorder %s37_s10, %s37_s10 }
   0x4   :  { %p4261_p0 = scmp.ne.s32.totalorder %s37_s10, %s4260_s13  ;;  %p4266_p2 = scmp.lt.s32.totalorder %s4260_s13, %s4260_s13 }
   0x6   :  { %p4267_p3 = por %p4266_p2, %p4265_p1 }
   0x8   :  { %p4268_p4 = pnand %p4267_p3, %p4261_p0 }
   0xa   :  { %4271 = shalt.err (!%p4268_p4)
}
   0xb   :  { %s4318_s14 = smov 256   ;;  %s4319_s15 = smov 16  }
   0xc   :  { %42 = dma.hbm_to_vmem [thread:$0]  %s5553_s2, 4096, %s37_s10, [#allocation7], %s4318_s14, %s4318_s14, %s4319_s15  }
   0xd   :  { %s4280_s18 = scalar_lea.vmem %s25_s12, 4096  ;;  %p4285_p6 = scmp.lt.s32.totalorder %s25_s12, %s25_s12 }
   0xe   :  { %p4281_p5 = scmp.ne.s32.totalorder %s25_s12, %s4280_s18  ;;  %p4286_p7 = scmp.lt.s32.totalorder %s4280_s18, %s4280_s18 }
  0x10   :  { %p4287_p8 = por %p4286_p7, %p4285_p6 }
  0x12   :  { %p4288_p9 = pnand %p4287_p8, %p4281_p5 }
  0x14   :  { %4291 = shalt.err (!%p4288_p9)
}
  0x15   :  { %30 = dma.hbm_to_vmem [thread:$0]  %s5552_s1, 4096, %s25_s12, [#allocation5], %s4318_s14, %s4318_s14, %s4319_s15  }
  0x16   :  { %s4320_s21 = smov [#allocation8]  }
  0x17   :  { %s48_s22 = sshll.u32 %s4320_s21, 4  ;;  %s49_s22 = int_to_ptr.vmem [resolvable:$true] %s48_s22 }
  0x18   :  { %s4300_s23 = scalar_lea.vmem %s49_s22, 8192  ;;  %p4305_p11 = scmp.lt.s32.totalorder %s49_s22, %s49_s22 }
  0x19   :  { %p4301_p10 = scmp.ne.s32.totalorder %s49_s22, %s4300_s23  ;;  %p4306_p12 = scmp.lt.s32.totalorder %s4300_s23, %s4300_s23 }
  0x1b   :  { %p4307_p13 = por %p4306_p12, %p4305_p11 }
  0x1d   :  { %p4308_p0 = pnand %p4307_p13, %p4301_p10 }
  0x1f   :  { %4311 = shalt.err (!%p4308_p0)
}
  0x20   :  { %54 = dma.hbm_to_vmem [thread:$0]  %s5554_s3, 8192, %s49_s22, [#allocation7], %s4318_s14, %s4318_s14, %s4319_s15  }
  0x21   :  { %4312 = dma.done.wait [#allocation5], 4096  }
  0x22   :  { %4313 = vsyncadd [#allocation5], 4294963200 }
  0x23   :  { %4314 = dma.done.wait [#allocation7], 12288  }
  0x24   :  { %4315 = vsyncadd [#allocation7], 4294955008  ;;  %v5565_v0 = vmov 0   ;;  %v3732_v1 = vld [vmem:[#allocation4 + $0xe4] ss:$16 sps:$4 sm:$0xff]   ;;  %v3793_v44 = vld [vmem:[%s5551_s0 + $0x8] sm:$0xff]  }
  0x25   :  { %383 = vmatprep.mubr.bf16.mxu0 %v5565_v0  ;;  %456 = vmatprep.mubr.bf16.mxu1 %v5565_v0  ;;  %v3734_v2 = vld [vmem:[#allocation4 + $0xec] ss:$16 sps:$4 sm:$0xff]   ;;  %v3736_v3 = vld [vmem:[#allocation4 + $0xe0] ss:$16 sps:$4 sm:$0xff]   ;;  %v3737_v4 = vld [vmem:[#allocation4 + $0xe8] ss:$16 sps:$4 sm:$0xff]  }
  0x26   :  { %351 = vmatprep.subr.bf16.mxu0 %v3732_v1  ;;  %424 = vmatprep.subr.bf16.mxu1 %v3734_v2  ;;  %v3738_v5 = vld [vmem:[#allocation4 + $0xc4] ss:$16 sps:$4 sm:$0xff]   ;;  %v3740_v6 = vld [vmem:[#allocation4 + $0xcc] ss:$16 sps:$4 sm:$0xff]   ;;  %v3742_v7 = vld [vmem:[#allocation4 + $0xc0] ss:$16 sps:$4 sm:$0xff]  }
  0x27   :  { %352 = vmatpush1.bf16.msra.mxu0 %v3736_v3  ;;  %425 = vmatpush1.bf16.msra.mxu1 %v3737_v4  ;;  %v3743_v8 = vld [vmem:[#allocation4 + $0xc8] ss:$16 sps:$4 sm:$0xff]   ;;  %v3744_v9 = vld [vmem:[#allocation4 + $0xa4] ss:$16 sps:$4 sm:$0xff]   ;;  %v3746_v10 = vld [vmem:[#allocation4 + $0xac] ss:$16 sps:$4 sm:$0xff]  }
  0x28   :  { %353 = vmatprep.subr.bf16.mxu0 %v3738_v5  ;;  %426 = vmatprep.subr.bf16.mxu1 %v3740_v6  ;;  %v3748_v11 = vld [vmem:[#allocation4 + $0xa0] ss:$16 sps:$4 sm:$0xff]   ;;  %v3749_v12 = vld [vmem:[#allocation4 + $0xa8] ss:$16 sps:$4 sm:$0xff]   ;;  %v3750_v13 = vld [vmem:[#allocation4 + $0x84] ss:$16 sps:$4 sm:$0xff]  }
  0x29   :  { %v3752_v14 = vld [vmem:[#allocation4 + $0x8c] ss:$16 sps:$4 sm:$0xff]   ;;  %v3754_v15 = vld [vmem:[#allocation4 + $0x80] ss:$16 sps:$4 sm:$0xff]   ;;  %v3755_v16 = vld [vmem:[#allocation4 + $0x88] ss:$16 sps:$4 sm:$0xff]  }
  0x2a   :  { %v3756_v17 = vld [vmem:[#allocation4 + $0x64] ss:$16 sps:$4 sm:$0xff]   ;;  %v3758_v18 = vld [vmem:[#allocation4 + $0x6c] ss:$16 sps:$4 sm:$0xff]   ;;  %v3760_v19 = vld [vmem:[#allocation4 + $0x60] ss:$16 sps:$4 sm:$0xff]  }
  0x2b   :  { %354 = vmatpush1.bf16.msra.mxu0 %v3742_v7  ;;  %427 = vmatpush1.bf16.msra.mxu1 %v3743_v8  ;;  %v3761_v20 = vld [vmem:[#allocation4 + $0x68] ss:$16 sps:$4 sm:$0xff]   ;;  %v3762_v21 = vld [vmem:[#allocation4 + $0x44] ss:$16 sps:$4 sm:$0xff]   ;;  %v3764_v22 = vld [vmem:[#allocation4 + $0x4c] ss:$16 sps:$4 sm:$0xff]   ;;  %v147_v8 = vlaneseq }
  0x2c   :  { %355 = vmatprep.subr.bf16.mxu0 %v3744_v9  ;;  %428 = vmatprep.subr.bf16.mxu1 %v3746_v10  ;;  %v3766_v23 = vld [vmem:[#allocation4 + $0x40] ss:$16 sps:$4 sm:$0xff]   ;;  %v3767_v24 = vld [vmem:[#allocation4 + $0x48] ss:$16 sps:$4 sm:$0xff]   ;;  %v3768_v25 = vld [vmem:[#allocation4 + $0x24] ss:$16 sps:$4 sm:$0xff]  }
  0x2d   :  { %v3770_v26 = vld [vmem:[#allocation4 + $0x2c] ss:$16 sps:$4 sm:$0xff]   ;;  %v3772_v27 = vld [vmem:[#allocation4 + $0x20] ss:$16 sps:$4 sm:$0xff]   ;;  %v3773_v28 = vld [vmem:[#allocation4 + $0x28] ss:$16 sps:$4 sm:$0xff]  }
  0x2e   :  { %v3774_v29 = vld [vmem:[#allocation4 + $0x4] ss:$16 sps:$4 sm:$0xff]   ;;  %v3776_v30 = vld [vmem:[#allocation4 + $0xc] ss:$16 sps:$4 sm:$0xff]   ;;  %v3778_v31 = vld [vmem:[#allocation4] ss:$16 sps:$4 sm:$0xff]  }
  0x2f   :  { %356 = vmatpush1.bf16.msra.mxu0 %v3748_v11  ;;  %429 = vmatpush1.bf16.msra.mxu1 %v3749_v12  ;;  %v3779_v32 = vld [vmem:[#allocation4 + $0x8] ss:$16 sps:$4 sm:$0xff]   ;;  %v4383_v33 = vld [vmem:[#allocation8 + $0xe4] ss:$16 sps:$4 sm:$0xff]   ;;  %v4385_v34 = vld [vmem:[#allocation8 + $0xec] ss:$16 sps:$4 sm:$0xff]  }
  0x30   :  { %357 = vmatprep.subr.bf16.mxu0 %v3750_v13  ;;  %430 = vmatprep.subr.bf16.mxu1 %v3752_v14  ;;  %v3780_v35 = vld [vmem:[%s5551_s0] sm:$0xff]   ;;  %v4392_v37 = vld [vmem:[#allocation8 + $0xe8] ss:$16 sps:$4 sm:$0xff]   ;;  %v4398_v39 = vld [vmem:[#allocation8 + $0xcc] ss:$16 sps:$4 sm:$0xff]   ;;  %v4538_v9 = vshrl.u32 %v147_v8, 7 }
  0x31   :  { %v4390_v36 = vld [vmem:[#allocation8 + $0xe0] ss:$16 sps:$4 sm:$0xff]   ;;  %v4396_v38 = vld [vmem:[#allocation8 + $0xc4] ss:$16 sps:$4 sm:$0xff]   ;;  %v4404_v41 = vld [vmem:[#allocation8 + $0xc8] ss:$16 sps:$4 sm:$0xff]  }
  0x32   :  { %v4400_v40 = vld [vmem:[#allocation8 + $0xc0] ss:$16 sps:$4 sm:$0xff]   ;;  %v4408_v42 = vld [vmem:[#allocation8 + $0xa4] ss:$16 sps:$4 sm:$0xff]   ;;  %v4410_v43 = vld [vmem:[#allocation8 + $0xac] ss:$16 sps:$4 sm:$0xff]  }
  0x33   :  { %358 = vmatpush1.bf16.msra.mxu0 %v3754_v15  ;;  %431 = vmatpush1.bf16.msra.mxu1 %v3755_v16  ;;  %v4417_v45 = vld [vmem:[#allocation8 + $0xa0] ss:$16 sps:$4 sm:$0xff]   ;;  %v4419_v46 = vld [vmem:[#allocation8 + $0xa8] ss:$16 sps:$4 sm:$0xff]   ;;  %v4423_v47 = vld [vmem:[#allocation8 + $0x84] ss:$16 sps:$4 sm:$0xff]  }
  0x34   :  { %359 = vmatprep.subr.bf16.mxu0 %v3756_v17  ;;  %432 = vmatprep.subr.bf16.mxu1 %v3758_v18  ;;  %v4427_v48 = vld [vmem:[#allocation8 + $0x8c] ss:$16 sps:$4 sm:$0xff]   ;;  %v4429_v49 = vld [vmem:[#allocation8 + $0x80] ss:$16 sps:$4 sm:$0xff]   ;;  %v4431_v50 = vld [vmem:[#allocation8 + $0x88] ss:$16 sps:$4 sm:$0xff]  }
  0x35   :  { %v4435_v51 = vld [vmem:[#allocation8 + $0x64] ss:$16 sps:$4 sm:$0xff]   ;;  %v4439_v52 = vld [vmem:[#allocation8 + $0x6c] ss:$16 sps:$4 sm:$0xff]   ;;  %v4446_v54 = vld [vmem:[#allocation8 + $0x60] ss:$16 sps:$4 sm:$0xff]  }
  0x36   :  { %v3806_v53 = vld [vmem:[%s5551_s0 + $0x10] sm:$0xff]   ;;  %v4448_v55 = vld [vmem:[#allocation8 + $0x68] ss:$16 sps:$4 sm:$0xff]   ;;  %v4452_v57 = vld [vmem:[#allocation8 + $0x4c] ss:$16 sps:$4 sm:$0xff]   ;;  %5583 = vst [vmem:[#allocation11_spill] sm:$0xff] %v4538_v9 }
  0x37   :  { %360 = vmatpush1.bf16.msra.mxu0 %v3760_v19  ;;  %433 = vmatpush1.bf16.msra.mxu1 %v3761_v20  ;;  %v4450_v56 = vld [vmem:[#allocation8 + $0x44] ss:$16 sps:$4 sm:$0xff]   ;;  %v4458_v58 = vld [vmem:[#allocation8 + $0x40] ss:$16 sps:$4 sm:$0xff]   ;;  %v4460_v59 = vld [vmem:[#allocation8 + $0x48] ss:$16 sps:$4 sm:$0xff]  }
  0x38   :  { %361 = vmatprep.subr.bf16.mxu0 %v3762_v21  ;;  %434 = vmatprep.subr.bf16.mxu1 %v3764_v22  ;;  %v4462_v60 = vld [vmem:[#allocation8 + $0x24] ss:$16 sps:$4 sm:$0xff]   ;;  %v4464_v61 = vld [vmem:[#allocation8 + $0x2c] ss:$16 sps:$4 sm:$0xff]   ;;  %v4475_v63 = vld [vmem:[#allocation8 + $0x20] ss:$16 sps:$4 sm:$0xff]  }
  0x39   :  { %v3819_v62 = vld [vmem:[%s5551_s0 + $0x18] sm:$0xff]   ;;  %v4479_v2 = vld [vmem:[#allocation8 + $0x4] ss:$16 sps:$4 sm:$0xff]   ;;  %v4487_v4 = vld [vmem:[#allocation8] ss:$16 sps:$4 sm:$0xff]   ;;  %v5563_v10 = vsub.s32 2, %v4538_v9 }
  0x3a   :  { %v4477_v1 = vld [vmem:[#allocation8 + $0x28] ss:$16 sps:$4 sm:$0xff]   ;;  %v4481_v3 = vld [vmem:[#allocation8 + $0xc] ss:$16 sps:$4 sm:$0xff]   ;;  %v104_v6 = vld [vmem:[%s5556_s5] sm:$0xff]  ;;  %v5564_v11 = vsub.s32 0, %v4538_v9 }
  0x3b   :  { %362 = vmatpush1.bf16.msra.mxu0 %v3766_v23  ;;  %435 = vmatpush1.bf16.msra.mxu1 %v3767_v24  ;;  %v4489_v5 = vld [vmem:[#allocation8 + $0x8] ss:$16 sps:$4 sm:$0xff]   ;;  %v647_v7 = vpack.c.bf16 %v104_v6, %v104_v6  ;;  %v5561_v12 = vsub.s32 3, %v4538_v9  ;;  %v71_v13 = vld [vmem:[%s5555_s4] sm:$0xf]  ;;  %v5562_v17 = vsub.s32 1, %v4538_v9 }
  0x3c   :  { %363 = vmatprep.subr.bf16.mxu0 %v3768_v25  ;;  %436 = vmatprep.subr.bf16.mxu1 %v3770_v26  ;;  %v4550_v16 = vrot.slane %v71_v13, %v5563_v10  ;;  %v4557_v20 = vrot.slane %v71_v13, %v5564_v11 }
  0x3d   :  { %v4561_v21 = vrot.slane %v71_v13, %v5561_v12  ;;  %v4565_v24 = vrot.slane %v71_v13, %v5562_v17 }
  0x3f   :  { %364 = vmatpush1.bf16.msra.mxu0 %v3772_v27  ;;  %437 = vmatpush1.bf16.msra.mxu1 %v3773_v28 }
  0x40   :  { %365 = vmatprep.subr.bf16.mxu0 %v3774_v29  ;;  %438 = vmatprep.subr.bf16.mxu1 %v3776_v30 }
  0x43   :  { %366 = vmatpush1.bf16.msra.mxu0 %v3778_v31  ;;  %439 = vmatpush1.bf16.msra.mxu1 %v3779_v32 }
  0x44   :  { %808 = vmatprep.subr.bf16.mxu0 %v4383_v33  ;;  %849 = vmatprep.subr.bf16.mxu1 %v4385_v34 }
  0x46   :  { %384 = vmatmul.mubr.bf16.vlgmr.msra.gmra.mxu0 %v3780_v35  ;;  %457 = vmatmul.mubr.bf16.vlgmr.msra.gmra.mxu1 %v3780_v35 }
  0x47   :  { %809 = vmatpush1.bf16.msra.mxu0 %v4390_v36  ;;  %850 = vmatpush1.bf16.msra.mxu1 %v4392_v37 }
  0x48   :  { %810 = vmatprep.subr.bf16.mxu0 %v4396_v38  ;;  %851 = vmatprep.subr.bf16.mxu1 %v4398_v39 }
  0x49   :  { %393 = vmatprep.mubr.bf16.mxu0 %v5565_v0  ;;  %466 = vmatprep.mubr.bf16.mxu1 %v5565_v0 }
  0x4b   :  { %811 = vmatpush1.bf16.msra.mxu0 %v4400_v40  ;;  %852 = vmatpush1.bf16.msra.mxu1 %v4404_v41 }
  0x4c   :  { %812 = vmatprep.subr.bf16.mxu0 %v4408_v42  ;;  %853 = vmatprep.subr.bf16.mxu1 %v4410_v43 }
  0x4e   :  { %394 = vmatmul.mubr.bf16.gmra.mxu0 %v3793_v44  ;;  %467 = vmatmul.mubr.bf16.gmra.mxu1 %v3793_v44 }
  0x4f   :  { %813 = vmatpush1.bf16.msra.mxu0 %v4417_v45  ;;  %854 = vmatpush1.bf16.msra.mxu1 %v4419_v46 }
  0x50   :  { %814 = vmatprep.subr.bf16.mxu0 %v4423_v47  ;;  %855 = vmatprep.subr.bf16.mxu1 %v4427_v48 }
  0x51   :  { %403 = vmatprep.mubr.bf16.mxu0 %v5565_v0  ;;  %476 = vmatprep.mubr.bf16.mxu1 %v5565_v0 }
  0x53   :  { %815 = vmatpush1.bf16.msra.mxu0 %v4429_v49  ;;  %856 = vmatpush1.bf16.msra.mxu1 %v4431_v50 }
  0x54   :  { %816 = vmatprep.subr.bf16.mxu0 %v4435_v51  ;;  %857 = vmatprep.subr.bf16.mxu1 %v4439_v52 }
  0x56   :  { %404 = vmatmul.mubr.bf16.gmra.mxu0 %v3806_v53  ;;  %477 = vmatmul.mubr.bf16.gmra.mxu1 %v3806_v53 }
  0x57   :  { %817 = vmatpush1.bf16.msra.mxu0 %v4446_v54  ;;  %858 = vmatpush1.bf16.msra.mxu1 %v4448_v55 }
  0x58   :  { %818 = vmatprep.subr.bf16.mxu0 %v4450_v56  ;;  %859 = vmatprep.subr.bf16.mxu1 %v4452_v57 }
  0x59   :  { %413 = vmatprep.mubr.bf16.mxu0 %v5565_v0  ;;  %486 = vmatprep.mubr.bf16.mxu1 %v5565_v0 }
  0x5b   :  { %819 = vmatpush1.bf16.msra.mxu0 %v4458_v58  ;;  %860 = vmatpush1.bf16.msra.mxu1 %v4460_v59 }
  0x5c   :  { %820 = vmatprep.subr.bf16.mxu0 %v4462_v60  ;;  %861 = vmatprep.subr.bf16.mxu1 %v4464_v61 }
  0x5e   :  { %414 = vmatmul.mubr.bf16.gmra.mxu0 %v3819_v62  ;;  %487 = vmatmul.mubr.bf16.gmra.mxu1 %v3819_v62 }
  0x5f   :  { %821 = vmatpush1.bf16.msra.mxu0 %v4475_v63  ;;  %862 = vmatpush1.bf16.msra.mxu1 %v4477_v1 }
  0x60   :  { %822 = vmatprep.subr.bf16.mxu0 %v4479_v2  ;;  %863 = vmatprep.subr.bf16.mxu1 %v4481_v3 }
  0x61   :  { %840 = vmatprep.mubr.bf16.mxu0 %v5565_v0  ;;  %881 = vmatprep.mubr.bf16.mxu1 %v5565_v0 }
  0x63   :  { %823 = vmatpush1.bf16.msra.mxu0 %v4487_v4  ;;  %864 = vmatpush1.bf16.msra.mxu1 %v4489_v5 }
  0x64   :  { %927 = vmatprep.subr.bf16.mxu0 %v4383_v33  ;;  %968 = vmatprep.subr.bf16.mxu1 %v4385_v34 }
  0x66   :  { %841 = vmatmul.mubr.bf16.vlgmr.msra.gmra.mxu0 %v647_v7  ;;  %882 = vmatmul.mubr.bf16.vlgmr.msra.gmra.mxu1 %v647_v7 }
  0x67   :  { %928 = vmatpush1.bf16.msra.mxu0 %v4390_v36  ;;  %969 = vmatpush1.bf16.msra.mxu1 %v4392_v37 }
  0x68   :  { %929 = vmatprep.subr.bf16.mxu0 %v4396_v38  ;;  %970 = vmatprep.subr.bf16.mxu1 %v4398_v39 }
  0x69   :  { %959 = vmatprep.mubr.bf16.mxu0 %v5565_v0  ;;  %1000 = vmatprep.mubr.bf16.mxu1 %v5565_v0 }
  0x6b   :  { %930 = vmatpush1.bf16.msra.mxu0 %v4400_v40  ;;  %971 = vmatpush1.bf16.msra.mxu1 %v4404_v41 }
  0x6c   :  { %931 = vmatprep.subr.bf16.mxu0 %v4408_v42  ;;  %972 = vmatprep.subr.bf16.mxu1 %v4410_v43 }
  0x6f   :  { %932 = vmatpush1.bf16.msra.mxu0 %v4417_v45  ;;  %973 = vmatpush1.bf16.msra.mxu1 %v4419_v46 }
  0x70   :  { %933 = vmatprep.subr.bf16.mxu0 %v4423_v47  ;;  %974 = vmatprep.subr.bf16.mxu1 %v4427_v48 }
  0x73   :  { %934 = vmatpush1.bf16.msra.mxu0 %v4429_v49  ;;  %975 = vmatpush1.bf16.msra.mxu1 %v4431_v50 }
  0x74   :  { %935 = vmatprep.subr.bf16.mxu0 %v4435_v51  ;;  %976 = vmatprep.subr.bf16.mxu1 %v4439_v52 }
  0x77   :  { %936 = vmatpush1.bf16.msra.mxu0 %v4446_v54  ;;  %977 = vmatpush1.bf16.msra.mxu1 %v4448_v55 }
  0x78   :  { %937 = vmatprep.subr.bf16.mxu0 %v4450_v56  ;;  %978 = vmatprep.subr.bf16.mxu1 %v4452_v57 }
  0x7b   :  { %938 = vmatpush1.bf16.msra.mxu0 %v4458_v58  ;;  %979 = vmatpush1.bf16.msra.mxu1 %v4460_v59 }
  0x7c   :  { %939 = vmatprep.subr.bf16.mxu0 %v4462_v60  ;;  %980 = vmatprep.subr.bf16.mxu1 %v4464_v61 }
  0x7f   :  { %940 = vmatpush1.bf16.msra.mxu0 %v4475_v63  ;;  %981 = vmatpush1.bf16.msra.mxu1 %v4477_v1 }
  0x80   :  { %941 = vmatprep.subr.bf16.mxu0 %v4479_v2  ;;  %982 = vmatprep.subr.bf16.mxu1 %v4481_v3 }
  0x83   :  { %942 = vmatpush1.bf16.msra.mxu0 %v4487_v4  ;;  %983 = vmatpush1.bf16.msra.mxu1 %v4489_v5 }
  0x84   :  { %1047 = vmatprep.subr.bf16.mxu0 %v4383_v33  ;;  %1088 = vmatprep.subr.bf16.mxu1 %v4385_v34 }
 0x106   :  { %v385_v14 = vpop.f32.mrf.mxu0  ;;  %v4546_v15 = vpop.f32.mrf.mxu1 }
 0x108   :  { %v387_v18 = vpop.f32.mrf.mxu0  ;;  %v4553_v19 = vpop.f32.mrf.mxu1 }
 0x10a   :  { %v389_v22 = vpop.f32.mrf.mxu0  ;;  %v462_v23 = vpop.f32.mrf.mxu1 }
 0x10b   :  { %v390_v25 = vadd.f32 %v389_v22, %v4557_v20  ;;  %v463_v26 = vadd.f32 %v462_v23, %v4550_v16 }
 0x10c   :  { %v391_v27 = vpop.f32.mrf.mxu0  ;;  %v464_v28 = vpop.f32.mrf.mxu1 }
 0x10d   :  { %v392_v29 = vadd.f32 %v391_v27, %v4565_v24  ;;  %v465_v30 = vadd.f32 %v464_v28, %v4561_v21 }
 0x10e   :  { %v395_v31 = vpop.f32.mrf.mxu0  ;;  %v468_v32 = vpop.f32.mrf.mxu1 }
 0x10f   :  { %v4571_v35 = vpack.c.bf16 %v392_v29, %v390_v25  ;;  %v4573_v44 = vpack.c.bf16 %v465_v30, %v463_v26  ;;  %v396_v53 = vadd.f32 %v395_v31, %v4557_v20  ;;  %v469_v62 = vadd.f32 %v468_v32, %v4550_v16 }
 0x110   :  { %v397_v6 = vpop.f32.mrf.mxu0  ;;  %v470_v7 = vpop.f32.mrf.mxu1 }
 0x111   :  { %v398_v8 = vadd.f32 %v397_v6, %v4565_v24  ;;  %v471_v13 = vadd.f32 %v470_v7, %v4561_v21 }
 0x112   :  { %v399_v22 = vpop.f32.mrf.mxu0  ;;  %v472_v23 = vpop.f32.mrf.mxu1 }
 0x113   :  { %v4579_v27 = vpack.c.bf16 %v398_v8, %v396_v53  ;;  %v4581_v28 = vpack.c.bf16 %v471_v13, %v469_v62  ;;  %v400_v25 = vadd.f32 %v399_v22, %v4557_v20  ;;  %v473_v26 = vadd.f32 %v472_v23, %v4550_v16 }
 0x114   :  { %v401_v29 = vpop.f32.mrf.mxu0  ;;  %v474_v30 = vpop.f32.mrf.mxu1 }
 0x115   :  { %v402_v31 = vadd.f32 %v401_v29, %v4565_v24  ;;  %v475_v32 = vadd.f32 %v474_v30, %v4561_v21 }
 0x116   :  { %v405_v12 = vpop.f32.mrf.mxu0  ;;  %v478_v6 = vpop.f32.mrf.mxu1 }
 0x117   :  { %v4587_v17 = vpack.c.bf16 %v402_v31, %v400_v25  ;;  %v4589_v7 = vpack.c.bf16 %v475_v32, %v473_v26  ;;  %v406_v53 = vadd.f32 %v405_v12, %v4557_v20  ;;  %v479_v62 = vadd.f32 %v478_v6, %v4550_v16 }
 0x118   :  { %v407_v8 = vpop.f32.mrf.mxu0  ;;  %v480_v13 = vpop.f32.mrf.mxu1  ;;  %v388_v32 = vadd.f32 %v387_v18, %v4565_v24 }
 0x119   :  { %5584 = vst [vmem:[#allocation12_spill] sm:$0xff] %v4589_v7  ;;  %v408_v22 = vadd.f32 %v407_v8, %v4565_v24  ;;  %v481_v23 = vadd.f32 %v480_v13, %v4561_v21  ;;  %v386_v13 = vadd.f32 %v385_v14, %v4557_v20 }
 0x11a   :  { %v409_v10 = vpop.f32.mrf.mxu0  ;;  %v482_v29 = vpop.f32.mrf.mxu1 }
 0x11b   :  { %v4595_v11 = vpack.c.bf16 %v408_v22, %v406_v53  ;;  %v4597_v30 = vpack.c.bf16 %v481_v23, %v479_v62  ;;  %v410_v25 = vadd.f32 %v409_v10, %v4557_v20  ;;  %v483_v26 = vadd.f32 %v482_v29, %v4550_v16 }
 0x11c   :  { %v411_v31 = vpop.f32.mrf.mxu0  ;;  %v484_v12 = vpop.f32.mrf.mxu1 }
 0x11d   :  { %5585 = vst [vmem:[#allocation13_spill] sm:$0xff] %v4595_v11  ;;  %5586 = vst [vmem:[#allocation14_spill] sm:$0xff] %v4597_v30  ;;  %v412_v6 = vadd.f32 %v411_v31, %v4565_v24  ;;  %v485_v8 = vadd.f32 %v484_v12, %v4561_v21  ;;  %v3694_v30 = vpack.c.bf16 %v388_v32, %v386_v13 }
 0x11e   :  { %v415_v0 = vpop.f32.mrf.mxu0  ;;  %v488_v9 = vpop.f32.mrf.mxu1 }
 0x11f   :  { %v4605_v53 = vpack.c.bf16 %v412_v6, %v410_v25  ;;  %v4607_v62 = vpack.c.bf16 %v485_v8, %v483_v26  ;;  %v416_v10 = vadd.f32 %v415_v0, %v4557_v20  ;;  %v489_v22 = vadd.f32 %v488_v9, %v4550_v16 }
 0x120   :  { %v417_v23 = vpop.f32.mrf.mxu0  ;;  %v490_v29 = vpop.f32.mrf.mxu1  ;;  %v643_v8 = vunpack.c.l.bf16 %v3694_v30 }
 0x121   :  { %5587 = vst [vmem:[#allocation15_spill] sm:$0xff] %v4607_v62  ;;  %v418_v18 = vadd.f32 %v417_v23, %v4565_v24  ;;  %v491_v31 = vadd.f32 %v490_v29, %v4561_v21 }
 0x122   :  { %v419_v12 = vpop.f32.mrf.mxu0  ;;  %v492_v11 = vpop.f32.mrf.mxu1 }
 0x123   :  { %v4613_v14 = vpack.c.bf16 %v418_v18, %v416_v10  ;;  %v4615_v7 = vpack.c.bf16 %v491_v31, %v489_v22  ;;  %v420_v25 = vadd.f32 %v419_v12, %v4557_v20  ;;  %v493_v26 = vadd.f32 %v492_v11, %v4550_v16 }
 0x124   :  { %v421_v0 = vpop.f32.mrf.mxu0  ;;  %v494_v6 = vpop.f32.mrf.mxu1  ;;  %v644_v22 = vunpack.c.h.bf16 %v3694_v30  ;;  %v459_v20 = vadd.f32 %v4546_v15, %v4550_v16  ;;  %v461_v11 = vadd.f32 %v4553_v19, %v4561_v21 }
 0x125   :  { %5588 = vst [vmem:[#allocation16_spill] sm:$0xff] %v4615_v7  ;;  %v422_v9 = vadd.f32 %v421_v0, %v4565_v24  ;;  %v495_v32 = vadd.f32 %v494_v6, %v4561_v21 }
 0x126   :  { %v842_v13 = vpop.f32.mrf.mxu0  ;;  %v883_v23 = vpop.f32.mrf.mxu1 }
 0x127   :  { %v4621_v29 = vpack.c.bf16 %v422_v9, %v420_v25  ;;  %v4623_v62 = vpack.c.bf16 %v495_v32, %v493_v26  ;;  %v890_v10 = vadd.f32 %v842_v13, %v643_v8  ;;  %v3695_v25 = vpack.c.bf16 %v461_v11, %v459_v20  ;;  %v105_v20 = vld [vmem:[%s5557_s6] sm:$0xff] }
 0x128   :  { %v844_v18 = vpop.f32.mrf.mxu0  ;;  %v885_v31 = vpop.f32.mrf.mxu1 }
 0x129   :  { %5589 = vst [vmem:[#allocation17_spill] sm:$0xff] %v4623_v62  ;;  %v3550_v24 = vmul.f32 -1.442695, %v890_v10  ;;  %v891_v12 = vadd.f32 %v844_v18, %v644_v22  ;;  %v646_v32 = vunpack.c.h.bf16 %v3695_v25  ;;  %v645_v8 = vunpack.c.l.bf16 %v3695_v25 }
 0x12a   :  { %v846_v0 = vpop.f32.mrf.mxu0  ;;  %v887_v6 = vpop.f32.mrf.mxu1  ;;  %v5590_v25 = vmov 0  }
 0x12b   :  { %3932 = vpow2.f32 %v3550_v24  ;;  %v3551_v7 = vmul.f32 -1.442695, %v891_v12  ;;  %v893_v30 = vadd.f32 %v885_v31, %v646_v32  ;;  %v892_v16 = vadd.f32 %v883_v23, %v645_v8 }
 0x12c   :  { %v847_v9 = vpop.f32.mrf.mxu0  ;;  %v888_v26 = vpop.f32.mrf.mxu1  ;;  %v924_v8 = vunpack.c.h.bf16 %v4571_v35 }
 0x12d   :  { %3934 = vpow2.f32 %v3551_v7  ;;  %v3552_v13 = vmul.f32 -1.442695, %v893_v30  ;;  %v923_v9 = vunpack.c.l.bf16 %v4571_v35 }
 0x12f   :  { %3936 = vpow2.f32 %v3552_v13 }
 0x138   :  { %v3933_v15 = vpop.eup %3932 }
 0x139   :  { %v897_v62 = vadd.f32 1.0, %v3933_v15 }
 0x13a   :  { %v3935_v19 = vpop.eup %3934 }
 0x13b   :  { %3938 = vrcp.f32 %v897_v62  ;;  %v903_v21 = vadd.f32 1.0, %v3935_v19 }
 0x13c   :  { %3940 = vtanh.f32 %v892_v16  ;;  %v3937_v10 = vpop.eup %3936 }
 0x13d   :  { %3942 = vrcp.f32 %v903_v21  ;;  %v910_v18 = vadd.f32 1.0, %v3937_v10 }
 0x13f   :  { %3944 = vrcp.f32 %v910_v18 }
 0x148   :  { %v3939_v22 = vpop.eup %3938 }
 0x149   :  { %v3941_v7 = vpop.eup %3940 }
 0x14a   :  { %v3943_v11 = vpop.eup %3942  ;;  %v914_v31 = vmul.f32 %v3941_v7, %v3939_v22 }
 0x14b   :  { %v913_v24 = vmul.f32 %v3943_v11, %v105_v20  ;;  %v926_v11 = vunpack.c.h.bf16 %v4573_v44 }
 0x14c   :  { %v3945_v62 = vpop.eup %3944 }
 0x14d   :  { %v4632_v12 = vadd.f32 %v914_v31, %v913_v24  ;;  %v925_v31 = vunpack.c.l.bf16 %v4573_v44 }
 0x14f   :  { %3946 = vtanh.f32 %v4632_v12 }
 0x15c   :  { %v3947_v23 = vpop.eup %3946 }
 0x15d   :  { %v917_v0 = vmul.f32 %v3947_v23, %v3945_v62 }
 0x15f   :  { %v918_v6 = vpack.c.bf16 %v917_v0, %v917_v0 }
 0x161   :  { %919 = vst [vmem:[#allocation3] sm:$0xf] %v918_v6  ;;  %960 = vmatmul.mubr.bf16.vlgmr.msra.gmra.mxu0 %v918_v6  ;;  %1001 = vmatmul.mubr.bf16.vlgmr.msra.gmra.mxu1 %v918_v6 }
 0x162   :  { %1048 = vmatpush1.bf16.msra.mxu0 %v4390_v36  ;;  %1089 = vmatpush1.bf16.msra.mxu1 %v4392_v37 }
 0x163   :  { %1049 = vmatprep.subr.bf16.mxu0 %v4396_v38  ;;  %1090 = vmatprep.subr.bf16.mxu1 %v4398_v39 }
 0x164   :  { %1079 = vmatprep.mubr.bf16.mxu0 %v5590_v25  ;;  %1120 = vmatprep.mubr.bf16.mxu1 %v5590_v25 }
 0x166   :  { %1050 = vmatpush1.bf16.msra.mxu0 %v4400_v40  ;;  %1091 = vmatpush1.bf16.msra.mxu1 %v4404_v41 }
 0x167   :  { %1051 = vmatprep.subr.bf16.mxu0 %v4408_v42  ;;  %1092 = vmatprep.subr.bf16.mxu1 %v4410_v43 }
 0x16a   :  { %1052 = vmatpush1.bf16.msra.mxu0 %v4417_v45  ;;  %1093 = vmatpush1.bf16.msra.mxu1 %v4419_v46 }
 0x16b   :  { %1053 = vmatprep.subr.bf16.mxu0 %v4423_v47  ;;  %1094 = vmatprep.subr.bf16.mxu1 %v4427_v48 }
 0x16e   :  { %1054 = vmatpush1.bf16.msra.mxu0 %v4429_v49  ;;  %1095 = vmatpush1.bf16.msra.mxu1 %v4431_v50 }
 0x16f   :  { %1055 = vmatprep.subr.bf16.mxu0 %v4435_v51  ;;  %1096 = vmatprep.subr.bf16.mxu1 %v4439_v52 }
 0x172   :  { %1056 = vmatpush1.bf16.msra.mxu0 %v4446_v54  ;;  %1097 = vmatpush1.bf16.msra.mxu1 %v4448_v55 }
 0x173   :  { %1057 = vmatprep.subr.bf16.mxu0 %v4450_v56  ;;  %1098 = vmatprep.subr.bf16.mxu1 %v4452_v57 }
 0x176   :  { %1058 = vmatpush1.bf16.msra.mxu0 %v4458_v58  ;;  %1099 = vmatpush1.bf16.msra.mxu1 %v4460_v59 }
 0x177   :  { %1059 = vmatprep.subr.bf16.mxu0 %v4462_v60  ;;  %1100 = vmatprep.subr.bf16.mxu1 %v4464_v61 }
 0x17a   :  { %1060 = vmatpush1.bf16.msra.mxu0 %v4475_v63  ;;  %1101 = vmatpush1.bf16.msra.mxu1 %v4477_v1 }
 0x17b   :  { %1061 = vmatprep.subr.bf16.mxu0 %v4479_v2  ;;  %1102 = vmatprep.subr.bf16.mxu1 %v4481_v3 }
 0x17e   :  { %1062 = vmatpush1.bf16.msra.mxu0 %v4487_v4  ;;  %1103 = vmatpush1.bf16.msra.mxu1 %v4489_v5 }
 0x17f   :  { %1167 = vmatprep.subr.bf16.mxu0 %v4383_v33  ;;  %1208 = vmatprep.subr.bf16.mxu1 %v4385_v34 }
 0x221   :  { %v961_v26 = vpop.f32.mrf.mxu0  ;;  %v1002_v32 = vpop.f32.mrf.mxu1 }
 0x222   :  { %v1009_v30 = vadd.f32 %v961_v26, %v923_v9  ;;  %v1011_v24 = vadd.f32 %v1002_v32, %v925_v31 }
 0x223   :  { %v963_v13 = vpop.f32.mrf.mxu0  ;;  %v1004_v15 = vpop.f32.mrf.mxu1 }
 0x224   :  { %v3553_v16 = vmul.f32 -1.442695, %v1009_v30  ;;  %v1010_v19 = vadd.f32 %v963_v13, %v924_v8  ;;  %v1012_v18 = vadd.f32 %v1004_v15, %v926_v11  ;;  %v1044_v11 = vunpack.c.h.bf16 %v4579_v27 }
 0x225   :  { %v965_v21 = vpop.f32.mrf.mxu0  ;;  %v1006_v10 = vpop.f32.mrf.mxu1 }
 0x226   :  { %3948 = vpow2.f32 %v3553_v16  ;;  %v3554_v22 = vmul.f32 -1.442695, %v1010_v19  ;;  %v3555_v62 = vmul.f32 -1.442695, %v1012_v18 }
 0x227   :  { %v966_v20 = vpop.f32.mrf.mxu0  ;;  %v1007_v7 = vpop.f32.mrf.mxu1 }
 0x228   :  { %3950 = vpow2.f32 %v3554_v22 }
 0x229   :  { %3952 = vtanh.f32 %v1011_v24 }
 0x22a   :  { %3954 = vpow2.f32 %v3555_v62 }
 0x233   :  { %v3949_v23 = vpop.eup %3948 }
 0x234   :  { %v1016_v35 = vadd.f32 1.0, %v3949_v23 }
 0x235   :  { %v3951_v0 = vpop.eup %3950 }
 0x236   :  { %3956 = vrcp.f32 %v1016_v35  ;;  %v1022_v6 = vadd.f32 1.0, %v3951_v0  ;;  %v3953_v9 = vpop.eup %3952 }
 0x237   :  { %v3955_v26 = vpop.eup %3954 }
 0x238   :  { %3958 = vrcp.f32 %v1022_v6  ;;  %v1029_v16 = vadd.f32 1.0, %v3955_v26  ;;  %v1045_v26 = vunpack.c.l.bf16 %v4581_v28 }
 0x23a   :  { %3960 = vrcp.f32 %v1029_v16 }
 0x243   :  { %v3957_v30 = vpop.eup %3956 }
 0x244   :  { %v1033_v8 = vmul.f32 %v3957_v30, %v3953_v9 }
 0x245   :  { %v3959_v13 = vpop.eup %3958 }
 0x246   :  { %v1032_v15 = vmul.f32 %v3959_v13, %v4632_v12  ;;  %v1043_v12 = vunpack.c.l.bf16 %v4579_v27 }
 0x247   :  { %v3961_v44 = vpop.eup %3960 }
 0x248   :  { %v4674_v19 = vadd.f32 %v1033_v8, %v1032_v15 }
 0x24a   :  { %3962 = vtanh.f32 %v4674_v19 }
 0x257   :  { %v3963_v32 = vpop.eup %3962 }
 0x258   :  { %v1036_v21 = vmul.f32 %v3963_v32, %v3961_v44 }
 0x25a   :  { %v1037_v10 = vpack.c.bf16 %v1036_v21, %v1036_v21 }
 0x25c   :  { %1039 = vst [vmem:[#allocation3 + $0x4] sm:$0xf] %v1037_v10  ;;  %1080 = vmatmul.mubr.bf16.vlgmr.msra.gmra.mxu0 %v1037_v10  ;;  %1121 = vmatmul.mubr.bf16.vlgmr.msra.gmra.mxu1 %v1037_v10 }
 0x25d   :  { %1168 = vmatpush1.bf16.msra.mxu0 %v4390_v36  ;;  %1209 = vmatpush1.bf16.msra.mxu1 %v4392_v37 }
 0x25e   :  { %1169 = vmatprep.subr.bf16.mxu0 %v4396_v38  ;;  %1210 = vmatprep.subr.bf16.mxu1 %v4398_v39 }
 0x25f   :  { %1199 = vmatprep.mubr.bf16.mxu0 %v5590_v25  ;;  %1240 = vmatprep.mubr.bf16.mxu1 %v5590_v25 }
 0x261   :  { %1170 = vmatpush1.bf16.msra.mxu0 %v4400_v40  ;;  %1211 = vmatpush1.bf16.msra.mxu1 %v4404_v41 }
 0x262   :  { %1171 = vmatprep.subr.bf16.mxu0 %v4408_v42  ;;  %1212 = vmatprep.subr.bf16.mxu1 %v4410_v43 }
 0x265   :  { %1172 = vmatpush1.bf16.msra.mxu0 %v4417_v45  ;;  %1213 = vmatpush1.bf16.msra.mxu1 %v4419_v46 }
 0x266   :  { %1173 = vmatprep.subr.bf16.mxu0 %v4423_v47  ;;  %1214 = vmatprep.subr.bf16.mxu1 %v4427_v48 }
 0x269   :  { %1174 = vmatpush1.bf16.msra.mxu0 %v4429_v49  ;;  %1215 = vmatpush1.bf16.msra.mxu1 %v4431_v50 }
 0x26a   :  { %1175 = vmatprep.subr.bf16.mxu0 %v4435_v51  ;;  %1216 = vmatprep.subr.bf16.mxu1 %v4439_v52 }
 0x26d   :  { %1176 = vmatpush1.bf16.msra.mxu0 %v4446_v54  ;;  %1217 = vmatpush1.bf16.msra.mxu1 %v4448_v55 }
 0x26e   :  { %1177 = vmatprep.subr.bf16.mxu0 %v4450_v56  ;;  %1218 = vmatprep.subr.bf16.mxu1 %v4452_v57 }
 0x271   :  { %1178 = vmatpush1.bf16.msra.mxu0 %v4458_v58  ;;  %1219 = vmatpush1.bf16.msra.mxu1 %v4460_v59 }
 0x272   :  { %1179 = vmatprep.subr.bf16.mxu0 %v4462_v60  ;;  %1220 = vmatprep.subr.bf16.mxu1 %v4464_v61 }
 0x275   :  { %1180 = vmatpush1.bf16.msra.mxu0 %v4475_v63  ;;  %1221 = vmatpush1.bf16.msra.mxu1 %v4477_v1 }
 0x276   :  { %1181 = vmatprep.subr.bf16.mxu0 %v4479_v2  ;;  %1222 = vmatprep.subr.bf16.mxu1 %v4481_v3 }
 0x279   :  { %1182 = vmatpush1.bf16.msra.mxu0 %v4487_v4  ;;  %1223 = vmatpush1.bf16.msra.mxu1 %v4489_v5 }
 0x27a   :  { %1287 = vmatprep.subr.bf16.mxu0 %v4383_v33  ;;  %1328 = vmatprep.subr.bf16.mxu1 %v4385_v34  ;;  %v1046_v33 = vunpack.c.h.bf16 %v4581_v28 }
 0x31c   :  { %v1081_v22 = vpop.f32.mrf.mxu0  ;;  %v1122_v20 = vpop.f32.mrf.mxu1 }
 0x31d   :  { %v1129_v7 = vadd.f32 %v1081_v22, %v1043_v12  ;;  %v1131_v30 = vadd.f32 %v1122_v20, %v1045_v26 }
 0x31e   :  { %v1083_v18 = vpop.f32.mrf.mxu0  ;;  %v1124_v31 = vpop.f32.mrf.mxu1 }
 0x31f   :  { %v3556_v24 = vmul.f32 -1.442695, %v1129_v7  ;;  %v1130_v62 = vadd.f32 %v1083_v18, %v1044_v11  ;;  %v1132_v34 = vadd.f32 %v1124_v31, %v1046_v33 }
 0x320   :  { %v1085_v23 = vpop.f32.mrf.mxu0  ;;  %v1126_v35 = vpop.f32.mrf.mxu1 }
 0x321   :  { %3964 = vpow2.f32 %v3556_v24  ;;  %v3557_v0 = vmul.f32 -1.442695, %v1130_v62  ;;  %v3558_v8 = vmul.f32 -1.442695, %v1132_v34 }
 0x322   :  { %v1086_v6 = vpop.f32.mrf.mxu0  ;;  %v1127_v9 = vpop.f32.mrf.mxu1 }
 0x323   :  { %3966 = vpow2.f32 %v3557_v0 }
 0x324   :  { %3968 = vtanh.f32 %v1131_v30  ;;  %v4765_v30 = vld [vmem:[#allocation8 + $0xe0] ss:$16 sps:$4 sm:$0xff]  }
 0x325   :  { %3970 = vpow2.f32 %v3558_v8  ;;  %v4768_v8 = vld [vmem:[#allocation8 + $0xe8] ss:$16 sps:$4 sm:$0xff]  }
 0x32e   :  { %v3965_v13 = vpop.eup %3964 }
 0x32f   :  { %v1136_v27 = vadd.f32 1.0, %v3965_v13  ;;  %v4771_v13 = vld [vmem:[#allocation8 + $0xc4] ss:$16 sps:$4 sm:$0xff]  }
 0x330   :  { %v3967_v16 = vpop.eup %3966 }
 0x331   :  { %3972 = vrcp.f32 %v1136_v27  ;;  %v1142_v15 = vadd.f32 1.0, %v3967_v16  ;;  %v3969_v44 = vpop.eup %3968  ;;  %v4774_v27 = vld [vmem:[#allocation8 + $0xcc] ss:$16 sps:$4 sm:$0xff]   ;;  %v4779_v16 = vld [vmem:[#allocation8 + $0xc0] ss:$16 sps:$4 sm:$0xff]  }
 0x332   :  { %v3971_v32 = vpop.eup %3970 }
 0x333   :  { %3974 = vrcp.f32 %v1142_v15  ;;  %v1149_v22 = vadd.f32 1.0, %v3971_v32  ;;  %v4782_v15 = vld [vmem:[#allocation8 + $0xc8] ss:$16 sps:$4 sm:$0xff]   ;;  %v4788_v32 = vld [vmem:[#allocation8 + $0xac] ss:$16 sps:$4 sm:$0xff]  }
 0x335   :  { %3976 = vrcp.f32 %v1149_v22  ;;  %v4800_v22 = vld [vmem:[#allocation8 + $0x8c] ss:$16 sps:$4 sm:$0xff]  }
 0x33e   :  { %v3973_v21 = vpop.eup %3972 }
 0x33f   :  { %v1153_v10 = vmul.f32 %v3973_v21, %v3969_v44  ;;  %v4785_v44 = vld [vmem:[#allocation8 + $0xa4] ss:$16 sps:$4 sm:$0xff]   ;;  %v4791_v21 = vld [vmem:[#allocation8 + $0xa0] ss:$16 sps:$4 sm:$0xff]  }
 0x340   :  { %v3975_v12 = vpop.eup %3974 }
 0x341   :  { %v1152_v7 = vmul.f32 %v3975_v12, %v4674_v19  ;;  %v4797_v12 = vld [vmem:[#allocation8 + $0x84] ss:$16 sps:$4 sm:$0xff]  }
 0x342   :  { %v3977_v28 = vpop.eup %3976 }
 0x343   :  { %v4716_v11 = vadd.f32 %v1153_v10, %v1152_v7  ;;  %v4794_v10 = vld [vmem:[#allocation8 + $0xa8] ss:$16 sps:$4 sm:$0xff]   ;;  %v4803_v7 = vld [vmem:[#allocation8 + $0x80] ss:$16 sps:$4 sm:$0xff]  }
 0x345   :  { %3978 = vtanh.f32 %v4716_v11 }
 0x352   :  { %v3979_v20 = vpop.eup %3978 }
 0x353   :  { %v1156_v18 = vmul.f32 %v3979_v20, %v3977_v28  ;;  %v4809_v28 = vld [vmem:[#allocation8 + $0x64] ss:$16 sps:$4 sm:$0xff]   ;;  %v4812_v20 = vld [vmem:[#allocation8 + $0x6c] ss:$16 sps:$4 sm:$0xff]  }
 0x355   :  { %v1157_v31 = vpack.c.bf16 %v1156_v18, %v1156_v18  ;;  %v4815_v18 = vld [vmem:[#allocation8 + $0x60] ss:$16 sps:$4 sm:$0xff]  }
 0x357   :  { %1159 = vst [vmem:[#allocation3 + $0x8] sm:$0xf] %v1157_v31  ;;  %1200 = vmatmul.mubr.bf16.vlgmr.msra.gmra.mxu0 %v1157_v31  ;;  %1241 = vmatmul.mubr.bf16.vlgmr.msra.gmra.mxu1 %v1157_v31  ;;  %v4818_v31 = vld [vmem:[#allocation8 + $0x68] ss:$16 sps:$4 sm:$0xff]  }
 0x358   :  { %1288 = vmatpush1.bf16.msra.mxu0 %v4390_v36  ;;  %1329 = vmatpush1.bf16.msra.mxu1 %v4392_v37  ;;  %v4751_v36 = vld [vmem:[#allocation8 + $0xe4] ss:$16 sps:$4 sm:$0xff]   ;;  %v4754_v37 = vld [vmem:[#allocation8 + $0xec] ss:$16 sps:$4 sm:$0xff]  }
 0x359   :  { %1289 = vmatprep.subr.bf16.mxu0 %v4396_v38  ;;  %1330 = vmatprep.subr.bf16.mxu1 %v4398_v39  ;;  %v1163_v38 = vunpack.c.l.bf16 %v4587_v17 }
 0x35a   :  { %1319 = vmatprep.mubr.bf16.mxu0 %v5590_v25  ;;  %1360 = vmatprep.mubr.bf16.mxu1 %v5590_v25 }
 0x35c   :  { %1290 = vmatpush1.bf16.msra.mxu0 %v4400_v40  ;;  %1331 = vmatpush1.bf16.msra.mxu1 %v4404_v41 }
 0x35d   :  { %1291 = vmatprep.subr.bf16.mxu0 %v4408_v42  ;;  %1332 = vmatprep.subr.bf16.mxu1 %v4410_v43  ;;  %v1164_v42 = vunpack.c.h.bf16 %v4587_v17 }
 0x360   :  { %1292 = vmatpush1.bf16.msra.mxu0 %v4417_v45  ;;  %1333 = vmatpush1.bf16.msra.mxu1 %v4419_v46 }
 0x361   :  { %1293 = vmatprep.subr.bf16.mxu0 %v4423_v47  ;;  %1334 = vmatprep.subr.bf16.mxu1 %v4427_v48 }
 0x364   :  { %1294 = vmatpush1.bf16.msra.mxu0 %v4429_v49  ;;  %1335 = vmatpush1.bf16.msra.mxu1 %v4431_v50 }
 0x365   :  { %1295 = vmatprep.subr.bf16.mxu0 %v4435_v51  ;;  %1336 = vmatprep.subr.bf16.mxu1 %v4439_v52 }
 0x368   :  { %1296 = vmatpush1.bf16.msra.mxu0 %v4446_v54  ;;  %1337 = vmatpush1.bf16.msra.mxu1 %v4448_v55  ;;  %v5591_v54 = vld [vmem:[#allocation12_spill] sm:$0xff] }
 0x369   :  { %1297 = vmatprep.subr.bf16.mxu0 %v4450_v56  ;;  %1338 = vmatprep.subr.bf16.mxu1 %v4452_v57  ;;  %v1166_v55 = vunpack.c.h.bf16 %v5591_v54  ;;  %v1165_v57 = vunpack.c.l.bf16 %v5591_v54 }
 0x36c   :  { %1298 = vmatpush1.bf16.msra.mxu0 %v4458_v58  ;;  %1339 = vmatpush1.bf16.msra.mxu1 %v4460_v59 }
 0x36d   :  { %1299 = vmatprep.subr.bf16.mxu0 %v4462_v60  ;;  %1340 = vmatprep.subr.bf16.mxu1 %v4464_v61 }
 0x370   :  { %1300 = vmatpush1.bf16.msra.mxu0 %v4475_v63  ;;  %1341 = vmatpush1.bf16.msra.mxu1 %v4477_v1 }
 0x371   :  { %1301 = vmatprep.subr.bf16.mxu0 %v4479_v2  ;;  %1342 = vmatprep.subr.bf16.mxu1 %v4481_v3 }
 0x374   :  { %1302 = vmatpush1.bf16.msra.mxu0 %v4487_v4  ;;  %1343 = vmatpush1.bf16.msra.mxu1 %v4489_v5 }
 0x375   :  { %1407 = vmatprep.subr.bf16.mxu0 %v4751_v36  ;;  %1448 = vmatprep.subr.bf16.mxu1 %v4754_v37 }
 0x417   :  { %v1201_v39 = vpop.f32.mrf.mxu0  ;;  %v1242_v40 = vpop.f32.mrf.mxu1 }
 0x418   :  { %v1249_v41 = vadd.f32 %v1201_v39, %v1163_v38  ;;  %v1251_v58 = vadd.f32 %v1242_v40, %v1165_v57  ;;  %v4821_v38 = vld [vmem:[#allocation8 + $0x44] ss:$16 sps:$4 sm:$0xff]   ;;  %v4824_v39 = vld [vmem:[#allocation8 + $0x4c] ss:$16 sps:$4 sm:$0xff]   ;;  %v4827_v40 = vld [vmem:[#allocation8 + $0x40] ss:$16 sps:$4 sm:$0xff]  }
 0x419   :  { %v1203_v43 = vpop.f32.mrf.mxu0  ;;  %v1244_v45 = vpop.f32.mrf.mxu1 }
 0x41a   :  { %v3559_v46 = vmul.f32 -1.442695, %v1249_v41  ;;  %v1250_v47 = vadd.f32 %v1203_v43, %v1164_v42  ;;  %v1252_v56 = vadd.f32 %v1244_v45, %v1166_v55  ;;  %v4830_v41 = vld [vmem:[#allocation8 + $0x48] ss:$16 sps:$4 sm:$0xff]   ;;  %v4833_v42 = vld [vmem:[#allocation8 + $0x24] ss:$16 sps:$4 sm:$0xff]  }
 0x41b   :  { %v1205_v48 = vpop.f32.mrf.mxu0  ;;  %v1246_v49 = vpop.f32.mrf.mxu1  ;;  %v4836_v43 = vld [vmem:[#allocation8 + $0x2c] ss:$16 sps:$4 sm:$0xff]   ;;  %v4839_v45 = vld [vmem:[#allocation8 + $0x20] ss:$16 sps:$4 sm:$0xff]  }
 0x41c   :  { %3980 = vpow2.f32 %v3559_v46  ;;  %v3560_v50 = vmul.f32 -1.442695, %v1250_v47  ;;  %v3561_v59 = vmul.f32 -1.442695, %v1252_v56  ;;  %v4842_v46 = vld [vmem:[#allocation8 + $0x28] ss:$16 sps:$4 sm:$0xff]  }
 0x41d   :  { %v1206_v51 = vpop.f32.mrf.mxu0  ;;  %v1247_v52 = vpop.f32.mrf.mxu1  ;;  %v5592_v47 = vld [vmem:[#allocation13_spill] sm:$0xff] }
 0x41e   :  { %3982 = vpow2.f32 %v3560_v50  ;;  %v1283_v48 = vunpack.c.l.bf16 %v5592_v47  ;;  %v1284_v52 = vunpack.c.h.bf16 %v5592_v47 }
 0x41f   :  { %3984 = vtanh.f32 %v1251_v58 }
 0x420   :  { %3986 = vpow2.f32 %v3561_v59  ;;  %v5593_v59 = vld [vmem:[#allocation14_spill] sm:$0xff] }
 0x429   :  { %v3981_v60 = vpop.eup %3980 }
 0x42a   :  { %v1256_v61 = vadd.f32 1.0, %v3981_v60  ;;  %v1286_v60 = vunpack.c.h.bf16 %v5593_v59 }
 0x42b   :  { %v3983_v63 = vpop.eup %3982 }
 0x42c   :  { %3988 = vrcp.f32 %v1256_v61  ;;  %v1262_v1 = vadd.f32 1.0, %v3983_v63  ;;  %v3985_v17 = vpop.eup %3984  ;;  %v1285_v63 = vunpack.c.l.bf16 %v5593_v59 }
 0x42d   :  { %v3987_v19 = vpop.eup %3986 }
 0x42e   :  { %3990 = vrcp.f32 %v1262_v1  ;;  %v1269_v35 = vadd.f32 1.0, %v3987_v19 }
 0x430   :  { %3992 = vrcp.f32 %v1269_v35 }
 0x439   :  { %v3989_v24 = vpop.eup %3988 }
 0x43a   :  { %v1273_v62 = vmul.f32 %v3989_v24, %v3985_v17 }
 0x43b   :  { %v3991_v23 = vpop.eup %3990 }
 0x43c   :  { %v1272_v0 = vmul.f32 %v3991_v23, %v4716_v11  ;;  %v4806_v11 = vld [vmem:[#allocation8 + $0x88] ss:$16 sps:$4 sm:$0xff]  }
 0x43d   :  { %v3993_v9 = vpop.eup %3992 }
 0x43e   :  { %v4762_v6 = vadd.f32 %v1273_v62, %v1272_v0 }
 0x440   :  { %3994 = vtanh.f32 %v4762_v6 }
 0x44d   :  { %v3995_v33 = vpop.eup %3994 }
 0x44e   :  { %v1276_v34 = vmul.f32 %v3995_v33, %v3993_v9 }
 0x450   :  { %v1277_v26 = vpack.c.bf16 %v1276_v34, %v1276_v34 }
 0x452   :  { %1279 = vst [vmem:[#allocation3 + $0xc] sm:$0xf] %v1277_v26  ;;  %1320 = vmatmul.mubr.bf16.vlgmr.msra.gmra.mxu0 %v1277_v26  ;;  %1361 = vmatmul.mubr.bf16.vlgmr.msra.gmra.mxu1 %v1277_v26 }
 0x453   :  { %1408 = vmatpush1.bf16.msra.mxu0 %v4765_v30  ;;  %1449 = vmatpush1.bf16.msra.mxu1 %v4768_v8 }
 0x454   :  { %1409 = vmatprep.subr.bf16.mxu0 %v4771_v13  ;;  %1450 = vmatprep.subr.bf16.mxu1 %v4774_v27 }
 0x455   :  { %1439 = vmatprep.mubr.bf16.mxu0 %v5590_v25  ;;  %1480 = vmatprep.mubr.bf16.mxu1 %v5590_v25 }
 0x457   :  { %1410 = vmatpush1.bf16.msra.mxu0 %v4779_v16  ;;  %1451 = vmatpush1.bf16.msra.mxu1 %v4782_v15 }
 0x458   :  { %1411 = vmatprep.subr.bf16.mxu0 %v4785_v44  ;;  %1452 = vmatprep.subr.bf16.mxu1 %v4788_v32 }
 0x45b   :  { %1412 = vmatpush1.bf16.msra.mxu0 %v4791_v21  ;;  %1453 = vmatpush1.bf16.msra.mxu1 %v4794_v10 }
 0x45c   :  { %1413 = vmatprep.subr.bf16.mxu0 %v4797_v12  ;;  %1454 = vmatprep.subr.bf16.mxu1 %v4800_v22 }
 0x45f   :  { %1414 = vmatpush1.bf16.msra.mxu0 %v4803_v7  ;;  %1455 = vmatpush1.bf16.msra.mxu1 %v4806_v11 }
 0x460   :  { %1415 = vmatprep.subr.bf16.mxu0 %v4809_v28  ;;  %1456 = vmatprep.subr.bf16.mxu1 %v4812_v20 }
 0x463   :  { %1416 = vmatpush1.bf16.msra.mxu0 %v4815_v18  ;;  %1457 = vmatpush1.bf16.msra.mxu1 %v4818_v31 }
 0x464   :  { %1417 = vmatprep.subr.bf16.mxu0 %v4821_v38  ;;  %1458 = vmatprep.subr.bf16.mxu1 %v4824_v39 }
 0x467   :  { %1418 = vmatpush1.bf16.msra.mxu0 %v4827_v40  ;;  %1459 = vmatpush1.bf16.msra.mxu1 %v4830_v41 }
 0x468   :  { %1419 = vmatprep.subr.bf16.mxu0 %v4833_v42  ;;  %1460 = vmatprep.subr.bf16.mxu1 %v4836_v43 }
 0x46b   :  { %1420 = vmatpush1.bf16.msra.mxu0 %v4839_v45  ;;  %1461 = vmatpush1.bf16.msra.mxu1 %v4842_v46 }
 0x46c   :  { %1421 = vmatprep.subr.bf16.mxu0 %v4479_v2  ;;  %1462 = vmatprep.subr.bf16.mxu1 %v4481_v3 }
 0x46f   :  { %1422 = vmatpush1.bf16.msra.mxu0 %v4487_v4  ;;  %1463 = vmatpush1.bf16.msra.mxu1 %v4489_v5 }
 0x470   :  { %1527 = vmatprep.subr.bf16.mxu0 %v4751_v36  ;;  %1568 = vmatprep.subr.bf16.mxu1 %v4754_v37 }
 0x512   :  { %v1321_v49 = vpop.f32.mrf.mxu0  ;;  %v1362_v50 = vpop.f32.mrf.mxu1 }
 0x513   :  { %v1369_v51 = vadd.f32 %v1321_v49, %v1283_v48  ;;  %v1371_v1 = vadd.f32 %v1362_v50, %v1285_v63 }
 0x514   :  { %v1323_v54 = vpop.f32.mrf.mxu0  ;;  %v1364_v55 = vpop.f32.mrf.mxu1 }
 0x515   :  { %v3562_v2 = vmul.f32 -1.442695, %v1369_v51  ;;  %v1370_v56 = vadd.f32 %v1323_v54, %v1284_v52  ;;  %v1372_v61 = vadd.f32 %v1364_v55, %v1286_v60  ;;  %v4890_v54 = vld [vmem:[#allocation8 + $0xc] ss:$16 sps:$4 sm:$0xff]   ;;  %v4893_v55 = vld [vmem:[#allocation8] ss:$16 sps:$4 sm:$0xff]  }
 0x516   :  { %v1325_v3 = vpop.f32.mrf.mxu0  ;;  %v1366_v57 = vpop.f32.mrf.mxu1 }
 0x517   :  { %3996 = vpow2.f32 %v3562_v2  ;;  %v3563_v4 = vmul.f32 -1.442695, %v1370_v56  ;;  %v3564_v17 = vmul.f32 -1.442695, %v1372_v61  ;;  %v4896_v2 = vld [vmem:[#allocation8 + $0x8] ss:$16 sps:$4 sm:$0xff]   ;;  %v1403_v56 = vunpack.c.l.bf16 %v4605_v53 }
 0x518   :  { %v1326_v5 = vpop.f32.mrf.mxu0  ;;  %v1367_v58 = vpop.f32.mrf.mxu1 }
 0x519   :  { %3998 = vpow2.f32 %v3563_v4  ;;  %v1404_v5 = vunpack.c.h.bf16 %v4605_v53 }
 0x51a   :  { %4000 = vtanh.f32 %v1371_v1 }
 0x51b   :  { %4002 = vpow2.f32 %v3564_v17 }
 0x524   :  { %v3997_v19 = vpop.eup %3996 }
 0x525   :  { %v1376_v24 = vadd.f32 1.0, %v3997_v19 }
 0x526   :  { %v3999_v62 = vpop.eup %3998 }
 0x527   :  { %4004 = vrcp.f32 %v1376_v24  ;;  %v1382_v23 = vadd.f32 1.0, %v3999_v62  ;;  %v4001_v35 = vpop.eup %4000 }
 0x528   :  { %v4003_v0 = vpop.eup %4002 }
 0x529   :  { %4006 = vrcp.f32 %v1382_v23  ;;  %v1389_v26 = vadd.f32 1.0, %v4003_v0 }
 0x52b   :  { %4008 = vrcp.f32 %v1389_v26 }
 0x534   :  { %v4005_v9 = vpop.eup %4004 }
 0x535   :  { %v1393_v33 = vmul.f32 %v4005_v9, %v4001_v35 }
 0x536   :  { %v4007_v34 = vpop.eup %4006 }
 0x537   :  { %v1392_v47 = vmul.f32 %v4007_v34, %v4762_v6  ;;  %v4887_v6 = vld [vmem:[#allocation8 + $0x4] ss:$16 sps:$4 sm:$0xff]  }
 0x538   :  { %v4009_v49 = vpop.eup %4008 }
 0x539   :  { %v4856_v48 = vadd.f32 %v1393_v33, %v1392_v47 }
 0x53b   :  { %4010 = vtanh.f32 %v4856_v48 }
 0x548   :  { %v4011_v50 = vpop.eup %4010 }
 0x549   :  { %v1396_v51 = vmul.f32 %v4011_v50, %v4009_v49 }
 0x54b   :  { %v1397_v52 = vpack.c.bf16 %v1396_v51, %v1396_v51 }
 0x54d   :  { %1399 = vst [vmem:[#allocation3 + $0x10] sm:$0xf] %v1397_v52  ;;  %1440 = vmatmul.mubr.bf16.vlgmr.msra.gmra.mxu0 %v1397_v52  ;;  %1481 = vmatmul.mubr.bf16.vlgmr.msra.gmra.mxu1 %v1397_v52 }
 0x54e   :  { %1528 = vmatpush1.bf16.msra.mxu0 %v4765_v30  ;;  %1569 = vmatpush1.bf16.msra.mxu1 %v4768_v8 }
 0x54f   :  { %1529 = vmatprep.subr.bf16.mxu0 %v4771_v13  ;;  %1570 = vmatprep.subr.bf16.mxu1 %v4774_v27 }
 0x550   :  { %1559 = vmatprep.mubr.bf16.mxu0 %v5590_v25  ;;  %1600 = vmatprep.mubr.bf16.mxu1 %v5590_v25 }
 0x552   :  { %1530 = vmatpush1.bf16.msra.mxu0 %v4779_v16  ;;  %1571 = vmatpush1.bf16.msra.mxu1 %v4782_v15 }
 0x553   :  { %1531 = vmatprep.subr.bf16.mxu0 %v4785_v44  ;;  %1572 = vmatprep.subr.bf16.mxu1 %v4788_v32 }
 0x556   :  { %1532 = vmatpush1.bf16.msra.mxu0 %v4791_v21  ;;  %1573 = vmatpush1.bf16.msra.mxu1 %v4794_v10 }
 0x557   :  { %1533 = vmatprep.subr.bf16.mxu0 %v4797_v12  ;;  %1574 = vmatprep.subr.bf16.mxu1 %v4800_v22 }
 0x55a   :  { %1534 = vmatpush1.bf16.msra.mxu0 %v4803_v7  ;;  %1575 = vmatpush1.bf16.msra.mxu1 %v4806_v11 }
 0x55b   :  { %1535 = vmatprep.subr.bf16.mxu0 %v4809_v28  ;;  %1576 = vmatprep.subr.bf16.mxu1 %v4812_v20 }
 0x55e   :  { %1536 = vmatpush1.bf16.msra.mxu0 %v4815_v18  ;;  %1577 = vmatpush1.bf16.msra.mxu1 %v4818_v31 }
 0x55f   :  { %1537 = vmatprep.subr.bf16.mxu0 %v4821_v38  ;;  %1578 = vmatprep.subr.bf16.mxu1 %v4824_v39 }
 0x562   :  { %1538 = vmatpush1.bf16.msra.mxu0 %v4827_v40  ;;  %1579 = vmatpush1.bf16.msra.mxu1 %v4830_v41 }
 0x563   :  { %1539 = vmatprep.subr.bf16.mxu0 %v4833_v42  ;;  %1580 = vmatprep.subr.bf16.mxu1 %v4836_v43 }
 0x566   :  { %1540 = vmatpush1.bf16.msra.mxu0 %v4839_v45  ;;  %1581 = vmatpush1.bf16.msra.mxu1 %v4842_v46 }
 0x567   :  { %1541 = vmatprep.subr.bf16.mxu0 %v4887_v6  ;;  %1582 = vmatprep.subr.bf16.mxu1 %v4890_v54 }
 0x56a   :  { %1542 = vmatpush1.bf16.msra.mxu0 %v4893_v55  ;;  %1583 = vmatpush1.bf16.msra.mxu1 %v4896_v2 }
 0x56b   :  { %1647 = vmatprep.subr.bf16.mxu0 %v4751_v36  ;;  %1688 = vmatprep.subr.bf16.mxu1 %v4754_v37  ;;  %v5594_v36 = vld [vmem:[#allocation15_spill] sm:$0xff] }
 0x56c   :  { %v1406_v37 = vunpack.c.h.bf16 %v5594_v36  ;;  %v1405_v23 = vunpack.c.l.bf16 %v5594_v36  ;;  %v3840_v36 = vld [vmem:[#allocation6 + $0xc4] ss:$16 sps:$4 sm:$0xff]  }
 0x60d   :  { %v1441_v3 = vpop.f32.mrf.mxu0  ;;  %v1482_v57 = vpop.f32.mrf.mxu1 }
 0x60e   :  { %v1489_v4 = vadd.f32 %v1441_v3, %v1403_v56  ;;  %v1491_v35 = vadd.f32 %v1482_v57, %v1405_v23  ;;  %v3841_v23 = vld [vmem:[#allocation6 + $0xc8] ss:$16 sps:$4 sm:$0xff]  }
 0x60f   :  { %v1443_v58 = vpop.f32.mrf.mxu0  ;;  %v1484_v59 = vpop.f32.mrf.mxu1 }
 0x610   :  { %v3565_v60 = vmul.f32 -1.442695, %v1489_v4  ;;  %v1490_v61 = vadd.f32 %v1443_v58, %v1404_v5  ;;  %v1492_v62 = vadd.f32 %v1484_v59, %v1406_v37  ;;  %v3843_v37 = vld [vmem:[#allocation6 + $0xcc] ss:$16 sps:$4 sm:$0xff]  }
 0x611   :  { %v1445_v63 = vpop.f32.mrf.mxu0  ;;  %v1486_v1 = vpop.f32.mrf.mxu1 }
 0x612   :  { %4012 = vpow2.f32 %v3565_v60  ;;  %v3566_v17 = vmul.f32 -1.442695, %v1490_v61  ;;  %v3567_v0 = vmul.f32 -1.442695, %v1492_v62  ;;  %v3838_v62 = vld [vmem:[#allocation6 + $0xc0] ss:$16 sps:$4 sm:$0xff]  }
 0x613   :  { %v1446_v19 = vpop.f32.mrf.mxu0  ;;  %v1487_v24 = vpop.f32.mrf.mxu1 }
 0x614   :  { %4014 = vpow2.f32 %v3566_v17  ;;  %v3832_v17 = vld [vmem:[#allocation6 + $0xe0] ss:$16 sps:$4 sm:$0xff]   ;;  %v3835_v19 = vld [vmem:[#allocation6 + $0xe8] ss:$16 sps:$4 sm:$0xff]  }
 0x615   :  { %4016 = vtanh.f32 %v1491_v35  ;;  %v3846_v35 = vld [vmem:[#allocation6 + $0xa4] ss:$16 sps:$4 sm:$0xff]  }
 0x616   :  { %4018 = vpow2.f32 %v3567_v0  ;;  %v3849_v0 = vld [vmem:[#allocation6 + $0xac] ss:$16 sps:$4 sm:$0xff]  }
 0x61f   :  { %v4013_v9 = vpop.eup %4012 }
 0x620   :  { %v1496_v53 = vadd.f32 1.0, %v4013_v9  ;;  %v3844_v9 = vld [vmem:[#allocation6 + $0xa0] ss:$16 sps:$4 sm:$0xff]  }
 0x621   :  { %v4015_v33 = vpop.eup %4014 }
 0x622   :  { %4020 = vrcp.f32 %v1496_v53  ;;  %v1502_v34 = vadd.f32 1.0, %v4015_v33  ;;  %v4017_v26 = vpop.eup %4016  ;;  %v3847_v53 = vld [vmem:[#allocation6 + $0xa8] ss:$16 sps:$4 sm:$0xff]   ;;  %v3852_v33 = vld [vmem:[#allocation6 + $0x84] ss:$16 sps:$4 sm:$0xff]  }
 0x623   :  { %v4019_v47 = vpop.eup %4018 }
 0x624   :  { %4022 = vrcp.f32 %v1502_v34  ;;  %v1509_v52 = vadd.f32 1.0, %v4019_v47  ;;  %v3855_v34 = vld [vmem:[#allocation6 + $0x8c] ss:$16 sps:$4 sm:$0xff]   ;;  %v3853_v47 = vld [vmem:[#allocation6 + $0x88] ss:$16 sps:$4 sm:$0xff]  }
 0x626   :  { %4024 = vrcp.f32 %v1509_v52  ;;  %v3859_v52 = vld [vmem:[#allocation6 + $0x68] ss:$16 sps:$4 sm:$0xff]  }
 0x62f   :  { %v4021_v49 = vpop.eup %4020 }
 0x630   :  { %v1513_v50 = vmul.f32 %v4021_v49, %v4017_v26  ;;  %v3850_v26 = vld [vmem:[#allocation6 + $0x80] ss:$16 sps:$4 sm:$0xff]   ;;  %v3858_v49 = vld [vmem:[#allocation6 + $0x64] ss:$16 sps:$4 sm:$0xff]  }
 0x631   :  { %v4023_v51 = vpop.eup %4022 }
 0x632   :  { %v1512_v56 = vmul.f32 %v4023_v51, %v4856_v48  ;;  %v3856_v51 = vld [vmem:[#allocation6 + $0x60] ss:$16 sps:$4 sm:$0xff]  }
 0x633   :  { %v4025_v57 = vpop.eup %4024 }
 0x634   :  { %v4906_v3 = vadd.f32 %v1513_v50, %v1512_v56  ;;  %v3861_v50 = vld [vmem:[#allocation6 + $0x6c] ss:$16 sps:$4 sm:$0xff]   ;;  %v3864_v56 = vld [vmem:[#allocation6 + $0x44] ss:$16 sps:$4 sm:$0xff]  }
 0x636   :  { %4026 = vtanh.f32 %v4906_v3 }
 0x643   :  { %v4027_v4 = vpop.eup %4026 }
 0x644   :  { %v1516_v5 = vmul.f32 %v4027_v4, %v4025_v57  ;;  %v3862_v57 = vld [vmem:[#allocation6 + $0x40] ss:$16 sps:$4 sm:$0xff]   ;;  %v3865_v4 = vld [vmem:[#allocation6 + $0x48] ss:$16 sps:$4 sm:$0xff]  }
 0x646   :  { %v1517_v58 = vpack.c.bf16 %v1516_v5, %v1516_v5  ;;  %v3870_v5 = vld [vmem:[#allocation6 + $0x24] ss:$16 sps:$4 sm:$0xff]  }
 0x648   :  { %1519 = vst [vmem:[#allocation3 + $0x14] sm:$0xf] %v1517_v58  ;;  %1560 = vmatmul.mubr.bf16.vlgmr.msra.gmra.mxu0 %v1517_v58  ;;  %1601 = vmatmul.mubr.bf16.vlgmr.msra.gmra.mxu1 %v1517_v58  ;;  %v3873_v58 = vld [vmem:[#allocation6 + $0x2c] ss:$16 sps:$4 sm:$0xff]  }
 0x649   :  { %1648 = vmatpush1.bf16.msra.mxu0 %v4765_v30  ;;  %1689 = vmatpush1.bf16.msra.mxu1 %v4768_v8  ;;  %v3834_v30 = vld [vmem:[#allocation6 + $0xe4] ss:$16 sps:$4 sm:$0xff]   ;;  %v3837_v8 = vld [vmem:[#allocation6 + $0xec] ss:$16 sps:$4 sm:$0xff]  }
 0x64a   :  { %1649 = vmatprep.subr.bf16.mxu0 %v4771_v13  ;;  %1690 = vmatprep.subr.bf16.mxu1 %v4774_v27  ;;  %v1523_v13 = vunpack.c.l.bf16 %v4613_v14 }
 0x64b   :  { %1679 = vmatprep.mubr.bf16.mxu0 %v5590_v25  ;;  %1720 = vmatprep.mubr.bf16.mxu1 %v5590_v25 }
 0x64d   :  { %1650 = vmatpush1.bf16.msra.mxu0 %v4779_v16  ;;  %1691 = vmatpush1.bf16.msra.mxu1 %v4782_v15 }
 0x64e   :  { %1651 = vmatprep.subr.bf16.mxu0 %v4785_v44  ;;  %1692 = vmatprep.subr.bf16.mxu1 %v4788_v32  ;;  %v1524_v44 = vunpack.c.h.bf16 %v4613_v14 }
 0x651   :  { %1652 = vmatpush1.bf16.msra.mxu0 %v4791_v21  ;;  %1693 = vmatpush1.bf16.msra.mxu1 %v4794_v10 }
 0x652   :  { %1653 = vmatprep.subr.bf16.mxu0 %v4797_v12  ;;  %1694 = vmatprep.subr.bf16.mxu1 %v4800_v22 }
 0x655   :  { %1654 = vmatpush1.bf16.msra.mxu0 %v4803_v7  ;;  %1695 = vmatpush1.bf16.msra.mxu1 %v4806_v11 }
 0x656   :  { %1655 = vmatprep.subr.bf16.mxu0 %v4809_v28  ;;  %1696 = vmatprep.subr.bf16.mxu1 %v4812_v20 }
 0x659   :  { %1656 = vmatpush1.bf16.msra.mxu0 %v4815_v18  ;;  %1697 = vmatpush1.bf16.msra.mxu1 %v4818_v31  ;;  %v5595_v18 = vld [vmem:[#allocation16_spill] sm:$0xff] }
 0x65a   :  { %1657 = vmatprep.subr.bf16.mxu0 %v4821_v38  ;;  %1698 = vmatprep.subr.bf16.mxu1 %v4824_v39  ;;  %v1526_v31 = vunpack.c.h.bf16 %v5595_v18  ;;  %v1525_v39 = vunpack.c.l.bf16 %v5595_v18  ;;  %v4975_v18 = vld [vmem:[#allocation8 + $0x1c8] ss:$16 sps:$4 sm:$0xff]  }
 0x65d   :  { %1658 = vmatpush1.bf16.msra.mxu0 %v4827_v40  ;;  %1699 = vmatpush1.bf16.msra.mxu1 %v4830_v41 }
 0x65e   :  { %1659 = vmatprep.subr.bf16.mxu0 %v4833_v42  ;;  %1700 = vmatprep.subr.bf16.mxu1 %v4836_v43 }
 0x661   :  { %1660 = vmatpush1.bf16.msra.mxu0 %v4839_v45  ;;  %1701 = vmatpush1.bf16.msra.mxu1 %v4842_v46 }
 0x662   :  { %1661 = vmatprep.subr.bf16.mxu0 %v4887_v6  ;;  %1702 = vmatprep.subr.bf16.mxu1 %v4890_v54 }
 0x665   :  { %1662 = vmatpush1.bf16.msra.mxu0 %v4893_v55  ;;  %1703 = vmatpush1.bf16.msra.mxu1 %v4896_v2 }
 0x666   :  { %2046 = vmatprep.subr.bf16.mxu0 %v3834_v30  ;;  %2119 = vmatprep.subr.bf16.mxu1 %v3837_v8  ;;  %v3868_v30 = vld [vmem:[#allocation6 + $0x20] ss:$16 sps:$4 sm:$0xff]   ;;  %v3871_v8 = vld [vmem:[#allocation6 + $0x28] ss:$16 sps:$4 sm:$0xff]  }
 0x708   :  { %v1561_v27 = vpop.f32.mrf.mxu0  ;;  %v1602_v16 = vpop.f32.mrf.mxu1 }
 0x709   :  { %v1609_v15 = vadd.f32 %v1561_v27, %v1523_v13  ;;  %v1611_v40 = vadd.f32 %v1602_v16, %v1525_v39  ;;  %v3876_v13 = vld [vmem:[#allocation6 + $0x4] ss:$16 sps:$4 sm:$0xff]   ;;  %v3879_v27 = vld [vmem:[#allocation6 + $0xc] ss:$16 sps:$4 sm:$0xff]   ;;  %v3874_v16 = vld [vmem:[#allocation6] ss:$16 sps:$4 sm:$0xff]  }
 0x70a   :  { %v1563_v32 = vpop.f32.mrf.mxu0  ;;  %v1604_v21 = vpop.f32.mrf.mxu1  ;;  %v4985_v39 = vld [vmem:[#allocation8 + $0x1a0] ss:$16 sps:$4 sm:$0xff]  }
 0x70b   :  { %v3568_v10 = vmul.f32 -1.442695, %v1609_v15  ;;  %v1610_v12 = vadd.f32 %v1563_v32, %v1524_v44  ;;  %v1612_v38 = vadd.f32 %v1604_v21, %v1526_v31  ;;  %v3877_v15 = vld [vmem:[#allocation6 + $0x8] ss:$16 sps:$4 sm:$0xff]   ;;  %v3880_v44 = vld [vmem:[#allocation3] sm:$0xff]   ;;  %v3882_v21 = vld [vmem:[#allocation3 + $0x10] sm:$0xff]  }
 0x70c   :  { %v1565_v22 = vpop.f32.mrf.mxu0  ;;  %v1606_v7 = vpop.f32.mrf.mxu1  ;;  %v3881_v32 = vld [vmem:[#allocation3 + $0x8] sm:$0xff]   ;;  %v4981_v31 = vld [vmem:[#allocation8 + $0x1a4] ss:$16 sps:$4 sm:$0xff]  }
 0x70d   :  { %4028 = vpow2.f32 %v3568_v10  ;;  %v3569_v11 = vmul.f32 -1.442695, %v1610_v12  ;;  %v3570_v41 = vmul.f32 -1.442695, %v1612_v38  ;;  %v4957_v10 = vld [vmem:[#allocation8 + $0x1e4] ss:$16 sps:$4 sm:$0xff]  }
 0x70e   :  { %v1566_v28 = vpop.f32.mrf.mxu0  ;;  %v1607_v20 = vpop.f32.mrf.mxu1  ;;  %v4959_v12 = vld [vmem:[#allocation8 + $0x1ec] ss:$16 sps:$4 sm:$0xff]   ;;  %v4961_v22 = vld [vmem:[#allocation8 + $0x1e0] ss:$16 sps:$4 sm:$0xff]   ;;  %v4963_v7 = vld [vmem:[#allocation8 + $0x1e8] ss:$16 sps:$4 sm:$0xff]  }
 0x70f   :  { %4030 = vpow2.f32 %v3569_v11  ;;  %v4969_v11 = vld [vmem:[#allocation8 + $0x1c4] ss:$16 sps:$4 sm:$0xff]   ;;  %v4971_v28 = vld [vmem:[#allocation8 + $0x1cc] ss:$16 sps:$4 sm:$0xff]   ;;  %v4973_v20 = vld [vmem:[#allocation8 + $0x1c0] ss:$16 sps:$4 sm:$0xff]  }
 0x710   :  { %4032 = vtanh.f32 %v1611_v40  ;;  %v4983_v38 = vld [vmem:[#allocation8 + $0x1ac] ss:$16 sps:$4 sm:$0xff]   ;;  %v4987_v40 = vld [vmem:[#allocation8 + $0x1a8] ss:$16 sps:$4 sm:$0xff]  }
 0x711   :  { %4034 = vpow2.f32 %v3570_v41  ;;  %v4993_v41 = vld [vmem:[#allocation8 + $0x184] ss:$16 sps:$4 sm:$0xff]  }
 0x71a   :  { %v4029_v42 = vpop.eup %4028 }
 0x71b   :  { %v1616_v14 = vadd.f32 1.0, %v4029_v42  ;;  %v4995_v42 = vld [vmem:[#allocation8 + $0x18c] ss:$16 sps:$4 sm:$0xff]  }
 0x71c   :  { %v4031_v43 = vpop.eup %4030 }
 0x71d   :  { %4036 = vrcp.f32 %v1616_v14  ;;  %v1622_v45 = vadd.f32 1.0, %v4031_v43  ;;  %v4033_v46 = vpop.eup %4032  ;;  %v4997_v14 = vld [vmem:[#allocation8 + $0x180] ss:$16 sps:$4 sm:$0xff]   ;;  %v4999_v43 = vld [vmem:[#allocation8 + $0x188] ss:$16 sps:$4 sm:$0xff]  }
 0x71e   :  { %v4035_v48 = vpop.eup %4034 }
 0x71f   :  { %4038 = vrcp.f32 %v1622_v45  ;;  %v1629_v2 = vadd.f32 1.0, %v4035_v48  ;;  %v5005_v45 = vld [vmem:[#allocation8 + $0x164] ss:$16 sps:$4 sm:$0xff]   ;;  %v5009_v48 = vld [vmem:[#allocation8 + $0x160] ss:$16 sps:$4 sm:$0xff]  }
 0x721   :  { %4040 = vrcp.f32 %v1629_v2  ;;  %v5021_v2 = vld [vmem:[#allocation8 + $0x140] ss:$16 sps:$4 sm:$0xff]  }
 0x72a   :  { %v4037_v6 = vpop.eup %4036 }
 0x72b   :  { %v1633_v54 = vmul.f32 %v4037_v6, %v4033_v46  ;;  %v5007_v46 = vld [vmem:[#allocation8 + $0x16c] ss:$16 sps:$4 sm:$0xff]   ;;  %v5011_v6 = vld [vmem:[#allocation8 + $0x168] ss:$16 sps:$4 sm:$0xff]  }
 0x72c   :  { %v4039_v55 = vpop.eup %4038 }
 0x72d   :  { %v1632_v59 = vmul.f32 %v4039_v55, %v4906_v3  ;;  %v3867_v3 = vld [vmem:[#allocation6 + $0x4c] ss:$16 sps:$4 sm:$0xff]  }
 0x72e   :  { %v4041_v61 = vpop.eup %4040  ;;  %v5015_v55 = vld [vmem:[#allocation8 + $0x14c] ss:$16 sps:$4 sm:$0xff]  }
 0x72f   :  { %v4946_v60 = vadd.f32 %v1633_v54, %v1632_v59  ;;  %v5013_v54 = vld [vmem:[#allocation8 + $0x144] ss:$16 sps:$4 sm:$0xff]   ;;  %v5023_v59 = vld [vmem:[#allocation8 + $0x148] ss:$16 sps:$4 sm:$0xff]  }
 0x731   :  { %4042 = vtanh.f32 %v4946_v60 }
 0x73e   :  { %v4043_v63 = vpop.eup %4042 }
 0x73f   :  { %v1636_v1 = vmul.f32 %v4043_v63, %v4041_v61  ;;  %v5029_v61 = vld [vmem:[#allocation8 + $0x124] ss:$16 sps:$4 sm:$0xff]   ;;  %v5031_v63 = vld [vmem:[#allocation8 + $0x12c] ss:$16 sps:$4 sm:$0xff]  }
 0x741   :  { %v1637_v24 = vpack.c.bf16 %v1636_v1, %v1636_v1  ;;  %v5033_v1 = vld [vmem:[#allocation8 + $0x120] ss:$16 sps:$4 sm:$0xff]  }
 0x743   :  { %1639 = vst [vmem:[#allocation3 + $0x18] sm:$0xf] %v1637_v24  ;;  %1680 = vmatmul.mubr.bf16.vlgmr.msra.gmra.mxu0 %v1637_v24  ;;  %1721 = vmatmul.mubr.bf16.vlgmr.msra.gmra.mxu1 %v1637_v24  ;;  %v5039_v24 = vld [vmem:[#allocation8 + $0x10c] ss:$16 sps:$4 sm:$0xff]  }
 0x744   :  { %2047 = vmatpush1.bf16.msra.mxu0 %v3832_v17  ;;  %2120 = vmatpush1.bf16.msra.mxu1 %v3835_v19  ;;  %v5035_v17 = vld [vmem:[#allocation8 + $0x128] ss:$16 sps:$4 sm:$0xff]   ;;  %v5037_v19 = vld [vmem:[#allocation8 + $0x104] ss:$16 sps:$4 sm:$0xff]  }
 0x745   :  { %2048 = vmatprep.subr.bf16.mxu0 %v3840_v36  ;;  %2121 = vmatprep.subr.bf16.mxu1 %v3843_v37  ;;  %v5045_v36 = vld [vmem:[#allocation8 + $0x100] ss:$16 sps:$4 sm:$0xff]   ;;  %v5047_v37 = vld [vmem:[#allocation8 + $0x108] ss:$16 sps:$4 sm:$0xff]  }
 0x746   :  { %2078 = vmatprep.mubr.bf16.mxu0 %v5590_v25  ;;  %2151 = vmatprep.mubr.bf16.mxu1 %v5590_v25 }
 0x748   :  { %2049 = vmatpush1.bf16.msra.mxu0 %v3838_v62  ;;  %2122 = vmatpush1.bf16.msra.mxu1 %v3841_v23  ;;  %v1643_v62 = vunpack.c.l.bf16 %v4621_v29 }
 0x749   :  { %2050 = vmatprep.subr.bf16.mxu0 %v3846_v35  ;;  %2123 = vmatprep.subr.bf16.mxu1 %v3849_v0 }
 0x74c   :  { %2051 = vmatpush1.bf16.msra.mxu0 %v3844_v9  ;;  %2124 = vmatpush1.bf16.msra.mxu1 %v3847_v53  ;;  %v1644_v9 = vunpack.c.h.bf16 %v4621_v29 }
 0x74d   :  { %2052 = vmatprep.subr.bf16.mxu0 %v3852_v33  ;;  %2125 = vmatprep.subr.bf16.mxu1 %v3855_v34 }
 0x750   :  { %2053 = vmatpush1.bf16.msra.mxu0 %v3850_v26  ;;  %2126 = vmatpush1.bf16.msra.mxu1 %v3853_v47 }
 0x751   :  { %2054 = vmatprep.subr.bf16.mxu0 %v3858_v49  ;;  %2127 = vmatprep.subr.bf16.mxu1 %v3861_v50 }
 0x754   :  { %2055 = vmatpush1.bf16.msra.mxu0 %v3856_v51  ;;  %2128 = vmatpush1.bf16.msra.mxu1 %v3859_v52 }
 0x755   :  { %2056 = vmatprep.subr.bf16.mxu0 %v3864_v56  ;;  %2129 = vmatprep.subr.bf16.mxu1 %v3867_v3  ;;  %v5596_v56 = vld [vmem:[#allocation17_spill] sm:$0xff] }
 0x756   :  { %v1646_v3 = vunpack.c.h.bf16 %v5596_v56 }
 0x758   :  { %2057 = vmatpush1.bf16.msra.mxu0 %v3862_v57  ;;  %2130 = vmatpush1.bf16.msra.mxu1 %v3865_v4  ;;  %v1645_v4 = vunpack.c.l.bf16 %v5596_v56 }
 0x759   :  { %2058 = vmatprep.subr.bf16.mxu0 %v3870_v5  ;;  %2131 = vmatprep.subr.bf16.mxu1 %v3873_v58 }
 0x75c   :  { %2059 = vmatpush1.bf16.msra.mxu0 %v3868_v30  ;;  %2132 = vmatpush1.bf16.msra.mxu1 %v3871_v8 }
 0x75d   :  { %2060 = vmatprep.subr.bf16.mxu0 %v3876_v13  ;;  %2133 = vmatprep.subr.bf16.mxu1 %v3879_v27 }
 0x760   :  { %2061 = vmatpush1.bf16.msra.mxu0 %v3874_v16  ;;  %2134 = vmatpush1.bf16.msra.mxu1 %v3877_v15 }
 0x761   :  { %2503 = vmatprep.subr.bf16.mxu0 %v4957_v10  ;;  %2544 = vmatprep.subr.bf16.mxu1 %v4959_v12 }
 0x763   :  { %2079 = vmatmul.mubr.bf16.vlgmr.msra.gmra.mxu0 %v3880_v44  ;;  %2152 = vmatmul.mubr.bf16.vlgmr.msra.gmra.mxu1 %v3880_v44 }
 0x764   :  { %2088 = vmatprep.mubr.bf16.mxu0 %v5590_v25  ;;  %2161 = vmatprep.mubr.bf16.mxu1 %v5590_v25 }
 0x765   :  { %2504 = vmatpush1.bf16.msra.mxu0 %v4961_v22  ;;  %2545 = vmatpush1.bf16.msra.mxu1 %v4963_v7 }
 0x766   :  { %2505 = vmatprep.subr.bf16.mxu0 %v4969_v11  ;;  %2546 = vmatprep.subr.bf16.mxu1 %v4971_v28 }
 0x769   :  { %2506 = vmatpush1.bf16.msra.mxu0 %v4973_v20  ;;  %2547 = vmatpush1.bf16.msra.mxu1 %v4975_v18 }
 0x76a   :  { %2507 = vmatprep.subr.bf16.mxu0 %v4981_v31  ;;  %2548 = vmatprep.subr.bf16.mxu1 %v4983_v38 }
 0x76b   :  { %2089 = vmatmul.mubr.bf16.gmra.mxu0 %v3881_v32  ;;  %2162 = vmatmul.mubr.bf16.gmra.mxu1 %v3881_v32  ;;  %v3574_v32 = vld [vmem:[%s5555_s4 + $0x4] sm:$0xf] }
 0x76c   :  { %2098 = vmatprep.mubr.bf16.mxu0 %v5590_v25  ;;  %2171 = vmatprep.mubr.bf16.mxu1 %v5590_v25 }
 0x76d   :  { %2508 = vmatpush1.bf16.msra.mxu0 %v4985_v39  ;;  %2549 = vmatpush1.bf16.msra.mxu1 %v4987_v40 }
 0x76e   :  { %2509 = vmatprep.subr.bf16.mxu0 %v4993_v41  ;;  %2550 = vmatprep.subr.bf16.mxu1 %v4995_v42 }
 0x771   :  { %2510 = vmatpush1.bf16.msra.mxu0 %v4997_v14  ;;  %2551 = vmatpush1.bf16.msra.mxu1 %v4999_v43 }
 0x772   :  { %2511 = vmatprep.subr.bf16.mxu0 %v5005_v45  ;;  %2552 = vmatprep.subr.bf16.mxu1 %v5007_v46 }
 0x773   :  { %2099 = vmatmul.mubr.bf16.gmra.mxu0 %v3882_v21  ;;  %2172 = vmatmul.mubr.bf16.gmra.mxu1 %v3882_v21 }
 0x774   :  { %2108 = vmatprep.mubr.bf16.mxu0 %v5590_v25  ;;  %2181 = vmatprep.mubr.bf16.mxu1 %v5590_v25 }
 0x775   :  { %2512 = vmatpush1.bf16.msra.mxu0 %v5009_v48  ;;  %2553 = vmatpush1.bf16.msra.mxu1 %v5011_v6 }
 0x776   :  { %2513 = vmatprep.subr.bf16.mxu0 %v5013_v54  ;;  %2554 = vmatprep.subr.bf16.mxu1 %v5015_v55 }
 0x779   :  { %2514 = vmatpush1.bf16.msra.mxu0 %v5021_v2  ;;  %2555 = vmatpush1.bf16.msra.mxu1 %v5023_v59 }
 0x77a   :  { %2515 = vmatprep.subr.bf16.mxu0 %v5029_v61  ;;  %2556 = vmatprep.subr.bf16.mxu1 %v5031_v63 }
 0x77d   :  { %2516 = vmatpush1.bf16.msra.mxu0 %v5033_v1  ;;  %2557 = vmatpush1.bf16.msra.mxu1 %v5035_v17 }
 0x77e   :  { %2517 = vmatprep.subr.bf16.mxu0 %v5037_v19  ;;  %2558 = vmatprep.subr.bf16.mxu1 %v5039_v24 }
 0x781   :  { %2518 = vmatpush1.bf16.msra.mxu0 %v5045_v36  ;;  %2559 = vmatpush1.bf16.msra.mxu1 %v5047_v37 }
 0x782   :  { %2621 = vmatprep.subr.bf16.mxu0 %v4957_v10  ;;  %2662 = vmatprep.subr.bf16.mxu1 %v4959_v12 }
 0x803   :  { %v1681_v23 = vpop.f32.mrf.mxu0  ;;  %v1722_v35 = vpop.f32.mrf.mxu1 }
 0x804   :  { %v1729_v0 = vadd.f32 %v1681_v23, %v1643_v62  ;;  %v1731_v5 = vadd.f32 %v1722_v35, %v1645_v4 }
 0x805   :  { %v1683_v53 = vpop.f32.mrf.mxu0  ;;  %v1724_v33 = vpop.f32.mrf.mxu1 }
 0x806   :  { %v3571_v34 = vmul.f32 -1.442695, %v1729_v0  ;;  %v1730_v26 = vadd.f32 %v1683_v53, %v1644_v9  ;;  %v1732_v57 = vadd.f32 %v1724_v33, %v1646_v3  ;;  %v5597_v53 = vld [vmem:[#allocation11_spill] sm:$0xff] }
 0x807   :  { %v1685_v47 = vpop.f32.mrf.mxu0  ;;  %v1726_v49 = vpop.f32.mrf.mxu1  ;;  %v5598_v33 = vsub.s32 0, %v5597_v53  ;;  %v5602_v3 = vsub.s32 3, %v5597_v53 }
 0x808   :  { %4044 = vpow2.f32 %v3571_v34  ;;  %v3572_v50 = vmul.f32 -1.442695, %v1730_v26  ;;  %v3573_v58 = vmul.f32 -1.442695, %v1732_v57 }
 0x809   :  { %v1686_v51 = vpop.f32.mrf.mxu0  ;;  %v1727_v52 = vpop.f32.mrf.mxu1  ;;  %v5072_v34 = vrot.slane %v3574_v32, %v5598_v33  ;;  %v5085_v57 = vrot.slane %v3574_v32, %v5602_v3 }
 0x80a   :  { %4046 = vpow2.f32 %v3572_v50  ;;  %v5600_v50 = vsub.s32 2, %v5597_v53  ;;  %v5601_v52 = vsub.s32 1, %v5597_v53 }
 0x80b   :  { %4048 = vtanh.f32 %v1731_v5  ;;  %5599 = vst [vmem:[#allocation12_spill] sm:$0xff] %v5072_v34 }
 0x80c   :  { %4050 = vpow2.f32 %v3573_v58  ;;  %v5077_v51 = vrot.slane %v3574_v32, %v5600_v50  ;;  %v5081_v56 = vrot.slane %v3574_v32, %v5601_v52 }
 0x815   :  { %v4045_v30 = vpop.eup %4044 }
 0x816   :  { %v1736_v29 = vadd.f32 1.0, %v4045_v30 }
 0x817   :  { %v4047_v8 = vpop.eup %4046 }
 0x818   :  { %4052 = vrcp.f32 %v1736_v29  ;;  %v1742_v13 = vadd.f32 1.0, %v4047_v8  ;;  %v4049_v27 = vpop.eup %4048 }
 0x819   :  { %v4051_v44 = vpop.eup %4050 }
 0x81a   :  { %4054 = vrcp.f32 %v1742_v13  ;;  %v1749_v9 = vadd.f32 1.0, %v4051_v44 }
 0x81c   :  { %4056 = vrcp.f32 %v1749_v9 }
 0x823   :  { %v5059_v16 = vpop.f32.mrf.mxu0  ;;  %v5061_v15 = vpop.f32.mrf.mxu1 }
 0x825   :  { %v4053_v21 = vpop.eup %4052  ;;  %v5066_v62 = vpop.f32.mrf.mxu0 }
 0x826   :  { %v5068_v23 = vpop.f32.mrf.mxu1  ;;  %v1753_v35 = vmul.f32 %v4053_v21, %v4049_v27 }
 0x827   :  { %v4055_v0 = vpop.eup %4054  ;;  %v2084_v26 = vpop.f32.mrf.mxu0 }
 0x828   :  { %v2157_v47 = vpop.f32.mrf.mxu1  ;;  %v1752_v49 = vmul.f32 %v4055_v0, %v4946_v60  ;;  %v2085_v4 = vadd.f32 %v2084_v26, %v5072_v34 }
 0x829   :  { %v2086_v5 = vpop.f32.mrf.mxu0  ;;  %v2158_v29 = vadd.f32 %v2157_v47, %v5077_v51 }
 0x82a   :  { %v2159_v58 = vpop.f32.mrf.mxu1  ;;  %v1754_v30 = vadd.f32 %v1753_v35, %v1752_v49  ;;  %v2087_v60 = vadd.f32 %v2086_v5, %v5081_v56 }
 0x82b   :  { %v2160_v8 = vadd.f32 %v2159_v58, %v5085_v57  ;;  %v2090_v13 = vpop.f32.mrf.mxu0 }
 0x82c   :  { %v2163_v27 = vpop.f32.mrf.mxu1  ;;  %4058 = vtanh.f32 %v1754_v30  ;;  %1761 = vst [vmem:[%s5560_s9] sm:$0xff] %v1754_v30  ;;  %v5094_v44 = vpack.c.bf16 %v2087_v60, %v2085_v4  ;;  %v2091_v0 = vadd.f32 %v2090_v13, %v5072_v34 }
 0x82d   :  { %v5096_v32 = vpack.c.bf16 %v2160_v8, %v2158_v29  ;;  %v2092_v21 = vpop.f32.mrf.mxu0  ;;  %v2164_v53 = vadd.f32 %v2163_v27, %v5077_v51 }
 0x82e   :  { %v2165_v35 = vpop.f32.mrf.mxu1  ;;  %v2093_v33 = vadd.f32 %v2092_v21, %v5081_v56 }
 0x82f   :  { %v2166_v9 = vadd.f32 %v2165_v35, %v5085_v57  ;;  %v2094_v26 = vpop.f32.mrf.mxu0 }
 0x830   :  { %v2167_v47 = vpop.f32.mrf.mxu1  ;;  %v5102_v49 = vpack.c.bf16 %v2093_v33, %v2091_v0  ;;  %v2095_v4 = vadd.f32 %v2094_v26, %v5072_v34 }
 0x831   :  { %v5104_v50 = vpack.c.bf16 %v2166_v9, %v2164_v53  ;;  %v2096_v52 = vpop.f32.mrf.mxu0  ;;  %v2168_v5 = vadd.f32 %v2167_v47, %v5077_v51  ;;  %v4057_v9 = vpop.eup %4056 }
 0x832   :  { %v2169_v3 = vpop.f32.mrf.mxu1  ;;  %v2097_v58 = vadd.f32 %v2096_v52, %v5081_v56 }
 0x833   :  { %v2170_v30 = vadd.f32 %v2169_v3, %v5085_v57  ;;  %v2100_v29 = vpop.f32.mrf.mxu0 }
 0x834   :  { %v2173_v60 = vpop.f32.mrf.mxu1  ;;  %v5110_v8 = vpack.c.bf16 %v2097_v58, %v2095_v4  ;;  %v2101_v35 = vadd.f32 %v2100_v29, %v5072_v34  ;;  %v3575_v58 = vld [vmem:[%s5556_s5 + $0x8] sm:$0xff] }
 0x835   :  { %v5112_v13 = vpack.c.bf16 %v2170_v30, %v2168_v5  ;;  %v2102_v27 = vpop.f32.mrf.mxu0  ;;  %v2174_v0 = vadd.f32 %v2173_v60, %v5077_v51  ;;  %v2342_v30 = vpack.c.bf16 %v3575_v58, %v3575_v58 }
 0x836   :  { %v2175_v21 = vpop.f32.mrf.mxu1  ;;  %v2103_v53 = vadd.f32 %v2102_v27, %v5081_v56  ;;  %v2083_v27 = vadd.f32 %v5066_v62, %v5081_v56 }
 0x837   :  { %5603 = vst [vmem:[#allocation13_spill] sm:$0xff] %v5112_v13  ;;  %v2176_v33 = vadd.f32 %v2175_v21, %v5085_v57  ;;  %v5164_v29 = vpop.f32.mrf.mxu0 }
 0x838   :  { %v5118_v26 = vpack.c.bf16 %v2103_v53, %v2101_v35  ;;  %5606 = vst [vmem:[#allocation16_spill] sm:$0xff] %v5164_v29  ;;  %v5166_v60 = vpop.f32.mrf.mxu1 }
 0x839   :  { %v5120_v47 = vpack.c.bf16 %v2176_v33, %v2174_v0  ;;  %v4059_v52 = vpop.eup %4058  ;;  %5607 = vst [vmem:[#allocation17_spill] sm:$0xff] %v5166_v60  ;;  %v5170_v21 = vpop.f32.mrf.mxu0  ;;  %v2081_v0 = vadd.f32 %v5059_v16, %v5072_v34 }
 0x83a   :  { %5604 = vst [vmem:[#allocation14_spill] sm:$0xff] %v5118_v26  ;;  %v1756_v3 = vmul.f32 %v4059_v52, %v4057_v9  ;;  %5608 = vst [vmem:[#allocation11_spill] sm:$0xff] %v5170_v21  ;;  %v5172_v35 = vpop.f32.mrf.mxu1 }
 0x83b   :  { %5605 = vst [vmem:[#allocation15_spill] sm:$0xff] %v5120_v47  ;;  %5609 = vst [vmem:[#allocation18_spill] sm:$0xff] %v5172_v35  ;;  %v3710_v9 = vpack.c.bf16 %v2083_v27, %v2081_v0 }
 0x83c   :  { %v1757_v4 = vpack.c.bf16 %v1756_v3, %v1756_v3  ;;  %1760 = vst [vmem:[%s5559_s8] sm:$0xff] %v1756_v3 }
 0x83d   :  { %v2338_v47 = vunpack.c.l.bf16 %v3710_v9 }
 0x83e   :  { %1759 = vst [vmem:[#allocation3 + $0x1c] sm:$0xf] %v1757_v4 }
 0x845   :  { %v3919_v5 = vld [vmem:[#allocation3 + $0x18] sm:$0xff]  }
 0x846   :  { %2109 = vmatmul.mubr.bf16.gmra.mxu0 %v3919_v5  ;;  %2182 = vmatmul.mubr.bf16.gmra.mxu1 %v3919_v5 }
 0x847   :  { %2535 = vmatprep.mubr.bf16.mxu0 %v5590_v25  ;;  %2576 = vmatprep.mubr.bf16.mxu1 %v5590_v25 }
 0x84e   :  { %2536 = vmatmul.mubr.bf16.vlgmr.msra.gmra.mxu0 %v2342_v30  ;;  %2577 = vmatmul.mubr.bf16.vlgmr.msra.gmra.mxu1 %v2342_v30 }
 0x84f   :  { %2622 = vmatpush1.bf16.msra.mxu0 %v4961_v22  ;;  %2663 = vmatpush1.bf16.msra.mxu1 %v4963_v7 }
 0x850   :  { %2623 = vmatprep.subr.bf16.mxu0 %v4969_v11  ;;  %2664 = vmatprep.subr.bf16.mxu1 %v4971_v28 }
 0x851   :  { %2653 = vmatprep.mubr.bf16.mxu0 %v5590_v25  ;;  %2694 = vmatprep.mubr.bf16.mxu1 %v5590_v25 }
 0x853   :  { %2624 = vmatpush1.bf16.msra.mxu0 %v4973_v20  ;;  %2665 = vmatpush1.bf16.msra.mxu1 %v4975_v18 }
 0x854   :  { %2625 = vmatprep.subr.bf16.mxu0 %v4981_v31  ;;  %2666 = vmatprep.subr.bf16.mxu1 %v4983_v38 }
 0x857   :  { %2626 = vmatpush1.bf16.msra.mxu0 %v4985_v39  ;;  %2667 = vmatpush1.bf16.msra.mxu1 %v4987_v40 }
 0x858   :  { %2627 = vmatprep.subr.bf16.mxu0 %v4993_v41  ;;  %2668 = vmatprep.subr.bf16.mxu1 %v4995_v42 }
 0x85b   :  { %2628 = vmatpush1.bf16.msra.mxu0 %v4997_v14  ;;  %2669 = vmatpush1.bf16.msra.mxu1 %v4999_v43 }
 0x85c   :  { %2629 = vmatprep.subr.bf16.mxu0 %v5005_v45  ;;  %2670 = vmatprep.subr.bf16.mxu1 %v5007_v46 }
 0x85f   :  { %2630 = vmatpush1.bf16.msra.mxu0 %v5009_v48  ;;  %2671 = vmatpush1.bf16.msra.mxu1 %v5011_v6 }
 0x860   :  { %2631 = vmatprep.subr.bf16.mxu0 %v5013_v54  ;;  %2672 = vmatprep.subr.bf16.mxu1 %v5015_v55 }
 0x863   :  { %2632 = vmatpush1.bf16.msra.mxu0 %v5021_v2  ;;  %2673 = vmatpush1.bf16.msra.mxu1 %v5023_v59 }
 0x864   :  { %2633 = vmatprep.subr.bf16.mxu0 %v5029_v61  ;;  %2674 = vmatprep.subr.bf16.mxu1 %v5031_v63 }
 0x867   :  { %2634 = vmatpush1.bf16.msra.mxu0 %v5033_v1  ;;  %2675 = vmatpush1.bf16.msra.mxu1 %v5035_v17 }
 0x868   :  { %2635 = vmatprep.subr.bf16.mxu0 %v5037_v19  ;;  %2676 = vmatprep.subr.bf16.mxu1 %v5039_v24 }
 0x86b   :  { %2636 = vmatpush1.bf16.msra.mxu0 %v5045_v36  ;;  %2677 = vmatpush1.bf16.msra.mxu1 %v5047_v37 }
 0x86c   :  { %2740 = vmatprep.subr.bf16.mxu0 %v4957_v10  ;;  %2781 = vmatprep.subr.bf16.mxu1 %v4959_v12 }
 0x906   :  { %v2110_v53 = vpop.f32.mrf.mxu0  ;;  %v2183_v33 = vpop.f32.mrf.mxu1 }
 0x907   :  { %v2111_v4 = vadd.f32 %v2110_v53, %v5072_v34  ;;  %v2184_v5 = vadd.f32 %v2183_v33, %v5077_v51 }
 0x908   :  { %v2112_v52 = vpop.f32.mrf.mxu0  ;;  %v2185_v3 = vpop.f32.mrf.mxu1 }
 0x909   :  { %v2113_v58 = vadd.f32 %v2112_v52, %v5081_v56  ;;  %v2186_v62 = vadd.f32 %v2185_v3, %v5085_v57 }
 0x90a   :  { %v2114_v30 = vpop.f32.mrf.mxu0  ;;  %v2187_v60 = vpop.f32.mrf.mxu1 }
 0x90b   :  { %v5180_v29 = vpack.c.bf16 %v2113_v58, %v2111_v4  ;;  %v5182_v35 = vpack.c.bf16 %v2186_v62, %v2184_v5  ;;  %v2115_v27 = vadd.f32 %v2114_v30, %v5072_v34  ;;  %v2188_v0 = vadd.f32 %v2187_v60, %v5077_v51 }
 0x90c   :  { %v2116_v16 = vpop.f32.mrf.mxu0  ;;  %v2189_v21 = vpop.f32.mrf.mxu1  ;;  %v2339_v5 = vunpack.c.h.bf16 %v3710_v9  ;;  %v2156_v58 = vadd.f32 %v5068_v23, %v5085_v57  ;;  %v2154_v60 = vadd.f32 %v5061_v15, %v5077_v51 }
 0x90d   :  { %5610 = vst [vmem:[#allocation19_spill] sm:$0xff] %v5180_v29  ;;  %5611 = vst [vmem:[#allocation20_spill] sm:$0xff] %v5182_v35  ;;  %v2117_v53 = vadd.f32 %v2116_v16, %v5081_v56  ;;  %v2190_v33 = vadd.f32 %v2189_v21, %v5085_v57 }
 0x90e   :  { %v2537_v52 = vpop.f32.mrf.mxu0  ;;  %v2578_v26 = vpop.f32.mrf.mxu1 }
 0x90f   :  { %v5188_v3 = vpack.c.bf16 %v2117_v53, %v2115_v27  ;;  %v5190_v13 = vpack.c.bf16 %v2190_v33, %v2188_v0  ;;  %v2585_v4 = vadd.f32 %v2537_v52, %v2338_v47  ;;  %v3711_v27 = vpack.c.bf16 %v2156_v58, %v2154_v60 }
 0x910   :  { %v2539_v62 = vpop.f32.mrf.mxu0  ;;  %v2580_v35 = vpop.f32.mrf.mxu1 }
 0x911   :  { %5612 = vst [vmem:[#allocation21_spill] sm:$0xff] %v5188_v3  ;;  %5613 = vst [vmem:[#allocation22_spill] sm:$0xff] %v5190_v13  ;;  %v3661_v30 = vmul.f32 -1.442695, %v2585_v4  ;;  %v2586_v29 = vadd.f32 %v2539_v62, %v2339_v5  ;;  %v2341_v47 = vunpack.c.h.bf16 %v3711_v27  ;;  %v2340_v33 = vunpack.c.l.bf16 %v3711_v27 }
 0x912   :  { %v2541_v16 = vpop.f32.mrf.mxu0  ;;  %v2582_v21 = vpop.f32.mrf.mxu1  ;;  %v2617_v27 = vunpack.c.l.bf16 %v5094_v44 }
 0x913   :  { %4060 = vpow2.f32 %v3661_v30  ;;  %v3662_v34 = vmul.f32 -1.442695, %v2586_v29  ;;  %v2588_v9 = vadd.f32 %v2580_v35, %v2341_v47  ;;  %v2587_v13 = vadd.f32 %v2578_v26, %v2340_v33  ;;  %v3576_v29 = vld [vmem:[%s5557_s6 + $0x8] sm:$0xff] }
 0x914   :  { %v2542_v53 = vpop.f32.mrf.mxu0  ;;  %v2583_v0 = vpop.f32.mrf.mxu1 }
 0x915   :  { %4062 = vpow2.f32 %v3662_v34  ;;  %v3663_v52 = vmul.f32 -1.442695, %v2588_v9  ;;  %v2618_v9 = vunpack.c.h.bf16 %v5094_v44 }
 0x917   :  { %4064 = vpow2.f32 %v3663_v52 }
 0x920   :  { %v4061_v23 = vpop.eup %4060 }
 0x921   :  { %v2592_v3 = vadd.f32 1.0, %v4061_v23 }
 0x922   :  { %v4063_v4 = vpop.eup %4062 }
 0x923   :  { %4066 = vrcp.f32 %v2592_v3  ;;  %v2598_v5 = vadd.f32 1.0, %v4063_v4 }
 0x924   :  { %4068 = vtanh.f32 %v2587_v13  ;;  %v4065_v15 = vpop.eup %4064 }
 0x925   :  { %4070 = vrcp.f32 %v2598_v5  ;;  %v2605_v35 = vadd.f32 1.0, %v4065_v15 }
 0x927   :  { %4072 = vrcp.f32 %v2605_v35 }
 0x930   :  { %v4067_v62 = vpop.eup %4066 }
 0x931   :  { %v4069_v34 = vpop.eup %4068 }
 0x932   :  { %v4071_v58 = vpop.eup %4070  ;;  %v2609_v30 = vmul.f32 %v4069_v34, %v4067_v62 }
 0x933   :  { %v2608_v60 = vmul.f32 %v4071_v58, %v3576_v29  ;;  %v2620_v58 = vunpack.c.h.bf16 %v5096_v32 }
 0x934   :  { %v4073_v26 = vpop.eup %4072 }
 0x935   :  { %v5199_v16 = vadd.f32 %v2609_v30, %v2608_v60  ;;  %v2619_v30 = vunpack.c.l.bf16 %v5096_v32 }
 0x937   :  { %4074 = vtanh.f32 %v5199_v16 }
 0x944   :  { %v4075_v3 = vpop.eup %4074 }
 0x945   :  { %v2612_v13 = vmul.f32 %v4075_v3, %v4073_v26 }
 0x947   :  { %v2613_v21 = vpack.c.bf16 %v2612_v13, %v2612_v13 }
 0x949   :  { %2614 = vst [vmem:[%s5558_s7] sm:$0xf] %v2613_v21  ;;  %2654 = vmatmul.mubr.bf16.vlgmr.msra.gmra.mxu0 %v2613_v21  ;;  %2695 = vmatmul.mubr.bf16.vlgmr.msra.gmra.mxu1 %v2613_v21 }
 0x94a   :  { %2741 = vmatpush1.bf16.msra.mxu0 %v4961_v22  ;;  %2782 = vmatpush1.bf16.msra.mxu1 %v4963_v7 }
 0x94b   :  { %2742 = vmatprep.subr.bf16.mxu0 %v4969_v11  ;;  %2783 = vmatprep.subr.bf16.mxu1 %v4971_v28 }
 0x94c   :  { %2772 = vmatprep.mubr.bf16.mxu0 %v5590_v25  ;;  %2813 = vmatprep.mubr.bf16.mxu1 %v5590_v25 }
 0x94e   :  { %2743 = vmatpush1.bf16.msra.mxu0 %v4973_v20  ;;  %2784 = vmatpush1.bf16.msra.mxu1 %v4975_v18 }
 0x94f   :  { %2744 = vmatprep.subr.bf16.mxu0 %v4981_v31  ;;  %2785 = vmatprep.subr.bf16.mxu1 %v4983_v38 }
 0x952   :  { %2745 = vmatpush1.bf16.msra.mxu0 %v4985_v39  ;;  %2786 = vmatpush1.bf16.msra.mxu1 %v4987_v40 }
 0x953   :  { %2746 = vmatprep.subr.bf16.mxu0 %v4993_v41  ;;  %2787 = vmatprep.subr.bf16.mxu1 %v4995_v42 }
 0x956   :  { %2747 = vmatpush1.bf16.msra.mxu0 %v4997_v14  ;;  %2788 = vmatpush1.bf16.msra.mxu1 %v4999_v43 }
 0x957   :  { %2748 = vmatprep.subr.bf16.mxu0 %v5005_v45  ;;  %2789 = vmatprep.subr.bf16.mxu1 %v5007_v46 }
 0x95a   :  { %2749 = vmatpush1.bf16.msra.mxu0 %v5009_v48  ;;  %2790 = vmatpush1.bf16.msra.mxu1 %v5011_v6 }
 0x95b   :  { %2750 = vmatprep.subr.bf16.mxu0 %v5013_v54  ;;  %2791 = vmatprep.subr.bf16.mxu1 %v5015_v55 }
 0x95e   :  { %2751 = vmatpush1.bf16.msra.mxu0 %v5021_v2  ;;  %2792 = vmatpush1.bf16.msra.mxu1 %v5023_v59 }
 0x95f   :  { %2752 = vmatprep.subr.bf16.mxu0 %v5029_v61  ;;  %2793 = vmatprep.subr.bf16.mxu1 %v5031_v63 }
 0x962   :  { %2753 = vmatpush1.bf16.msra.mxu0 %v5033_v1  ;;  %2794 = vmatpush1.bf16.msra.mxu1 %v5035_v17 }
 0x963   :  { %2754 = vmatprep.subr.bf16.mxu0 %v5037_v19  ;;  %2795 = vmatprep.subr.bf16.mxu1 %v5039_v24 }
 0x966   :  { %2755 = vmatpush1.bf16.msra.mxu0 %v5045_v36  ;;  %2796 = vmatpush1.bf16.msra.mxu1 %v5047_v37 }
 0x967   :  { %2859 = vmatprep.subr.bf16.mxu0 %v4957_v10  ;;  %2900 = vmatprep.subr.bf16.mxu1 %v4959_v12 }
 0xa09   :  { %v2655_v53 = vpop.f32.mrf.mxu0  ;;  %v2696_v0 = vpop.f32.mrf.mxu1 }
 0xa0a   :  { %v2703_v47 = vadd.f32 %v2655_v53, %v2617_v27  ;;  %v2705_v60 = vadd.f32 %v2696_v0, %v2619_v30 }
 0xa0b   :  { %v2657_v33 = vpop.f32.mrf.mxu0  ;;  %v2698_v52 = vpop.f32.mrf.mxu1 }
 0xa0c   :  { %v3664_v23 = vmul.f32 -1.442695, %v2703_v47  ;;  %v2704_v4 = vadd.f32 %v2657_v33, %v2618_v9  ;;  %v2706_v35 = vadd.f32 %v2698_v52, %v2620_v58  ;;  %v2737_v58 = vunpack.c.h.bf16 %v5102_v49 }
 0xa0d   :  { %v2659_v5 = vpop.f32.mrf.mxu0  ;;  %v2700_v15 = vpop.f32.mrf.mxu1 }
 0xa0e   :  { %4076 = vpow2.f32 %v3664_v23  ;;  %v3665_v62 = vmul.f32 -1.442695, %v2704_v4  ;;  %v3666_v26 = vmul.f32 -1.442695, %v2706_v35 }
 0xa0f   :  { %v2660_v29 = vpop.f32.mrf.mxu0  ;;  %v2701_v34 = vpop.f32.mrf.mxu1 }
 0xa10   :  { %4078 = vpow2.f32 %v3665_v62 }
 0xa11   :  { %4080 = vtanh.f32 %v2705_v60 }
 0xa12   :  { %4082 = vpow2.f32 %v3666_v26 }
 0xa1b   :  { %v4077_v3 = vpop.eup %4076 }
 0xa1c   :  { %v2710_v44 = vadd.f32 1.0, %v4077_v3 }
 0xa1d   :  { %v4079_v13 = vpop.eup %4078 }
 0xa1e   :  { %4084 = vrcp.f32 %v2710_v44  ;;  %v2716_v21 = vadd.f32 1.0, %v4079_v13  ;;  %v4081_v27 = vpop.eup %4080 }
 0xa1f   :  { %v4083_v53 = vpop.eup %4082 }
 0xa20   :  { %4086 = vrcp.f32 %v2716_v21  ;;  %v2723_v23 = vadd.f32 1.0, %v4083_v53  ;;  %v2739_v53 = vunpack.c.h.bf16 %v5104_v50 }
 0xa22   :  { %4088 = vrcp.f32 %v2723_v23 }
 0xa2b   :  { %v4085_v47 = vpop.eup %4084 }
 0xa2c   :  { %v2727_v9 = vmul.f32 %v4085_v47, %v4081_v27 }
 0xa2d   :  { %v4087_v33 = vpop.eup %4086 }
 0xa2e   :  { %v2726_v52 = vmul.f32 %v4087_v33, %v5199_v16  ;;  %v2736_v16 = vunpack.c.l.bf16 %v5102_v49 }
 0xa2f   :  { %v4089_v32 = vpop.eup %4088 }
 0xa30   :  { %v5244_v4 = vadd.f32 %v2727_v9, %v2726_v52  ;;  %v2738_v9 = vunpack.c.l.bf16 %v5104_v50 }
 0xa32   :  { %4090 = vtanh.f32 %v5244_v4 }
 0xa3f   :  { %v4091_v0 = vpop.eup %4090 }
 0xa40   :  { %v2730_v5 = vmul.f32 %v4091_v0, %v4089_v32 }
 0xa42   :  { %v2731_v15 = vpack.c.bf16 %v2730_v5, %v2730_v5 }
 0xa44   :  { %3667 = vst [vmem:[%s5558_s7 + $0x4] sm:$0xf] %v2731_v15  ;;  %2773 = vmatmul.mubr.bf16.vlgmr.msra.gmra.mxu0 %v2731_v15  ;;  %2814 = vmatmul.mubr.bf16.vlgmr.msra.gmra.mxu1 %v2731_v15 }
 0xa45   :  { %2860 = vmatpush1.bf16.msra.mxu0 %v4961_v22  ;;  %2901 = vmatpush1.bf16.msra.mxu1 %v4963_v7 }
 0xa46   :  { %2861 = vmatprep.subr.bf16.mxu0 %v4969_v11  ;;  %2902 = vmatprep.subr.bf16.mxu1 %v4971_v28 }
 0xa47   :  { %2891 = vmatprep.mubr.bf16.mxu0 %v5590_v25  ;;  %2932 = vmatprep.mubr.bf16.mxu1 %v5590_v25 }
 0xa49   :  { %2862 = vmatpush1.bf16.msra.mxu0 %v4973_v20  ;;  %2903 = vmatpush1.bf16.msra.mxu1 %v4975_v18 }
 0xa4a   :  { %2863 = vmatprep.subr.bf16.mxu0 %v4981_v31  ;;  %2904 = vmatprep.subr.bf16.mxu1 %v4983_v38 }
 0xa4d   :  { %2864 = vmatpush1.bf16.msra.mxu0 %v4985_v39  ;;  %2905 = vmatpush1.bf16.msra.mxu1 %v4987_v40 }
 0xa4e   :  { %2865 = vmatprep.subr.bf16.mxu0 %v4993_v41  ;;  %2906 = vmatprep.subr.bf16.mxu1 %v4995_v42 }
 0xa51   :  { %2866 = vmatpush1.bf16.msra.mxu0 %v4997_v14  ;;  %2907 = vmatpush1.bf16.msra.mxu1 %v4999_v43 }
 0xa52   :  { %2867 = vmatprep.subr.bf16.mxu0 %v5005_v45  ;;  %2908 = vmatprep.subr.bf16.mxu1 %v5007_v46 }
 0xa55   :  { %2868 = vmatpush1.bf16.msra.mxu0 %v5009_v48  ;;  %2909 = vmatpush1.bf16.msra.mxu1 %v5011_v6 }
 0xa56   :  { %2869 = vmatprep.subr.bf16.mxu0 %v5013_v54  ;;  %2910 = vmatprep.subr.bf16.mxu1 %v5015_v55 }
 0xa59   :  { %2870 = vmatpush1.bf16.msra.mxu0 %v5021_v2  ;;  %2911 = vmatpush1.bf16.msra.mxu1 %v5023_v59 }
 0xa5a   :  { %2871 = vmatprep.subr.bf16.mxu0 %v5029_v61  ;;  %2912 = vmatprep.subr.bf16.mxu1 %v5031_v63 }
 0xa5d   :  { %2872 = vmatpush1.bf16.msra.mxu0 %v5033_v1  ;;  %2913 = vmatpush1.bf16.msra.mxu1 %v5035_v17 }
 0xa5e   :  { %2873 = vmatprep.subr.bf16.mxu0 %v5037_v19  ;;  %2914 = vmatprep.subr.bf16.mxu1 %v5039_v24 }
 0xa61   :  { %2874 = vmatpush1.bf16.msra.mxu0 %v5045_v36  ;;  %2915 = vmatpush1.bf16.msra.mxu1 %v5047_v37 }
 0xa62   :  { %2978 = vmatprep.subr.bf16.mxu0 %v4957_v10  ;;  %3019 = vmatprep.subr.bf16.mxu1 %v4959_v12 }
 0xb04   :  { %v2774_v62 = vpop.f32.mrf.mxu0  ;;  %v2815_v29 = vpop.f32.mrf.mxu1 }
 0xb05   :  { %v2822_v34 = vadd.f32 %v2774_v62, %v2736_v16  ;;  %v2824_v33 = vadd.f32 %v2815_v29, %v2738_v9 }
 0xb06   :  { %v2776_v35 = vpop.f32.mrf.mxu0  ;;  %v2817_v30 = vpop.f32.mrf.mxu1 }
 0xb07   :  { %v3668_v60 = vmul.f32 -1.442695, %v2822_v34  ;;  %v2823_v26 = vadd.f32 %v2776_v35, %v2737_v58  ;;  %v2825_v47 = vadd.f32 %v2817_v30, %v2739_v53 }
 0xb08   :  { %v2778_v3 = vpop.f32.mrf.mxu0  ;;  %v2819_v44 = vpop.f32.mrf.mxu1 }
 0xb09   :  { %4092 = vpow2.f32 %v3668_v60  ;;  %v3669_v13 = vmul.f32 -1.442695, %v2823_v26  ;;  %v3670_v23 = vmul.f32 -1.442695, %v2825_v47 }
 0xb0a   :  { %v2779_v21 = vpop.f32.mrf.mxu0  ;;  %v2820_v27 = vpop.f32.mrf.mxu1 }
 0xb0b   :  { %4094 = vpow2.f32 %v3669_v13 }
 0xb0c   :  { %4096 = vtanh.f32 %v2824_v33 }
 0xb0d   :  { %4098 = vpow2.f32 %v3670_v23 }
 0xb16   :  { %v4093_v52 = vpop.eup %4092 }
 0xb17   :  { %v2829_v49 = vadd.f32 1.0, %v4093_v52 }
 0xb18   :  { %v4095_v32 = vpop.eup %4094 }
 0xb19   :  { %4100 = vrcp.f32 %v2829_v49  ;;  %v2835_v0 = vadd.f32 1.0, %v4095_v32  ;;  %v4097_v5 = vpop.eup %4096 }
 0xb1a   :  { %v4099_v15 = vpop.eup %4098 }
 0xb1b   :  { %4102 = vrcp.f32 %v2835_v0  ;;  %v2842_v58 = vadd.f32 1.0, %v4099_v15 }
 0xb1d   :  { %4104 = vrcp.f32 %v2842_v58 }
 0xb26   :  { %v4101_v16 = vpop.eup %4100 }
 0xb27   :  { %v2846_v62 = vmul.f32 %v4101_v16, %v4097_v5 }
 0xb28   :  { %v4103_v34 = vpop.eup %4102 }
 0xb29   :  { %v2845_v35 = vmul.f32 %v4103_v34, %v5244_v4 }
 0xb2a   :  { %v4105_v50 = vpop.eup %4104 }
 0xb2b   :  { %v5289_v30 = vadd.f32 %v2846_v62, %v2845_v35 }
 0xb2d   :  { %4106 = vtanh.f32 %v5289_v30 }
 0xb3a   :  { %v4107_v29 = vpop.eup %4106 }
 0xb3b   :  { %v2849_v60 = vmul.f32 %v4107_v29, %v4105_v50  ;;  %v5340_v29 = vld [vmem:[#allocation8 + $0x1e0] ss:$16 sps:$4 sm:$0xff]  }
 0xb3d   :  { %v2850_v26 = vpack.c.bf16 %v2849_v60, %v2849_v60  ;;  %v5346_v60 = vld [vmem:[#allocation8 + $0x1c4] ss:$16 sps:$4 sm:$0xff]  }
 0xb3f   :  { %3671 = vst [vmem:[%s5558_s7 + $0x8] sm:$0xf] %v2850_v26  ;;  %2892 = vmatmul.mubr.bf16.vlgmr.msra.gmra.mxu0 %v2850_v26  ;;  %2933 = vmatmul.mubr.bf16.vlgmr.msra.gmra.mxu1 %v2850_v26  ;;  %v5349_v26 = vld [vmem:[#allocation8 + $0x1cc] ss:$16 sps:$4 sm:$0xff]  }
 0xb40   :  { %2979 = vmatpush1.bf16.msra.mxu0 %v4961_v22  ;;  %3020 = vmatpush1.bf16.msra.mxu1 %v4963_v7  ;;  %v2855_v22 = vunpack.c.l.bf16 %v5110_v8 }
 0xb41   :  { %2980 = vmatprep.subr.bf16.mxu0 %v4969_v11  ;;  %3021 = vmatprep.subr.bf16.mxu1 %v4971_v28 }
 0xb42   :  { %3010 = vmatprep.mubr.bf16.mxu0 %v5590_v25  ;;  %3051 = vmatprep.mubr.bf16.mxu1 %v5590_v25 }
 0xb44   :  { %2981 = vmatpush1.bf16.msra.mxu0 %v4973_v20  ;;  %3022 = vmatpush1.bf16.msra.mxu1 %v4975_v18  ;;  %v2856_v20 = vunpack.c.h.bf16 %v5110_v8 }
 0xb45   :  { %2982 = vmatprep.subr.bf16.mxu0 %v4981_v31  ;;  %3023 = vmatprep.subr.bf16.mxu1 %v4983_v38 }
 0xb48   :  { %2983 = vmatpush1.bf16.msra.mxu0 %v4985_v39  ;;  %3024 = vmatpush1.bf16.msra.mxu1 %v4987_v40 }
 0xb49   :  { %2984 = vmatprep.subr.bf16.mxu0 %v4993_v41  ;;  %3025 = vmatprep.subr.bf16.mxu1 %v4995_v42 }
 0xb4c   :  { %2985 = vmatpush1.bf16.msra.mxu0 %v4997_v14  ;;  %3026 = vmatpush1.bf16.msra.mxu1 %v4999_v43 }
 0xb4d   :  { %2986 = vmatprep.subr.bf16.mxu0 %v5005_v45  ;;  %3027 = vmatprep.subr.bf16.mxu1 %v5007_v46 }
 0xb50   :  { %2987 = vmatpush1.bf16.msra.mxu0 %v5009_v48  ;;  %3028 = vmatpush1.bf16.msra.mxu1 %v5011_v6 }
 0xb51   :  { %2988 = vmatprep.subr.bf16.mxu0 %v5013_v54  ;;  %3029 = vmatprep.subr.bf16.mxu1 %v5015_v55 }
 0xb54   :  { %2989 = vmatpush1.bf16.msra.mxu0 %v5021_v2  ;;  %3030 = vmatpush1.bf16.msra.mxu1 %v5023_v59 }
 0xb55   :  { %2990 = vmatprep.subr.bf16.mxu0 %v5029_v61  ;;  %3031 = vmatprep.subr.bf16.mxu1 %v5031_v63 }
 0xb58   :  { %2991 = vmatpush1.bf16.msra.mxu0 %v5033_v1  ;;  %3032 = vmatpush1.bf16.msra.mxu1 %v5035_v17 }
 0xb59   :  { %2992 = vmatprep.subr.bf16.mxu0 %v5037_v19  ;;  %3033 = vmatprep.subr.bf16.mxu1 %v5039_v24 }
 0xb5c   :  { %2993 = vmatpush1.bf16.msra.mxu0 %v5045_v36  ;;  %3034 = vmatpush1.bf16.msra.mxu1 %v5047_v37 }
 0xb5d   :  { %3097 = vmatprep.subr.bf16.mxu0 %v4957_v10  ;;  %3138 = vmatprep.subr.bf16.mxu1 %v4959_v12  ;;  %v5614_v10 = vld [vmem:[#allocation13_spill] sm:$0xff] }
 0xb5e   :  { %v2858_v12 = vunpack.c.h.bf16 %v5614_v10  ;;  %v2857_v27 = vunpack.c.l.bf16 %v5614_v10 }
 0xbff   :  { %v2893_v7 = vpop.f32.mrf.mxu0  ;;  %v2934_v11 = vpop.f32.mrf.mxu1 }
 0xc00   :  { %v2941_v28 = vadd.f32 %v2893_v7, %v2855_v22  ;;  %v2943_v53 = vadd.f32 %v2934_v11, %v2857_v27  ;;  %v5354_v22 = vld [vmem:[#allocation8 + $0x1c0] ss:$16 sps:$4 sm:$0xff]   ;;  %v5357_v7 = vld [vmem:[#allocation8 + $0x1c8] ss:$16 sps:$4 sm:$0xff]   ;;  %v5360_v11 = vld [vmem:[#allocation8 + $0x1a4] ss:$16 sps:$4 sm:$0xff]  }
 0xc01   :  { %v2895_v18 = vpop.f32.mrf.mxu0  ;;  %v2936_v31 = vpop.f32.mrf.mxu1 }
 0xc02   :  { %v3672_v38 = vmul.f32 -1.442695, %v2941_v28  ;;  %v2942_v39 = vadd.f32 %v2895_v18, %v2856_v20  ;;  %v2944_v21 = vadd.f32 %v2936_v31, %v2858_v12  ;;  %v5363_v28 = vld [vmem:[#allocation8 + $0x1ac] ss:$16 sps:$4 sm:$0xff]   ;;  %v5366_v20 = vld [vmem:[#allocation8 + $0x1a0] ss:$16 sps:$4 sm:$0xff]  }
 0xc03   :  { %v2897_v40 = vpop.f32.mrf.mxu0  ;;  %v2938_v4 = vpop.f32.mrf.mxu1  ;;  %v5369_v18 = vld [vmem:[#allocation8 + $0x1a8] ss:$16 sps:$4 sm:$0xff]  }
 0xc04   :  { %4108 = vpow2.f32 %v3672_v38  ;;  %v3673_v3 = vmul.f32 -1.442695, %v2942_v39  ;;  %v3674_v47 = vmul.f32 -1.442695, %v2944_v21 }
 0xc05   :  { %v2898_v44 = vpop.f32.mrf.mxu0  ;;  %v2939_v13 = vpop.f32.mrf.mxu1 }
 0xc06   :  { %4110 = vpow2.f32 %v3673_v3 }
 0xc07   :  { %4112 = vtanh.f32 %v2943_v53 }
 0xc08   :  { %4114 = vpow2.f32 %v3674_v47 }
 0xc11   :  { %v4109_v9 = vpop.eup %4108 }
 0xc12   :  { %v2948_v8 = vadd.f32 1.0, %v4109_v9 }
 0xc13   :  { %v4111_v33 = vpop.eup %4110 }
 0xc14   :  { %4116 = vrcp.f32 %v2948_v8  ;;  %v2954_v23 = vadd.f32 1.0, %v4111_v33  ;;  %v4113_v52 = vpop.eup %4112 }
 0xc15   :  { %v4115_v49 = vpop.eup %4114 }
 0xc16   :  { %4118 = vrcp.f32 %v2954_v23  ;;  %v2961_v15 = vadd.f32 1.0, %v4115_v49  ;;  %v5421_v49 = vld [vmem:[#allocation8 + $0x184] ss:$16 sps:$4 sm:$0xff]  }
 0xc18   :  { %4120 = vrcp.f32 %v2961_v15  ;;  %v5433_v15 = vld [vmem:[#allocation8 + $0x164] ss:$16 sps:$4 sm:$0xff]  }
 0xc21   :  { %v4117_v32 = vpop.eup %4116 }
 0xc22   :  { %v2965_v0 = vmul.f32 %v4117_v32, %v4113_v52  ;;  %v5424_v32 = vld [vmem:[#allocation8 + $0x18c] ss:$16 sps:$4 sm:$0xff]  }
 0xc23   :  { %v4119_v5 = vpop.eup %4118 }
 0xc24   :  { %v2964_v16 = vmul.f32 %v4119_v5, %v5289_v30  ;;  %v5343_v30 = vld [vmem:[#allocation8 + $0x1e8] ss:$16 sps:$4 sm:$0xff]  }
 0xc25   :  { %v4121_v34 = vpop.eup %4120  ;;  %v5430_v5 = vld [vmem:[#allocation8 + $0x188] ss:$16 sps:$4 sm:$0xff]  }
 0xc26   :  { %v5334_v62 = vadd.f32 %v2965_v0, %v2964_v16  ;;  %v5427_v0 = vld [vmem:[#allocation8 + $0x180] ss:$16 sps:$4 sm:$0xff]   ;;  %v5436_v16 = vld [vmem:[#allocation8 + $0x16c] ss:$16 sps:$4 sm:$0xff]  }
 0xc28   :  { %4122 = vtanh.f32 %v5334_v62 }
 0xc35   :  { %v4123_v58 = vpop.eup %4122 }
 0xc36   :  { %v2968_v35 = vmul.f32 %v4123_v58, %v4121_v34  ;;  %v5442_v34 = vld [vmem:[#allocation8 + $0x168] ss:$16 sps:$4 sm:$0xff]   ;;  %v5445_v58 = vld [vmem:[#allocation8 + $0x144] ss:$16 sps:$4 sm:$0xff]  }
 0xc38   :  { %v2969_v50 = vpack.c.bf16 %v2968_v35, %v2968_v35  ;;  %v5448_v35 = vld [vmem:[#allocation8 + $0x14c] ss:$16 sps:$4 sm:$0xff]  }
 0xc3a   :  { %3675 = vst [vmem:[%s5558_s7 + $0xc] sm:$0xf] %v2969_v50  ;;  %3011 = vmatmul.mubr.bf16.vlgmr.msra.gmra.mxu0 %v2969_v50  ;;  %3052 = vmatmul.mubr.bf16.vlgmr.msra.gmra.mxu1 %v2969_v50  ;;  %v5451_v50 = vld [vmem:[#allocation8 + $0x140] ss:$16 sps:$4 sm:$0xff]  }
 0xc3b   :  { %3098 = vmatpush1.bf16.msra.mxu0 %v5340_v29  ;;  %3139 = vmatpush1.bf16.msra.mxu1 %v5343_v30 }
 0xc3c   :  { %3099 = vmatprep.subr.bf16.mxu0 %v5346_v60  ;;  %3140 = vmatprep.subr.bf16.mxu1 %v5349_v26 }
 0xc3d   :  { %3129 = vmatprep.mubr.bf16.mxu0 %v5590_v25  ;;  %3170 = vmatprep.mubr.bf16.mxu1 %v5590_v25 }
 0xc3f   :  { %3100 = vmatpush1.bf16.msra.mxu0 %v5354_v22  ;;  %3141 = vmatpush1.bf16.msra.mxu1 %v5357_v7 }
 0xc40   :  { %3101 = vmatprep.subr.bf16.mxu0 %v5360_v11  ;;  %3142 = vmatprep.subr.bf16.mxu1 %v5363_v28 }
 0xc43   :  { %3102 = vmatpush1.bf16.msra.mxu0 %v5366_v20  ;;  %3143 = vmatpush1.bf16.msra.mxu1 %v5369_v18 }
 0xc44   :  { %3103 = vmatprep.subr.bf16.mxu0 %v4993_v41  ;;  %3144 = vmatprep.subr.bf16.mxu1 %v4995_v42  ;;  %v5392_v41 = vld [vmem:[#allocation8 + $0x1e4] ss:$16 sps:$4 sm:$0xff]   ;;  %v5395_v42 = vld [vmem:[#allocation8 + $0x1ec] ss:$16 sps:$4 sm:$0xff]  }
 0xc47   :  { %3104 = vmatpush1.bf16.msra.mxu0 %v4997_v14  ;;  %3145 = vmatpush1.bf16.msra.mxu1 %v4999_v43  ;;  %v5615_v14 = vld [vmem:[#allocation14_spill] sm:$0xff] }
 0xc48   :  { %3105 = vmatprep.subr.bf16.mxu0 %v5005_v45  ;;  %3146 = vmatprep.subr.bf16.mxu1 %v5007_v46  ;;  %v2974_v43 = vunpack.c.l.bf16 %v5615_v14 }
 0xc4b   :  { %3106 = vmatpush1.bf16.msra.mxu0 %v5009_v48  ;;  %3147 = vmatpush1.bf16.msra.mxu1 %v5011_v6  ;;  %v2975_v6 = vunpack.c.h.bf16 %v5615_v14  ;;  %v5454_v14 = vld [vmem:[#allocation8 + $0x148] ss:$16 sps:$4 sm:$0xff]  }
 0xc4c   :  { %3107 = vmatprep.subr.bf16.mxu0 %v5013_v54  ;;  %3148 = vmatprep.subr.bf16.mxu1 %v5015_v55 }
 0xc4f   :  { %3108 = vmatpush1.bf16.msra.mxu0 %v5021_v2  ;;  %3149 = vmatpush1.bf16.msra.mxu1 %v5023_v59 }
 0xc50   :  { %3109 = vmatprep.subr.bf16.mxu0 %v5029_v61  ;;  %3150 = vmatprep.subr.bf16.mxu1 %v5031_v63 }
 0xc53   :  { %3110 = vmatpush1.bf16.msra.mxu0 %v5033_v1  ;;  %3151 = vmatpush1.bf16.msra.mxu1 %v5035_v17 }
 0xc54   :  { %3111 = vmatprep.subr.bf16.mxu0 %v5037_v19  ;;  %3152 = vmatprep.subr.bf16.mxu1 %v5039_v24  ;;  %v5616_v24 = vld [vmem:[#allocation15_spill] sm:$0xff] }
 0xc55   :  { %v2976_v31 = vunpack.c.l.bf16 %v5616_v24 }
 0xc57   :  { %3112 = vmatpush1.bf16.msra.mxu0 %v5045_v36  ;;  %3153 = vmatpush1.bf16.msra.mxu1 %v5047_v37  ;;  %v2977_v36 = vunpack.c.h.bf16 %v5616_v24 }
 0xc58   :  { %3216 = vmatprep.subr.bf16.mxu0 %v5392_v41  ;;  %3257 = vmatprep.subr.bf16.mxu1 %v5395_v42 }
 0xcfa   :  { %v3012_v45 = vpop.f32.mrf.mxu0  ;;  %v3053_v46 = vpop.f32.mrf.mxu1 }
 0xcfb   :  { %v3060_v48 = vadd.f32 %v3012_v45, %v2974_v43  ;;  %v3062_v38 = vadd.f32 %v3053_v46, %v2976_v31  ;;  %v5457_v43 = vld [vmem:[#allocation8 + $0x124] ss:$16 sps:$4 sm:$0xff]   ;;  %v5460_v45 = vld [vmem:[#allocation8 + $0x12c] ss:$16 sps:$4 sm:$0xff]   ;;  %v5463_v46 = vld [vmem:[#allocation8 + $0x120] ss:$16 sps:$4 sm:$0xff]  }
 0xcfc   :  { %v3014_v54 = vpop.f32.mrf.mxu0  ;;  %v3055_v55 = vpop.f32.mrf.mxu1 }
 0xcfd   :  { %v3676_v2 = vmul.f32 -1.442695, %v3060_v48  ;;  %v3061_v59 = vadd.f32 %v3014_v54, %v2975_v6  ;;  %v3063_v37 = vadd.f32 %v3055_v55, %v2977_v36  ;;  %v5466_v48 = vld [vmem:[#allocation8 + $0x128] ss:$16 sps:$4 sm:$0xff]   ;;  %v5469_v6 = vld [vmem:[#allocation8 + $0x104] ss:$16 sps:$4 sm:$0xff]  }
 0xcfe   :  { %v3016_v61 = vpop.f32.mrf.mxu0  ;;  %v3057_v63 = vpop.f32.mrf.mxu1  ;;  %v5472_v54 = vld [vmem:[#allocation8 + $0x10c] ss:$16 sps:$4 sm:$0xff]   ;;  %v5475_v55 = vld [vmem:[#allocation8 + $0x100] ss:$16 sps:$4 sm:$0xff]  }
 0xcff   :  { %4124 = vpow2.f32 %v3676_v2  ;;  %v3677_v1 = vmul.f32 -1.442695, %v3061_v59  ;;  %v3678_v39 = vmul.f32 -1.442695, %v3063_v37  ;;  %v5478_v2 = vld [vmem:[#allocation8 + $0x108] ss:$16 sps:$4 sm:$0xff]  }
 0xd00   :  { %v3017_v17 = vpop.f32.mrf.mxu0  ;;  %v3058_v19 = vpop.f32.mrf.mxu1  ;;  %v5617_v59 = vld [vmem:[#allocation11_spill] sm:$0xff]  ;;  %v5618_v63 = vld [vmem:[#allocation12_spill] sm:$0xff] }
 0xd01   :  { %4126 = vpow2.f32 %v3677_v1  ;;  %v2107_v61 = vadd.f32 %v5617_v59, %v5081_v56  ;;  %v5619_v1 = vld [vmem:[#allocation16_spill] sm:$0xff] }
 0xd02   :  { %4128 = vtanh.f32 %v3062_v38  ;;  %v2105_v17 = vadd.f32 %v5619_v1, %v5618_v63 }
 0xd03   :  { %4130 = vpow2.f32 %v3678_v39  ;;  %v5620_v39 = vld [vmem:[#allocation18_spill] sm:$0xff] }
 0xd04   :  { %v3720_v19 = vpack.c.bf16 %v2107_v61, %v2105_v17 }
 0xd06   :  { %v3093_v24 = vunpack.c.l.bf16 %v3720_v19  ;;  %v3094_v38 = vunpack.c.h.bf16 %v3720_v19 }
 0xd0c   :  { %v4125_v40 = vpop.eup %4124 }
 0xd0d   :  { %v3067_v4 = vadd.f32 1.0, %v4125_v40  ;;  %v2180_v40 = vadd.f32 %v5620_v39, %v5085_v57 }
 0xd0e   :  { %v4127_v3 = vpop.eup %4126 }
 0xd0f   :  { %4132 = vrcp.f32 %v3067_v4  ;;  %v3073_v44 = vadd.f32 1.0, %v4127_v3  ;;  %v4129_v13 = vpop.eup %4128 }
 0xd10   :  { %v4131_v10 = vpop.eup %4130 }
 0xd11   :  { %4134 = vrcp.f32 %v3073_v44  ;;  %v3080_v53 = vadd.f32 1.0, %v4131_v10 }
 0xd13   :  { %4136 = vrcp.f32 %v3080_v53 }
 0xd1c   :  { %v4133_v12 = vpop.eup %4132 }
 0xd1d   :  { %v3084_v21 = vmul.f32 %v4133_v12, %v4129_v13 }
 0xd1e   :  { %v4135_v27 = vpop.eup %4134 }
 0xd1f   :  { %v3083_v47 = vmul.f32 %v4135_v27, %v5334_v62  ;;  %v5439_v62 = vld [vmem:[#allocation8 + $0x160] ss:$16 sps:$4 sm:$0xff]  }
 0xd20   :  { %v4137_v8 = vpop.eup %4136 }
 0xd21   :  { %v5403_v9 = vadd.f32 %v3084_v21, %v3083_v47 }
 0xd23   :  { %4138 = vtanh.f32 %v5403_v9 }
 0xd30   :  { %v4139_v33 = vpop.eup %4138 }
 0xd31   :  { %v3087_v23 = vmul.f32 %v4139_v33, %v4137_v8 }
 0xd33   :  { %v3088_v52 = vpack.c.bf16 %v3087_v23, %v3087_v23 }
 0xd35   :  { %3679 = vst [vmem:[%s5558_s7 + $0x10] sm:$0xf] %v3088_v52  ;;  %3130 = vmatmul.mubr.bf16.vlgmr.msra.gmra.mxu0 %v3088_v52  ;;  %3171 = vmatmul.mubr.bf16.vlgmr.msra.gmra.mxu1 %v3088_v52 }
 0xd36   :  { %3217 = vmatpush1.bf16.msra.mxu0 %v5340_v29  ;;  %3258 = vmatpush1.bf16.msra.mxu1 %v5343_v30 }
 0xd37   :  { %3218 = vmatprep.subr.bf16.mxu0 %v5346_v60  ;;  %3259 = vmatprep.subr.bf16.mxu1 %v5349_v26 }
 0xd38   :  { %3248 = vmatprep.mubr.bf16.mxu0 %v5590_v25  ;;  %3289 = vmatprep.mubr.bf16.mxu1 %v5590_v25 }
 0xd3a   :  { %3219 = vmatpush1.bf16.msra.mxu0 %v5354_v22  ;;  %3260 = vmatpush1.bf16.msra.mxu1 %v5357_v7 }
 0xd3b   :  { %3220 = vmatprep.subr.bf16.mxu0 %v5360_v11  ;;  %3261 = vmatprep.subr.bf16.mxu1 %v5363_v28 }
 0xd3e   :  { %3221 = vmatpush1.bf16.msra.mxu0 %v5366_v20  ;;  %3262 = vmatpush1.bf16.msra.mxu1 %v5369_v18 }
 0xd3f   :  { %3222 = vmatprep.subr.bf16.mxu0 %v5421_v49  ;;  %3263 = vmatprep.subr.bf16.mxu1 %v5424_v32 }
 0xd42   :  { %3223 = vmatpush1.bf16.msra.mxu0 %v5427_v0  ;;  %3264 = vmatpush1.bf16.msra.mxu1 %v5430_v5 }
 0xd43   :  { %3224 = vmatprep.subr.bf16.mxu0 %v5433_v15  ;;  %3265 = vmatprep.subr.bf16.mxu1 %v5436_v16 }
 0xd46   :  { %3225 = vmatpush1.bf16.msra.mxu0 %v5439_v62  ;;  %3266 = vmatpush1.bf16.msra.mxu1 %v5442_v34 }
 0xd47   :  { %3226 = vmatprep.subr.bf16.mxu0 %v5445_v58  ;;  %3267 = vmatprep.subr.bf16.mxu1 %v5448_v35 }
 0xd4a   :  { %3227 = vmatpush1.bf16.msra.mxu0 %v5451_v50  ;;  %3268 = vmatpush1.bf16.msra.mxu1 %v5454_v14 }
 0xd4b   :  { %3228 = vmatprep.subr.bf16.mxu0 %v5457_v43  ;;  %3269 = vmatprep.subr.bf16.mxu1 %v5460_v45 }
 0xd4e   :  { %3229 = vmatpush1.bf16.msra.mxu0 %v5463_v46  ;;  %3270 = vmatpush1.bf16.msra.mxu1 %v5466_v48 }
 0xd4f   :  { %3230 = vmatprep.subr.bf16.mxu0 %v5469_v6  ;;  %3271 = vmatprep.subr.bf16.mxu1 %v5472_v54 }
 0xd52   :  { %3231 = vmatpush1.bf16.msra.mxu0 %v5475_v55  ;;  %3272 = vmatpush1.bf16.msra.mxu1 %v5478_v2 }
 0xd53   :  { %3335 = vmatprep.subr.bf16.mxu0 %v5392_v41  ;;  %3376 = vmatprep.subr.bf16.mxu1 %v5395_v42  ;;  %v5621_v42 = vld [vmem:[#allocation17_spill] sm:$0xff] }
 0xd54   :  { %v2178_v13 = vadd.f32 %v5621_v42, %v5077_v51 }
 0xd56   :  { %v3721_v21 = vpack.c.bf16 %v2180_v40, %v2178_v13 }
 0xd58   :  { %v3096_v47 = vunpack.c.h.bf16 %v3721_v21  ;;  %v3095_v33 = vunpack.c.l.bf16 %v3721_v21 }
 0xdf5   :  { %v3131_v36 = vpop.f32.mrf.mxu0  ;;  %v3172_v37 = vpop.f32.mrf.mxu1 }
 0xdf6   :  { %v3179_v31 = vadd.f32 %v3131_v36, %v3093_v24  ;;  %v3181_v23 = vadd.f32 %v3172_v37, %v3095_v33 }
 0xdf7   :  { %v3133_v4 = vpop.f32.mrf.mxu0  ;;  %v3174_v3 = vpop.f32.mrf.mxu1 }
 0xdf8   :  { %v3680_v41 = vmul.f32 -1.442695, %v3179_v31  ;;  %v3180_v44 = vadd.f32 %v3133_v4, %v3094_v38  ;;  %v3182_v8 = vadd.f32 %v3174_v3, %v3096_v47 }
 0xdf9   :  { %v3135_v56 = vpop.f32.mrf.mxu0  ;;  %v3176_v10 = vpop.f32.mrf.mxu1 }
 0xdfa   :  { %4140 = vpow2.f32 %v3680_v41  ;;  %v3681_v12 = vmul.f32 -1.442695, %v3180_v44  ;;  %v3682_v57 = vmul.f32 -1.442695, %v3182_v8  ;;  %v5624_v56 = vld [vmem:[#allocation21_spill] sm:$0xff] }
 0xdfb   :  { %v3136_v27 = vpop.f32.mrf.mxu0  ;;  %v3177_v53 = vpop.f32.mrf.mxu1  ;;  %v3331_v10 = vunpack.c.l.bf16 %v5624_v56 }
 0xdfc   :  { %4142 = vpow2.f32 %v3681_v12  ;;  %v3332_v53 = vunpack.c.h.bf16 %v5624_v56 }
 0xdfd   :  { %4144 = vtanh.f32 %v3181_v23 }
 0xdfe   :  { %4146 = vpow2.f32 %v3682_v57 }
 0xe07   :  { %v4141_v52 = vpop.eup %4140 }
 0xe08   :  { %v3186_v59 = vadd.f32 1.0, %v4141_v52 }
 0xe09   :  { %v4143_v61 = vpop.eup %4142 }
 0xe0a   :  { %4148 = vrcp.f32 %v3186_v59  ;;  %v3192_v51 = vadd.f32 1.0, %v4143_v61  ;;  %v4145_v63 = vpop.eup %4144 }
 0xe0b   :  { %v4147_v1 = vpop.eup %4146 }
 0xe0c   :  { %4150 = vrcp.f32 %v3192_v51  ;;  %v3199_v36 = vadd.f32 1.0, %v4147_v1 }
 0xe0e   :  { %4152 = vrcp.f32 %v3199_v36 }
 0xe17   :  { %v4149_v17 = vpop.eup %4148 }
 0xe18   :  { %v3203_v19 = vmul.f32 %v4149_v17, %v4145_v63  ;;  %v5625_v63 = vld [vmem:[#allocation22_spill] sm:$0xff] }
 0xe19   :  { %v4151_v24 = vpop.eup %4150  ;;  %v3334_v1 = vunpack.c.h.bf16 %v5625_v63 }
 0xe1a   :  { %v3202_v31 = vmul.f32 %v4151_v24, %v5403_v9 }
 0xe1b   :  { %v4153_v37 = vpop.eup %4152 }
 0xe1c   :  { %v5492_v38 = vadd.f32 %v3203_v19, %v3202_v31  ;;  %v3333_v19 = vunpack.c.l.bf16 %v5625_v63 }
 0xe1e   :  { %4154 = vtanh.f32 %v5492_v38 }
 0xe2b   :  { %v4155_v39 = vpop.eup %4154 }
 0xe2c   :  { %v3206_v40 = vmul.f32 %v4155_v39, %v4153_v37 }
 0xe2e   :  { %v3207_v4 = vpack.c.bf16 %v3206_v40, %v3206_v40 }
 0xe30   :  { %3683 = vst [vmem:[%s5558_s7 + $0x14] sm:$0xf] %v3207_v4  ;;  %3249 = vmatmul.mubr.bf16.vlgmr.msra.gmra.mxu0 %v3207_v4  ;;  %3290 = vmatmul.mubr.bf16.vlgmr.msra.gmra.mxu1 %v3207_v4 }
 0xe31   :  { %3336 = vmatpush1.bf16.msra.mxu0 %v5340_v29  ;;  %3377 = vmatpush1.bf16.msra.mxu1 %v5343_v30 }
 0xe32   :  { %3337 = vmatprep.subr.bf16.mxu0 %v5346_v60  ;;  %3378 = vmatprep.subr.bf16.mxu1 %v5349_v26 }
 0xe33   :  { %3367 = vmatprep.mubr.bf16.mxu0 %v5590_v25  ;;  %3408 = vmatprep.mubr.bf16.mxu1 %v5590_v25  ;;  %v5622_v25 = vld [vmem:[#allocation19_spill] sm:$0xff] }
 0xe34   :  { %v3212_v29 = vunpack.c.l.bf16 %v5622_v25 }
 0xe35   :  { %3338 = vmatpush1.bf16.msra.mxu0 %v5354_v22  ;;  %3379 = vmatpush1.bf16.msra.mxu1 %v5357_v7  ;;  %v3213_v22 = vunpack.c.h.bf16 %v5622_v25 }
 0xe36   :  { %3339 = vmatprep.subr.bf16.mxu0 %v5360_v11  ;;  %3380 = vmatprep.subr.bf16.mxu1 %v5363_v28 }
 0xe39   :  { %3340 = vmatpush1.bf16.msra.mxu0 %v5366_v20  ;;  %3381 = vmatpush1.bf16.msra.mxu1 %v5369_v18 }
 0xe3a   :  { %3341 = vmatprep.subr.bf16.mxu0 %v5421_v49  ;;  %3382 = vmatprep.subr.bf16.mxu1 %v5424_v32 }
 0xe3d   :  { %3342 = vmatpush1.bf16.msra.mxu0 %v5427_v0  ;;  %3383 = vmatpush1.bf16.msra.mxu1 %v5430_v5  ;;  %v5623_v5 = vld [vmem:[#allocation20_spill] sm:$0xff] }
 0xe3e   :  { %3343 = vmatprep.subr.bf16.mxu0 %v5433_v15  ;;  %3384 = vmatprep.subr.bf16.mxu1 %v5436_v16  ;;  %v3215_v15 = vunpack.c.h.bf16 %v5623_v5 }
 0xe41   :  { %3344 = vmatpush1.bf16.msra.mxu0 %v5439_v62  ;;  %3385 = vmatpush1.bf16.msra.mxu1 %v5442_v34  ;;  %v3214_v62 = vunpack.c.l.bf16 %v5623_v5 }
 0xe42   :  { %3345 = vmatprep.subr.bf16.mxu0 %v5445_v58  ;;  %3386 = vmatprep.subr.bf16.mxu1 %v5448_v35 }
 0xe45   :  { %3346 = vmatpush1.bf16.msra.mxu0 %v5451_v50  ;;  %3387 = vmatpush1.bf16.msra.mxu1 %v5454_v14 }
 0xe46   :  { %3347 = vmatprep.subr.bf16.mxu0 %v5457_v43  ;;  %3388 = vmatprep.subr.bf16.mxu1 %v5460_v45 }
 0xe49   :  { %3348 = vmatpush1.bf16.msra.mxu0 %v5463_v46  ;;  %3389 = vmatpush1.bf16.msra.mxu1 %v5466_v48 }
 0xe4a   :  { %3349 = vmatprep.subr.bf16.mxu0 %v5469_v6  ;;  %3390 = vmatprep.subr.bf16.mxu1 %v5472_v54 }
 0xe4d   :  { %3350 = vmatpush1.bf16.msra.mxu0 %v5475_v55  ;;  %3391 = vmatpush1.bf16.msra.mxu1 %v5478_v2 }
 0xef0   :  { %v3250_v30 = vpop.f32.mrf.mxu0  ;;  %v3291_v60 = vpop.f32.mrf.mxu1 }
 0xef1   :  { %v3298_v26 = vadd.f32 %v3250_v30, %v3212_v29  ;;  %v3300_v34 = vadd.f32 %v3291_v60, %v3214_v62 }
 0xef2   :  { %v3252_v7 = vpop.f32.mrf.mxu0  ;;  %v3293_v11 = vpop.f32.mrf.mxu1 }
 0xef3   :  { %v3684_v28 = vmul.f32 -1.442695, %v3298_v26  ;;  %v3299_v20 = vadd.f32 %v3252_v7, %v3213_v22  ;;  %v3301_v16 = vadd.f32 %v3293_v11, %v3215_v15 }
 0xef4   :  { %v3254_v18 = vpop.f32.mrf.mxu0  ;;  %v3295_v9 = vpop.f32.mrf.mxu1 }
 0xef5   :  { %4156 = vpow2.f32 %v3684_v28  ;;  %v3685_v49 = vmul.f32 -1.442695, %v3299_v20  ;;  %v3686_v58 = vmul.f32 -1.442695, %v3301_v16 }
 0xef6   :  { %v3255_v32 = vpop.f32.mrf.mxu0  ;;  %v3296_v0 = vpop.f32.mrf.mxu1 }
 0xef7   :  { %4158 = vpow2.f32 %v3685_v49 }
 0xef8   :  { %4160 = vtanh.f32 %v3300_v34 }
 0xef9   :  { %4162 = vpow2.f32 %v3686_v58 }
 0xf02   :  { %v4157_v35 = vpop.eup %4156 }
 0xf03   :  { %v3305_v50 = vadd.f32 1.0, %v4157_v35 }
 0xf04   :  { %v4159_v14 = vpop.eup %4158 }
 0xf05   :  { %4164 = vrcp.f32 %v3305_v50  ;;  %v3311_v43 = vadd.f32 1.0, %v4159_v14  ;;  %v4161_v45 = vpop.eup %4160 }
 0xf06   :  { %v4163_v46 = vpop.eup %4162 }
 0xf07   :  { %4166 = vrcp.f32 %v3311_v43  ;;  %v3318_v55 = vadd.f32 1.0, %v4163_v46 }
 0xf09   :  { %4168 = vrcp.f32 %v3318_v55 }
 0xf12   :  { %v4165_v48 = vpop.eup %4164 }
 0xf13   :  { %v3322_v6 = vmul.f32 %v4165_v48, %v4161_v45 }
 0xf14   :  { %v4167_v54 = vpop.eup %4166 }
 0xf15   :  { %v3321_v2 = vmul.f32 %v4167_v54, %v5492_v38 }
 0xf16   :  { %v4169_v41 = vpop.eup %4168 }
 0xf17   :  { %v3323_v3 = vadd.f32 %v3322_v6, %v3321_v2 }
 0xf19   :  { %4170 = vtanh.f32 %v3323_v3 }
 0xf26   :  { %v4171_v44 = vpop.eup %4170 }
 0xf27   :  { %v3325_v42 = vmul.f32 %v4171_v44, %v4169_v41 }
 0xf29   :  { %v3326_v13 = vpack.c.bf16 %v3325_v42, %v3325_v42 }
 0xf2b   :  { %3687 = vst [vmem:[%s5558_s7 + $0x18] sm:$0xf] %v3326_v13  ;;  %3368 = vmatmul.mubr.bf16.vlgmr.msra.gmra.mxu0 %v3326_v13  ;;  %3409 = vmatmul.mubr.bf16.vlgmr.msra.gmra.mxu1 %v3326_v13 }
 0xfeb   :  { %v3369_v12 = vpop.f32.mrf.mxu0  ;;  %v3410_v21 = vpop.f32.mrf.mxu1 }
 0xfec   :  { %v3417_v27 = vadd.f32 %v3369_v12, %v3331_v10  ;;  %v3419_v24 = vadd.f32 %v3410_v21, %v3333_v19 }
 0xfed   :  { %v3371_v47 = vpop.f32.mrf.mxu0  ;;  %v3412_v8 = vpop.f32.mrf.mxu1 }
 0xfee   :  { %v3688_v33 = vmul.f32 -1.442695, %v3417_v27  ;;  %v3418_v23 = vadd.f32 %v3371_v47, %v3332_v53  ;;  %v3420_v17 = vadd.f32 %v3412_v8, %v3334_v1 }
 0xfef   :  { %v3373_v57 = vpop.f32.mrf.mxu0  ;;  %v3414_v52 = vpop.f32.mrf.mxu1 }
 0xff0   :  { %4172 = vpow2.f32 %v3688_v33  ;;  %v3689_v59 = vmul.f32 -1.442695, %v3418_v23  ;;  %v3690_v36 = vmul.f32 -1.442695, %v3420_v17 }
 0xff1   :  { %v3374_v61 = vpop.f32.mrf.mxu0  ;;  %v3415_v51 = vpop.f32.mrf.mxu1 }
 0xff2   :  { %4174 = vpow2.f32 %v3689_v59 }
 0xff3   :  { %4176 = vtanh.f32 %v3419_v24 }
 0xff4   :  { %4178 = vpow2.f32 %v3690_v36 }
 0xffd   :  { %v4173_v31 = vpop.eup %4172 }
 0xffe   :  { %v3424_v38 = vadd.f32 1.0, %v4173_v31 }
 0xfff   :  { %v4175_v37 = vpop.eup %4174 }
0x1000   :  { %4180 = vrcp.f32 %v3424_v38  ;;  %v3430_v39 = vadd.f32 1.0, %v4175_v37  ;;  %v4177_v40 = vpop.eup %4176 }
0x1001   :  { %v4179_v4 = vpop.eup %4178 }
0x1002   :  { %4182 = vrcp.f32 %v3430_v39  ;;  %v3437_v60 = vadd.f32 1.0, %v4179_v4 }
0x1004   :  { %4184 = vrcp.f32 %v3437_v60 }
0x100d   :  { %v4181_v25 = vpop.eup %4180 }
0x100e   :  { %v3441_v29 = vmul.f32 %v4181_v25, %v4177_v40 }
0x100f   :  { %v4183_v30 = vpop.eup %4182 }
0x1010   :  { %v3440_v26 = vmul.f32 %v4183_v30, %v3323_v3 }
0x1011   :  { %v4185_v7 = vpop.eup %4184 }
0x1012   :  { %v3442_v22 = vadd.f32 %v3441_v29, %v3440_v26 }
0x1014   :  { %4186 = vtanh.f32 %v3442_v22  ;;  %3693 = vst [vmem:[%s5560_s9 + $0x8] sm:$0xff] %v3442_v22 }
0x1021   :  { %v4187_v11 = vpop.eup %4186 }
0x1022   :  { %v3444_v28 = vmul.f32 %v4187_v11, %v4185_v7 }
0x1024   :  { %v3445_v20 = vpack.c.bf16 %v3444_v28, %v3444_v28  ;;  %3692 = vst [vmem:[%s5559_s8 + $0x8] sm:$0xff] %v3444_v28 }
0x1026   :  { %3691 = vst [vmem:[%s5558_s7 + $0x1c] sm:$0xf] %v3445_v20 }
0x1027   :  { %3464 = vsyncpa [#allocation5], 1 }
0x1028   :  { %3465 = vsyncpa [#allocation7], 1 }

</bundles_post_ra>
